<compile_context>
chip_gen: v6e
topology: v6e:2x2x1
jax: 0.10.0
libtpu: 0.0.40
codegen_flags: <defaults>
</compile_context>

<pallas_src>
import functools

import jax
import jax.numpy as jnp
from jax.experimental import pallas as pl
from jax.experimental.pallas import tpu as pltpu

VGG19_CFG = [64, 64, 'M', 128, 128, 'M', 256, 256, 256, 256, 'M',
             512, 512, 512, 512, 'M', 512, 512, 512, 512, 'M']


def _vmem_limit_bytes():
    """Per-generation VMEM budget: ~80% of physical (v5e/v6e ~102 MiB, v7x ~51 MiB)."""
    try:
        info = pltpu.get_tpu_info()
        cap = getattr(info, "vmem_capacity_bytes", None)
        if cap:
            return int(cap * 0.8)
    except Exception:
        pass
    return 64 * 1024 * 1024


_VMEM_LIMIT = _vmem_limit_bytes()
# f32 accumulator budget per conv tile (review: 4-8 MiB on v5e/v6e, 2-4 MiB on v7x).
_ACC_BUDGET = (4 * 1024 * 1024 if _VMEM_LIMIT >= 96 * 1024 * 1024
               else 2 * 1024 * 1024)


def _pick_block_rows(H, W, Cout, pool):
    """Largest divisor R of H (even when pooling, preferring multiples of 8)
    whose f32 accumulator tile R*W*Cout*4 fits the per-generation budget."""
    cap = max(2 if pool else 1, _ACC_BUDGET // max(1, W * Cout * 4))
    divs = [d for d in range(1, H + 1)
            if H % d == 0 and (not pool or d % 2 == 0)]
    ok = [d for d in divs if d <= cap] or [min(divs)]
    ok8 = [d for d in ok if d % 8 == 0]
    return max(ok8) if ok8 else max(ok)


# --------------------- conv3x3 + bias + ReLU (+ maxpool) -------------------- #

def _conv_kernel(x_ref, w_ref, b_ref, o_ref, xp_ref, *pool_scratch,
                 R, H, W, Cout, pool, k_pack):
    """Fused 3x3 conv (pad 1, stride 1) + bias + ReLU [+ 2x2/2 maxpool] on R rows.

    x_ref : (1, H, W, Cin)      bf16, full sample, resident across the r axis
    w_ref : (3, 3*Cin, Cout) or (9, Cin, Cout)  bf16, grid-resident
    b_ref : (1, Cout)           f32,  grid-resident
    o_ref : (1, R, W, Cout) or (1, R//2, W//2, Cout)  bf16
    xp_ref: (1, H+2, W+2, Cin)  bf16 scratch -- zero-padded copy built at r == 0
    pool_scratch: (yt, rm) bf16 scratches for the fused maxpool
    """
    Cin = x_ref.shape[3]
    Hp, Wp = H + 2, W + 2
    r = pl.program_id(1)

    # Build the zero-padded sample in VMEM once per sample (no HBM pad copy).
    @pl.when(r == 0)
    def _():
        zrow = jnp.zeros((1, 1, Wp, Cin), xp_ref.dtype)
        zcol = jnp.zeros((1, Hp, 1, Cin), xp_ref.dtype)
        xp_ref[:, 0:1, :, :] = zrow
        xp_ref[:, Hp - 1:Hp, :, :] = zrow
        xp_ref[:, :, 0:1, :] = zcol
        xp_ref[:, :, Wp - 1:Wp, :] = zcol
        xp_ref[:, 1:H + 1, 1:W + 1, :] = x_ref[...]

    row0 = pl.multiple_of(r * R, R)
    acc = None
    for dy in range(3):
        if k_pack:
            # Pack the 3 dx taps along K: one K=3*Cin dot per dy (better MXU
            # depth utilisation than 9 small-K dots on 64/128-channel layers).
            lhs = jnp.concatenate(
                [xp_ref[0, pl.ds(row0 + dy, R), dx:dx + W, :] for dx in range(3)],
                axis=-1).reshape(R * W, 3 * Cin)
            part = jnp.dot(lhs, w_ref[dy], preferred_element_type=jnp.float32)
            acc = part if acc is None else acc + part
        else:
            for dx in range(3):
                lhs = xp_ref[0, pl.ds(row0 + dy, R), dx:dx + W, :].reshape(R * W, Cin)
                part = jnp.dot(lhs, w_ref[dy * 3 + dx],
                               preferred_element_type=jnp.float32)
                acc = part if acc is None else acc + part

    y = jnp.maximum(acc + b_ref[...], 0.0)                     # bias + ReLU in f32

    if pool:
        yt_ref, rm_ref = pool_scratch
        Rp, Wo = R // 2, W // 2
        yt_ref[...] = y.reshape(1, R, W, Cout).astype(yt_ref.dtype)
        rm_ref[...] = jnp.maximum(yt_ref[:, pl.ds(0, Rp, 2), :, :],
                                  yt_ref[:, pl.ds(1, Rp, 2), :, :])
        o_ref[...] = jnp.maximum(rm_ref[:, :, pl.ds(0, Wo, 2), :],
                                 rm_ref[:, :, pl.ds(1, Wo, 2), :]
                                 ).astype(o_ref.dtype)
    else:
        o_ref[...] = y.reshape(1, R, W, Cout).astype(o_ref.dtype)


def conv3x3_relu(x_nhwc, w_hwio, b, pool):
    """3x3 conv (stride 1, pad 1) + bias + ReLU, optionally fused 2x2/2 maxpool.

    x_nhwc: (N, H, W, Cin); returns (N, H[/2], W[/2], Cout) bf16.
    """
    N, H, W, Cin = x_nhwc.shape
    Cout = w_hwio.shape[-1]
    if pool:
        assert H % 2 == 0 and W % 2 == 0, "fused VGG maxpool needs even dims"
    k_pack = (Cin % 8 == 0)
    R = _pick_block_rows(H, W, Cout, pool)
    Rp = R // 2 if pool else R
    Ho = H // 2 if pool else H
    Wo = W // 2 if pool else W

    x = x_nhwc.astype(jnp.bfloat16)
    wk = (w_hwio.reshape(3, 3 * Cin, Cout) if k_pack
          else w_hwio.reshape(9, Cin, Cout)).astype(jnp.bfloat16)
    b2 = b.reshape(1, Cout).astype(jnp.float32)

    scratch = [pltpu.VMEM((1, H + 2, W + 2, Cin), jnp.bfloat16)]
    if pool:
        scratch += [pltpu.VMEM((1, R, W, Cout), jnp.bfloat16),
                    pltpu.VMEM((1, R // 2, W, Cout), jnp.bfloat16)]

    kernel = functools.partial(_conv_kernel, R=R, H=H, W=W, Cout=Cout,
                               pool=pool, k_pack=k_pack)

    return pl.pallas_call(
        kernel,
        out_shape=jax.ShapeDtypeStruct((N, Ho, Wo, Cout), jnp.bfloat16),
        grid=(N, H // R),
        in_specs=[
            # full (unpadded) sample, constant over r -> single DMA per sample
            pl.BlockSpec((1, H, W, Cin), lambda n, r: (n, 0, 0, 0)),
            # weights + bias resident across the whole grid
            pl.BlockSpec(wk.shape, lambda n, r: (0, 0, 0)),
            pl.BlockSpec((1, Cout), lambda n, r: (0, 0)),
        ],
        out_specs=pl.BlockSpec((1, Rp, Wo, Cout), lambda n, r: (n, r, 0, 0)),
        scratch_shapes=scratch,
        compiler_params=pltpu.CompilerParams(
            # batch axis outermost + parallel so v7x's two TensorCores split it;
            # r is arbitrary (the padded-sample scratch is built at r == 0).
            dimension_semantics=("parallel", "arbitrary"),
            vmem_limit_bytes=_VMEM_LIMIT),
    )(x, wk, b2)


# ------------------------------ full network -------------------------------- #

def init_params(key):
    """Deterministic He-init with the exact torchvision VGG19 conv shapes."""
    params = []
    cin = 3
    for idx, v in enumerate(VGG19_CFG):
        if v == 'M':
            continue
        k = jax.random.fold_in(key, idx)
        w = jax.random.normal(k, (3, 3, cin, v), jnp.float32) * jnp.sqrt(2.0 / (9 * cin))
        b = jnp.zeros((v,), jnp.float32)
        params.append((w, b))
        cin = v
    return params


@jax.jit
def vgg19_features(x_nchw, params):
    # PyTorch NCHW -> NHWC for the TPU kernels.
    x = jnp.transpose(x_nchw, (0, 2, 3, 1))
    pi = 0
    i = 0
    while i < len(VGG19_CFG):
        v = VGG19_CFG[i]
        assert v != 'M'
        pool = (i + 1 < len(VGG19_CFG) and VGG19_CFG[i + 1] == 'M')
        w, b = params[pi]
        pi += 1
        x = conv3x3_relu(x, w, b, pool)
        i += 2 if pool else 1
    # back to NCHW / f32 to match the PyTorch module's output convention
    return jnp.transpose(x, (0, 3, 1, 2)).astype(jnp.float32)


# --------------------------------- checks ----------------------------------- #

def _ref_conv(x, w, b, pool):
    """Pure-JAX reference (same bf16 input rounding, f32 math)."""
    xr = x.astype(jnp.bfloat16).astype(jnp.float32)
    wr = w.astype(jnp.bfloat16).astype(jnp.float32)
    y = jax.lax.conv_general_dilated(
        xr, wr, window_strides=(1, 1), padding=((1, 1), (1, 1)),
        dimension_numbers=('NHWC', 'HWIO', 'NHWC'))
    y = jnp.maximum(y + b.reshape(1, 1, 1, -1), 0.0)
    if pool:
        y = jax.lax.reduce_window(y, -jnp.inf, jax.lax.max,
                                  (1, 2, 2, 1), (1, 2, 2, 1), 'VALID')
    return y


if __name__ == "__main__":
    key = jax.random.PRNGKey(0)

    # single-layer correctness checks (9-dot Cin=3 path; packed-K + fused pool path)
    for (cin, cout, hw, pool) in [(3, 32, 16, False), (64, 64, 16, True)]:
        kx = jax.random.fold_in(key, 10 * cin + int(pool))
        x = jax.random.normal(kx, (2, hw, hw, cin), jnp.float32)
        w = jax.random.normal(jax.random.fold_in(kx, 1), (3, 3, cin, cout),
                              jnp.float32) * jnp.sqrt(2.0 / (9 * cin))
        b = jax.random.normal(jax.random.fold_in(kx, 2), (cout,), jnp.float32) * 0.1
        got = jax.block_until_ready(conv3x3_relu(x, w, b, pool)).astype(jnp.float32)
        ref = _ref_conv(x, w, b, pool)
        assert got.shape == ref.shape, (got.shape, ref.shape)
        assert bool(jnp.allclose(got, ref, atol=3e-2, rtol=3e-2)), \
            float(jnp.max(jnp.abs(got - ref)))

    # full VGG19 feature extractor (smallest size valid for all 5 max-pools: 32)
    params = init_params(key)
    x = jax.random.normal(jax.random.fold_in(key, 1000), (2, 3, 32, 32), jnp.float32)
    out = jax.block_until_ready(vgg19_features(x, params))
    assert out.shape == (2, 512, 1, 1), out.shape
    assert bool(jnp.all(jnp.isfinite(out)))
    print("KERNEL_OK")
</pallas_src>

<mosaic_0001>
module attributes {stable_mosaic.version = 11 : i64} {
  func.func @_conv_kernel(%arg0: i32, %arg1: i32, %arg2: memref<1x16x16x3xbf16, #tpu.memory_space<vmem>>, %arg3: memref<9x3x32xbf16, #tpu.memory_space<vmem>>, %arg4: memref<1x32xf32, #tpu.memory_space<vmem>>, %arg5: memref<1x16x16x32xbf16, #tpu.memory_space<vmem>>, %arg6: memref<1x18x18x3xbf16, #tpu.memory_space<vmem>>) attributes {dimension_semantics = [#tpu.dimension_semantics<parallel>, #tpu.dimension_semantics<arbitrary>], iteration_bounds = array<i64: 2, 1>, scalar_prefetch = 0 : i64, scratch_operands = 1 : i64, tpu.core_type = #tpu.core_type<tc>, window_params = [{transform_indices = @transform_0, window_bounds = array<i64: 1, 16, 16, 3>}, {pipeline_mode = #tpu.pipeline_mode<synchronous>, transform_indices = @transform_1, window_bounds = array<i64: 9, 3, 32>}, {pipeline_mode = #tpu.pipeline_mode<synchronous>, transform_indices = @transform_2, window_bounds = array<i64: 1, 32>}, {transform_indices = @transform_3, window_bounds = array<i64: 1, 16, 16, 32>}]} {
    %c0_i32 = arith.constant 0 : i32
    %0 = arith.cmpi eq, %arg1, %c0_i32 : i32
    %1 = arith.extui %0 : i1 to i32
    %c0_i32_0 = arith.constant 0 : i32
    %2 = arith.cmpi ne, %1, %c0_i32_0 : i32
    scf.if %2 {
      %cst_68 = arith.constant 0.000000e+00 : bf16
      %93 = vector.broadcast %cst_68 : bf16 to vector<1x1x18x3xbf16>
      %cst_69 = arith.constant 0.000000e+00 : bf16
      %94 = vector.broadcast %cst_69 : bf16 to vector<1x18x1x3xbf16>
      %c0_70 = arith.constant 0 : index
      %c0_71 = arith.constant 0 : index
      %c0_72 = arith.constant 0 : index
      %c0_73 = arith.constant 0 : index
      %95 = vector.load %arg6[%c0_70, %c0_71, %c0_72, %c0_73] : memref<1x18x18x3xbf16, #tpu.memory_space<vmem>>, vector<1x1x18x3xbf16>
      tpu.vector_store %arg6[%c0_70, %c0_71, %c0_72, %c0_73], %93 {strides = array<i32>} : memref<1x18x18x3xbf16, #tpu.memory_space<vmem>>, vector<1x1x18x3xbf16>,
      %c0_74 = arith.constant 0 : index
      %c17 = arith.constant 17 : index
      %c0_75 = arith.constant 0 : index
      %c0_76 = arith.constant 0 : index
      %96 = vector.load %arg6[%c0_74, %c17, %c0_75, %c0_76] : memref<1x18x18x3xbf16, #tpu.memory_space<vmem>>, vector<1x1x18x3xbf16>
      tpu.vector_store %arg6[%c0_74, %c17, %c0_75, %c0_76], %93 {strides = array<i32>} : memref<1x18x18x3xbf16, #tpu.memory_space<vmem>>, vector<1x1x18x3xbf16>,
      %c0_77 = arith.constant 0 : index
      %c0_78 = arith.constant 0 : index
      %c0_79 = arith.constant 0 : index
      %c0_80 = arith.constant 0 : index
      %97 = vector.load %arg6[%c0_77, %c0_78, %c0_79, %c0_80] : memref<1x18x18x3xbf16, #tpu.memory_space<vmem>>, vector<1x18x1x3xbf16>
      tpu.vector_store %arg6[%c0_77, %c0_78, %c0_79, %c0_80], %94 {strides = array<i32>} : memref<1x18x18x3xbf16, #tpu.memory_space<vmem>>, vector<1x18x1x3xbf16>,
      %c0_81 = arith.constant 0 : index
      %c0_82 = arith.constant 0 : index
      %c17_83 = arith.constant 17 : index
      %c0_84 = arith.constant 0 : index
      %98 = vector.load %arg6[%c0_81, %c0_82, %c17_83, %c0_84] : memref<1x18x18x3xbf16, #tpu.memory_space<vmem>>, vector<1x18x1x3xbf16>
      tpu.vector_store %arg6[%c0_81, %c0_82, %c17_83, %c0_84], %94 {strides = array<i32>} : memref<1x18x18x3xbf16, #tpu.memory_space<vmem>>, vector<1x18x1x3xbf16>,
      %c0_85 = arith.constant 0 : index
      %c0_86 = arith.constant 0 : index
      %c0_87 = arith.constant 0 : index
      %c0_88 = arith.constant 0 : index
      %99 = vector.load %arg2[%c0_85, %c0_86, %c0_87, %c0_88] : memref<1x16x16x3xbf16, #tpu.memory_space<vmem>>, vector<1x16x16x3xbf16>
      %c0_89 = arith.constant 0 : index
      %c1_90 = arith.constant 1 : index
      %c1_91 = arith.constant 1 : index
      %c0_92 = arith.constant 0 : index
      %100 = vector.load %arg6[%c0_89, %c1_90, %c1_91, %c0_92] : memref<1x18x18x3xbf16, #tpu.memory_space<vmem>>, vector<1x16x16x3xbf16>
      tpu.vector_store %arg6[%c0_89, %c1_90, %c1_91, %c0_92], %99 {strides = array<i32>} : memref<1x18x18x3xbf16, #tpu.memory_space<vmem>>, vector<1x16x16x3xbf16>,
    } else {
    }
    %c16_i32 = arith.constant 16 : i32
    %3 = arith.muli %arg1, %c16_i32 : i32
    %4 = tpu.assume_multiple %3, 16 : i32
    %c0_i32_1 = arith.constant 0 : i32
    %5 = arith.addi %4, %c0_i32_1 : i32
    %c0 = arith.constant 0 : index
    %6 = arith.index_cast %5 : i32 to index
    %c0_2 = arith.constant 0 : index
    %c0_3 = arith.constant 0 : index
    %7 = vector.load %arg6[%c0, %6, %c0_2, %c0_3] : memref<1x18x18x3xbf16, #tpu.memory_space<vmem>>, vector<1x16x16x3xbf16>
    %8 = vector.shape_cast %7 : vector<1x16x16x3xbf16> to vector<16x16x3xbf16>
    %9 = vector.shape_cast %8 : vector<16x16x3xbf16> to vector<256x3xbf16>
    %c0_4 = arith.constant 0 : index
    %c0_5 = arith.constant 0 : index
    %c0_6 = arith.constant 0 : index
    %10 = vector.load %arg3[%c0_4, %c0_5, %c0_6] : memref<9x3x32xbf16, #tpu.memory_space<vmem>>, vector<1x3x32xbf16>
    %11 = vector.shape_cast %10 : vector<1x3x32xbf16> to vector<3x32xbf16>
    %cst = arith.constant dense<0.000000e+00> : vector<256x32xf32>
    %12 = tpu.matmul %9, %11, %cst {dimension_numbers = #tpu.dot_dimension_numbers<[1], [0], [0], [1], [0, 0, 1, 1], [], []>} : vector<256x3xbf16>, vector<3x32xbf16>, vector<256x32xf32> -> vector<256x32xf32>
    %c0_i32_7 = arith.constant 0 : i32
    %13 = arith.addi %4, %c0_i32_7 : i32
    %c0_8 = arith.constant 0 : index
    %14 = arith.index_cast %13 : i32 to index
    %c1 = arith.constant 1 : index
    %c0_9 = arith.constant 0 : index
    %15 = vector.load %arg6[%c0_8, %14, %c1, %c0_9] : memref<1x18x18x3xbf16, #tpu.memory_space<vmem>>, vector<1x16x16x3xbf16>
    %16 = vector.shape_cast %15 : vector<1x16x16x3xbf16> to vector<16x16x3xbf16>
    %17 = vector.shape_cast %16 : vector<16x16x3xbf16> to vector<256x3xbf16>
    %c1_10 = arith.constant 1 : index
    %c0_11 = arith.constant 0 : index
    %c0_12 = arith.constant 0 : index
    %18 = vector.load %arg3[%c1_10, %c0_11, %c0_12] : memref<9x3x32xbf16, #tpu.memory_space<vmem>>, vector<1x3x32xbf16>
    %19 = vector.shape_cast %18 : vector<1x3x32xbf16> to vector<3x32xbf16>
    %cst_13 = arith.constant dense<0.000000e+00> : vector<256x32xf32>
    %20 = tpu.matmul %17, %19, %cst_13 {dimension_numbers = #tpu.dot_dimension_numbers<[1], [0], [0], [1], [0, 0, 1, 1], [], []>} : vector<256x3xbf16>, vector<3x32xbf16>, vector<256x32xf32> -> vector<256x32xf32>
    %21 = arith.addf %12, %20 : vector<256x32xf32>
    %c0_i32_14 = arith.constant 0 : i32
    %22 = arith.addi %4, %c0_i32_14 : i32
    %c0_15 = arith.constant 0 : index
    %23 = arith.index_cast %22 : i32 to index
    %c2 = arith.constant 2 : index
    %c0_16 = arith.constant 0 : index
    %24 = vector.load %arg6[%c0_15, %23, %c2, %c0_16] : memref<1x18x18x3xbf16, #tpu.memory_space<vmem>>, vector<1x16x16x3xbf16>
    %25 = vector.shape_cast %24 : vector<1x16x16x3xbf16> to vector<16x16x3xbf16>
    %26 = vector.shape_cast %25 : vector<16x16x3xbf16> to vector<256x3xbf16>
    %c2_17 = arith.constant 2 : index
    %c0_18 = arith.constant 0 : index
    %c0_19 = arith.constant 0 : index
    %27 = vector.load %arg3[%c2_17, %c0_18, %c0_19] : memref<9x3x32xbf16, #tpu.memory_space<vmem>>, vector<1x3x32xbf16>
    %28 = vector.shape_cast %27 : vector<1x3x32xbf16> to vector<3x32xbf16>
    %cst_20 = arith.constant dense<0.000000e+00> : vector<256x32xf32>
    %29 = tpu.matmul %26, %28, %cst_20 {dimension_numbers = #tpu.dot_dimension_numbers<[1], [0], [0], [1], [0, 0, 1, 1], [], []>} : vector<256x3xbf16>, vector<3x32xbf16>, vector<256x32xf32> -> vector<256x32xf32>
    %30 = arith.addf %21, %29 : vector<256x32xf32>
    %c1_i32 = arith.constant 1 : i32
    %31 = arith.addi %4, %c1_i32 : i32
    %c0_21 = arith.constant 0 : index
    %32 = arith.index_cast %31 : i32 to index
    %c0_22 = arith.constant 0 : index
    %c0_23 = arith.constant 0 : index
    %33 = vector.load %arg6[%c0_21, %32, %c0_22, %c0_23] : memref<1x18x18x3xbf16, #tpu.memory_space<vmem>>, vector<1x16x16x3xbf16>
    %34 = vector.shape_cast %33 : vector<1x16x16x3xbf16> to vector<16x16x3xbf16>
    %35 = vector.shape_cast %34 : vector<16x16x3xbf16> to vector<256x3xbf16>
    %c3 = arith.constant 3 : index
    %c0_24 = arith.constant 0 : index
    %c0_25 = arith.constant 0 : index
    %36 = vector.load %arg3[%c3, %c0_24, %c0_25] : memref<9x3x32xbf16, #tpu.memory_space<vmem>>, vector<1x3x32xbf16>
    %37 = vector.shape_cast %36 : vector<1x3x32xbf16> to vector<3x32xbf16>
    %cst_26 = arith.constant dense<0.000000e+00> : vector<256x32xf32>
    %38 = tpu.matmul %35, %37, %cst_26 {dimension_numbers = #tpu.dot_dimension_numbers<[1], [0], [0], [1], [0, 0, 1, 1], [], []>} : vector<256x3xbf16>, vector<3x32xbf16>, vector<256x32xf32> -> vector<256x32xf32>
    %39 = arith.addf %30, %38 : vector<256x32xf32>
    %c1_i32_27 = arith.constant 1 : i32
    %40 = arith.addi %4, %c1_i32_27 : i32
    %c0_28 = arith.constant 0 : index
    %41 = arith.index_cast %40 : i32 to index
    %c1_29 = arith.constant 1 : index
    %c0_30 = arith.constant 0 : index
    %42 = vector.load %arg6[%c0_28, %41, %c1_29, %c0_30] : memref<1x18x18x3xbf16, #tpu.memory_space<vmem>>, vector<1x16x16x3xbf16>
    %43 = vector.shape_cast %42 : vector<1x16x16x3xbf16> to vector<16x16x3xbf16>
    %44 = vector.shape_cast %43 : vector<16x16x3xbf16> to vector<256x3xbf16>
    %c4 = arith.constant 4 : index
    %c0_31 = arith.constant 0 : index
    %c0_32 = arith.constant 0 : index
    %45 = vector.load %arg3[%c4, %c0_31, %c0_32] : memref<9x3x32xbf16, #tpu.memory_space<vmem>>, vector<1x3x32xbf16>
    %46 = vector.shape_cast %45 : vector<1x3x32xbf16> to vector<3x32xbf16>
    %cst_33 = arith.constant dense<0.000000e+00> : vector<256x32xf32>
    %47 = tpu.matmul %44, %46, %cst_33 {dimension_numbers = #tpu.dot_dimension_numbers<[1], [0], [0], [1], [0, 0, 1, 1], [], []>} : vector<256x3xbf16>, vector<3x32xbf16>, vector<256x32xf32> -> vector<256x32xf32>
    %48 = arith.addf %39, %47 : vector<256x32xf32>
    %c1_i32_34 = arith.constant 1 : i32
    %49 = arith.addi %4, %c1_i32_34 : i32
    %c0_35 = arith.constant 0 : index
    %50 = arith.index_cast %49 : i32 to index
    %c2_36 = arith.constant 2 : index
    %c0_37 = arith.constant 0 : index
    %51 = vector.load %arg6[%c0_35, %50, %c2_36, %c0_37] : memref<1x18x18x3xbf16, #tpu.memory_space<vmem>>, vector<1x16x16x3xbf16>
    %52 = vector.shape_cast %51 : vector<1x16x16x3xbf16> to vector<16x16x3xbf16>
    %53 = vector.shape_cast %52 : vector<16x16x3xbf16> to vector<256x3xbf16>
    %c5 = arith.constant 5 : index
    %c0_38 = arith.constant 0 : index
    %c0_39 = arith.constant 0 : index
    %54 = vector.load %arg3[%c5, %c0_38, %c0_39] : memref<9x3x32xbf16, #tpu.memory_space<vmem>>, vector<1x3x32xbf16>
    %55 = vector.shape_cast %54 : vector<1x3x32xbf16> to vector<3x32xbf16>
    %cst_40 = arith.constant dense<0.000000e+00> : vector<256x32xf32>
    %56 = tpu.matmul %53, %55, %cst_40 {dimension_numbers = #tpu.dot_dimension_numbers<[1], [0], [0], [1], [0, 0, 1, 1], [], []>} : vector<256x3xbf16>, vector<3x32xbf16>, vector<256x32xf32> -> vector<256x32xf32>
    %57 = arith.addf %48, %56 : vector<256x32xf32>
    %c2_i32 = arith.constant 2 : i32
    %58 = arith.addi %4, %c2_i32 : i32
    %c0_41 = arith.constant 0 : index
    %59 = arith.index_cast %58 : i32 to index
    %c0_42 = arith.constant 0 : index
    %c0_43 = arith.constant 0 : index
    %60 = vector.load %arg6[%c0_41, %59, %c0_42, %c0_43] : memref<1x18x18x3xbf16, #tpu.memory_space<vmem>>, vector<1x16x16x3xbf16>
    %61 = vector.shape_cast %60 : vector<1x16x16x3xbf16> to vector<16x16x3xbf16>
    %62 = vector.shape_cast %61 : vector<16x16x3xbf16> to vector<256x3xbf16>
    %c6 = arith.constant 6 : index
    %c0_44 = arith.constant 0 : index
    %c0_45 = arith.constant 0 : index
    %63 = vector.load %arg3[%c6, %c0_44, %c0_45] : memref<9x3x32xbf16, #tpu.memory_space<vmem>>, vector<1x3x32xbf16>
    %64 = vector.shape_cast %63 : vector<1x3x32xbf16> to vector<3x32xbf16>
    %cst_46 = arith.constant dense<0.000000e+00> : vector<256x32xf32>
    %65 = tpu.matmul %62, %64, %cst_46 {dimension_numbers = #tpu.dot_dimension_numbers<[1], [0], [0], [1], [0, 0, 1, 1], [], []>} : vector<256x3xbf16>, vector<3x32xbf16>, vector<256x32xf32> -> vector<256x32xf32>
    %66 = arith.addf %57, %65 : vector<256x32xf32>
    %c2_i32_47 = arith.constant 2 : i32
    %67 = arith.addi %4, %c2_i32_47 : i32
    %c0_48 = arith.constant 0 : index
    %68 = arith.index_cast %67 : i32 to index
    %c1_49 = arith.constant 1 : index
    %c0_50 = arith.constant 0 : index
    %69 = vector.load %arg6[%c0_48, %68, %c1_49, %c0_50] : memref<1x18x18x3xbf16, #tpu.memory_space<vmem>>, vector<1x16x16x3xbf16>
    %70 = vector.shape_cast %69 : vector<1x16x16x3xbf16> to vector<16x16x3xbf16>
    %71 = vector.shape_cast %70 : vector<16x16x3xbf16> to vector<256x3xbf16>
    %c7 = arith.constant 7 : index
    %c0_51 = arith.constant 0 : index
    %c0_52 = arith.constant 0 : index
    %72 = vector.load %arg3[%c7, %c0_51, %c0_52] : memref<9x3x32xbf16, #tpu.memory_space<vmem>>, vector<1x3x32xbf16>
    %73 = vector.shape_cast %72 : vector<1x3x32xbf16> to vector<3x32xbf16>
    %cst_53 = arith.constant dense<0.000000e+00> : vector<256x32xf32>
    %74 = tpu.matmul %71, %73, %cst_53 {dimension_numbers = #tpu.dot_dimension_numbers<[1], [0], [0], [1], [0, 0, 1, 1], [], []>} : vector<256x3xbf16>, vector<3x32xbf16>, vector<256x32xf32> -> vector<256x32xf32>
    %75 = arith.addf %66, %74 : vector<256x32xf32>
    %c2_i32_54 = arith.constant 2 : i32
    %76 = arith.addi %4, %c2_i32_54 : i32
    %c0_55 = arith.constant 0 : index
    %77 = arith.index_cast %76 : i32 to index
    %c2_56 = arith.constant 2 : index
    %c0_57 = arith.constant 0 : index
    %78 = vector.load %arg6[%c0_55, %77, %c2_56, %c0_57] : memref<1x18x18x3xbf16, #tpu.memory_space<vmem>>, vector<1x16x16x3xbf16>
    %79 = vector.shape_cast %78 : vector<1x16x16x3xbf16> to vector<16x16x3xbf16>
    %80 = vector.shape_cast %79 : vector<16x16x3xbf16> to vector<256x3xbf16>
    %c8 = arith.constant 8 : index
    %c0_58 = arith.constant 0 : index
    %c0_59 = arith.constant 0 : index
    %81 = vector.load %arg3[%c8, %c0_58, %c0_59] : memref<9x3x32xbf16, #tpu.memory_space<vmem>>, vector<1x3x32xbf16>
    %82 = vector.shape_cast %81 : vector<1x3x32xbf16> to vector<3x32xbf16>
    %cst_60 = arith.constant dense<0.000000e+00> : vector<256x32xf32>
    %83 = tpu.matmul %80, %82, %cst_60 {dimension_numbers = #tpu.dot_dimension_numbers<[1], [0], [0], [1], [0, 0, 1, 1], [], []>} : vector<256x3xbf16>, vector<3x32xbf16>, vector<256x32xf32> -> vector<256x32xf32>
    %84 = arith.addf %75, %83 : vector<256x32xf32>
    %c0_61 = arith.constant 0 : index
    %c0_62 = arith.constant 0 : index
    %85 = vector.load %arg4[%c0_61, %c0_62] : memref<1x32xf32, #tpu.memory_space<vmem>>, vector<1x32xf32>
    %86 = vector.broadcast %85 : vector<1x32xf32> to vector<256x32xf32>
    %87 = arith.addf %84, %86 : vector<256x32xf32>
    %cst_63 = arith.constant 0.000000e+00 : f32
    %88 = vector.broadcast %cst_63 : f32 to vector<256x32xf32>
    %89 = arith.maximumf %87, %88 : vector<256x32xf32>
    %90 = vector.shape_cast %89 : vector<256x32xf32> to vector<1x16x16x32xf32>
    %91 = arith.truncf %90 : vector<1x16x16x32xf32> to vector<1x16x16x32xbf16>
    %c0_64 = arith.constant 0 : index
    %c0_65 = arith.constant 0 : index
    %c0_66 = arith.constant 0 : index
    %c0_67 = arith.constant 0 : index
    %92 = vector.load %arg5[%c0_64, %c0_65, %c0_66, %c0_67] : memref<1x16x16x32xbf16, #tpu.memory_space<vmem>>, vector<1x16x16x32xbf16>
    tpu.vector_store %arg5[%c0_64, %c0_65, %c0_66, %c0_67], %91 {strides = array<i32>} : memref<1x16x16x32xbf16, #tpu.memory_space<vmem>>, vector<1x16x16x32xbf16>,
    return
  }
  func.func @transform_0(%arg0: i32, %arg1: i32) -> (i32, i32, i32, i32) {
    %c0_i32 = arith.constant 0 : i32
    %c0_i32_0 = arith.constant 0 : i32
    %c0_i32_1 = arith.constant 0 : i32
    %c0_i32_2 = arith.constant 0 : i32
    return %arg0, %c0_i32, %c0_i32_0, %c0_i32_1 : i32, i32, i32, i32
  }
  func.func @transform_1(%arg0: i32, %arg1: i32) -> (i32, i32, i32) {
    %c0_i32 = arith.constant 0 : i32
    %c0_i32_0 = arith.constant 0 : i32
    %c0_i32_1 = arith.constant 0 : i32
    %c0_i32_2 = arith.constant 0 : i32
    return %c0_i32, %c0_i32_0, %c0_i32_1 : i32, i32, i32
  }
  func.func @transform_2(%arg0: i32, %arg1: i32) -> (i32, i32) {
    %c0_i32 = arith.constant 0 : i32
    %c0_i32_0 = arith.constant 0 : i32
    %c0_i32_1 = arith.constant 0 : i32
    return %c0_i32, %c0_i32_0 : i32, i32
  }
  func.func @transform_3(%arg0: i32, %arg1: i32) -> (i32, i32, i32, i32) {
    %c0_i32 = arith.constant 0 : i32
    %c0_i32_0 = arith.constant 0 : i32
    %c0_i32_1 = arith.constant 0 : i32
    return %arg0, %arg1, %c0_i32, %c0_i32_0 : i32, i32, i32, i32
  }
}

</mosaic_0001>

<bundles_post_ra>
// kernel: tpu_custom_call.1
= control target key start
LH: loop header
LB: loop body
LE: loop exit
PB: predicated region body
PF: predicated region fallthrough
CT: control target
= control target key end

     0   :  { %8 = vsyncpa [#allocation4], 0  ;;  %s9742_s0 = inlined_call_operand.vmem [shape: bf16[2,16,16,3], index: 0, kind: input, shape index: {}]   ;;  %s9743_s1 = inlined_call_operand.vmem [shape: bf16[9,3,32], index: 1, kind: input, shape index: {}]   ;;  %s9744_s2 = inlined_call_operand.vmem [shape: f32[1,32], index: 2, kind: input, shape index: {}]   ;;  %s9745_s3 = inlined_call_operand.hbm [shape: bf16[2,16,16,32], index: 3, kind: output, shape index: {}]  }
   0x1   :  { %10 = vsyncpa [#allocation4 + $0x1], 0  ;;  %s6976_s12 = smov 0   ;;  %s6978_s13 = smov 0  }
   0x2   :  { %s6980_s14 = smov 0   ;;  %s6982_s15 = smov 0  }
   0x3   :  { %s6984_s16 = smov 0   ;;  %s6986_s17 = smov 0  }
   0x4 LB: > { %s5684_s18 = sadd.s32 4294967295, %s6949_s17   ;;  %s5685_s19 = sadd.s32 4294967294, %s6949_s17   ;;  %s6949_s17 = sphi %s6986_s17, %s16_s17   ;;  %s6945_s16 = sphi %s6984_s16, %s9998_s16   ;;  %s6941_s15 = sphi %s6982_s15, %s9997_s15   ;;  %s6937_s14 = sphi %s6980_s14, %s9996_s14   ;;  %s6933_s13 = sphi %s6978_s13, %s9995_s13   ;;  %s6929_s12 = sphi %s6976_s12, %s9994_s12  }
   0x5   : > { %s28_s20 = sadd.s32 1, %s6945_s16  ;;  %s105_s21 = sadd.s32 1, %s6937_s14 }
   0x6   : > { %p30_p0 = scmp.ge.s32.totalorder %s28_s20, 2  ;;  %p115_p1 = scmp.ne.s32.totalorder %s6937_s14, %s6933_s13 }
   0x7   : > { %p116_p2 = scmp.eq.s32.totalorder %s5684_s18, 1  ;;  %p121_p3 = scmp.ne.s32.totalorder %s6933_s13, %s6929_s12 }
   0x8   : > { %s10000_s20 = smov (%p30_p0, %s28_s20), 0  ;;  %p122_p5 = scmp.eq.s32.totalorder %s5685_s19, 1 }
   0x9   : > { %p7016_p4 = por %p116_p2, %p115_p1  ;;  %s100_s23 = ssub.s32 %s6945_s16, %s10000_s20 }
   0xa   : > { %p5688_p6 = scmp.ge.s32.totalorder %s6949_s17, 1  ;;  %p103_p7 = scmp.eq.s32.totalorder %s100_s23, 0 }
   0xb   : > { %p7023_p8 = por %p122_p5, %p121_p3  ;;  %p154_p9 = scmp.lt.s32.totalorder %s6949_s17, 3 }
   0xc   : > { %s7029_s25 = scalar_select %p103_p7, %s6937_s14, %s105_s21  }
   0xd   : > { %p155_p10 = pnand %p5688_p6, %p154_p9 }
   0xf   : > { %158 = sbr.rel (%p155_p10) target bundleno = 663 (0x297), region = 32 }
  0x14   : > { %v5692_v0 = vld [vmem:[%s9743_s1 + $0x2] sm:$0x3]  ;;  %vm1319_vm0 = vcmask 1040384   ;;  %vm1320_vm1 = vcmask 1041408   ;;  %vm189_vm2 = vcmask 19456   ;;  %v6951_v1 = vmov 65535  }
  0x15   : > { %v1321_v2 = vsel %vm1319_vm0, 4294967295, %v6951_v1  ;;  %vm192_vm3 = vcmask 16384   ;;  %vm199_vm4 = vsmask.f32 256  ;;  %p178_p11 = scmp.lt.s32.totalorder %s6941_s15, 1  ;;  %v6952_v4 = vmov 0  }
  0x16   : > { %v7035_v3 = vsel %vm1320_vm1, %v1321_v2, 0  ;;  %190 = vst.msk [vmem:[#allocation2] sm:$0xf] %vm189_vm2, %v6952_v4  ;;  %191 = vst.msk [vmem:[#allocation2 + $0x4] sm:$0xf] %vm189_vm2, %v6952_v4  ;;  %v9758_v5 = vmov 0 }
  0x17   : > { %193 = vst.msk [vmem:[#allocation2 + $0x8] sm:$0x1] %vm192_vm3, %v6952_v4  ;;  %197 = vst.msk [vmem:[#allocation2 + $0xd4] sm:$0x1] %vm192_vm3, %v6952_v4  ;;  %vm255_vm6 = vsmask.f32 7938  ;;  %v1324_v6 = vand.u32 %v5692_v0, %v7035_v3 }
  0x18   : > { %vm7040_vm5 = vmand %vm192_vm3, %vm199_vm4  ;;  %195 = vst.msk [vmem:[#allocation2 + $0xcc] sm:$0xf] %vm189_vm2, %v6952_v4  ;;  %v9761_v7 = vmov 0  ;;  %s179_s28 = scalar_select %p178_p11, %s6941_s15, 1  ;;  %v204_v8 = vld [vmem:[#allocation2 + $0xc] sm:$0x1] }
  0x19   : > { %v9759_v5 = vsel %vm7040_vm5, 4294967295, %v9758_v5  ;;  %196 = vst.msk [vmem:[#allocation2 + $0xd0] sm:$0xf] %vm189_vm2, %v6952_v4  ;;  %vm7048_vm7 = vmand %vm192_vm3, %vm255_vm6  ;;  %v205_v9 = vsel %vm7040_vm5, 0, %v204_v8  ;;  %v260_v10 = vld [vmem:[#allocation2 + $0x14] sm:$0x1]  ;;  %6453 = vmatprep.subr.bf16.mxu0 %v1324_v6  ;;  %6759 = vmatprep.subr.bf16.mxu1 %v1324_v6 }
  0x1a   : > { %9760 = vst [vmem:[#allocation6_spill] sm:$0xff] %v9759_v5  ;;  %v9762_v7 = vsel %vm7048_vm7, 4294967295, %v9761_v7  ;;  %s6266_s29 = sshll.u32 %s179_s28, 7  ;;  %206 = vst [vmem:[#allocation2 + $0xc] sm:$0x1] %v205_v9  ;;  %v261_v11 = vsel %vm7048_vm7, 0, %v260_v10  ;;  %6454 = vmatpush3.bf16.msra.mxu0 %v1324_v6  ;;  %6760 = vmatpush3.bf16.msra.mxu1 %v1324_v6 }
  0x1b   : > { %9763 = vst [vmem:[#allocation7_spill] sm:$0xff] %v9762_v7  ;;  %v225_v12 = vld [vmem:[#allocation2 + $0x60] sm:$0x1]  ;;  %v281_v13 = vld [vmem:[#allocation2 + $0x68] sm:$0x1]  ;;  %s7060_s5 = scalar_lea.vmem %s9742_s0, %s6266_s29  ;;  %vm7083_vm9 = vmand %vm189_vm2, %vm255_vm6  ;;  %v9764_v33 = vmov 0 }
  0x1c   : > { %262 = vst [vmem:[#allocation2 + $0x14] sm:$0x1] %v261_v11  ;;  %vm343_vm8 = vsmask.f32 4368  ;;  %v226_v14 = vsel %vm7040_vm5, 0, %v225_v12  ;;  %v282_v15 = vsel %vm7048_vm7, 0, %v281_v13 }
  0x1d   : > { %v816_v16 = vld [vmem:[%s9743_s1] sm:$0x3]  ;;  %v312_v18 = vld [vmem:[%s7060_s5 + $0x4] sm:$0xf]  ;;  %227 = vst [vmem:[#allocation2 + $0x60] sm:$0x1] %v226_v14  ;;  %vm7091_vm12 = vmor %vm199_vm4, %vm343_vm8 }
  0x1e   : > { %v311_v17 = vld [vmem:[%s7060_s5] sm:$0xf]  ;;  %283 = vst [vmem:[#allocation2 + $0x68] sm:$0x1] %v282_v15  ;;  %v325_v19 = vld [vmem:[%s7060_s5 + $0x38] sm:$0xf]  ;;  %v7073_v20 = vand.u32 %v7035_v3, %v816_v16 }
  0x1f   : > { %v346_v21 = vshrl.u32 %v311_v17, 16  ;;  %v349_v22 = vshll.u32 %v311_v17, 16  ;;  %v354_v23 = vshrl.u32 %v312_v18, 16  ;;  %v357_v24 = vshll.u32 %v312_v18, 16  ;;  %v326_v25 = vld [vmem:[%s7060_s5 + $0x3c] sm:$0xf] }
  0x20   : > { %v201_v26 = vld [vmem:[#allocation2] sm:$0x1]  ;;  %v257_v27 = vld [vmem:[#allocation2 + $0x8] sm:$0x1]  ;;  %v785_v28 = vld [vmem:[#allocation2 + $0x4] sm:$0xf]  ;;  %6487 = vmatprep.subr.bf16.mxu1 %v7073_v20 }
  0x21   : > { %v202_v29 = vsel %vm7040_vm5, 0, %v201_v26  ;;  %v258_v30 = vsel %vm7048_vm7, 0, %v257_v27  ;;  %v846_v31 = vshll.u32 %v785_v28, 16  ;;  %v850_v32 = vshrl.u32 %v785_v28, 16  ;;  %v228_v38 = vld [vmem:[#allocation2 + $0x6c] sm:$0x1] }
  0x22   : > { %203 = vst [vmem:[#allocation2] sm:$0x1] %v202_v29  ;;  %259 = vst [vmem:[#allocation2 + $0x8] sm:$0x1] %v258_v30  ;;  %v9765_v33 = vsel %vm7083_vm9, 4294967295, %v9764_v33  ;;  %v348_v34 = vrot.slane %v346_v21, 7 }
  0x23   : > { %9766 = vst [vmem:[#allocation8_spill] sm:$0xff] %v9765_v33  ;;  %vm833_vm10 = vsmask.f32 3328  ;;  %vm834_vm11 = vsmask.f32 7440  ;;  %v356_v35 = vrot.slane %v354_v23, 7 }
  0x24   : > { %v465_v36 = vshrl.u32 %v325_v19, 16  ;;  %v468_v37 = vshll.u32 %v325_v19, 16  ;;  %v7087_v39 = vrot.slane %v846_v31, 5  ;;  %v852_v40 = vrot.slane %v850_v32, 4  ;;  %v668_v42 = vld [vmem:[#allocation2 + $0xc] sm:$0xf]  ;;  %vm7131_vm13 = vmor %vm833_vm10, %vm834_vm11 }
  0x25   : > { %v9767_v41 = vmov 0  ;;  %v473_v43 = vshrl.u32 %v326_v25, 16  ;;  %v476_v44 = vshll.u32 %v326_v25, 16  ;;  %v351_v45 = vor.u32 %v349_v22, %v348_v34  ;;  %v672_v49 = vld [vmem:[#allocation2 + $0x14] sm:$0x1]  ;;  %s6299_s10 = sshll.u32 %s6941_s15, 11 }
  0x26   : > { %v9768_v41 = vsel %vm7091_vm12, 4294967295, %v9767_v41  ;;  %v352_v46 = vrot.slane %v348_v34, 4  ;;  %v359_v47 = vor.u32 %v357_v24, %v356_v35  ;;  %v361_v48 = vrot.slane %v356_v35, 4  ;;  %v284_v53 = vld [vmem:[#allocation2 + $0x74] sm:$0x1]  ;;  %s9687_s21 = scalar_lea.hbm %s9745_s3, %s6299_s10  ;;  %s6953_s26 = smov [#allocation3]  }
  0x27   : > { %9769 = vst [vmem:[#allocation9_spill] sm:$0xff] %v9768_v41  ;;  %v853_v50 = vor.u32 %v852_v40, %v7087_v39  ;;  %v467_v51 = vrot.slane %v465_v36, 7  ;;  %v475_v52 = vrot.slane %v473_v43, 7  ;;  %v327_v54 = vld [vmem:[%s7060_s5 + $0x40] sm:$0xf]  ;;  %v669_v56 = vsel %vm7083_vm9, %v351_v45, %v668_v42  ;;  %s6877_s27 = sshll.u32 %s6953_s26, 4  ;;  %s6878_s27 = int_to_ptr.vmem [resolvable:$false] %s6877_s27 }
  0x28   : > { %v360_v55 = vsel %vm7091_vm12, %v352_v46, %v359_v47  ;;  %v673_v57 = vsel %vm7040_vm5, %v361_v48, %v672_v49  ;;  %v717_v58 = vld [vmem:[#allocation2 + $0x60] sm:$0xf]  ;;  %v229_v59 = vsel %vm7040_vm5, 0, %v228_v38  ;;  %v328_v60 = vld [vmem:[%s7060_s5 + $0x44] sm:$0xf]  ;;  %v285_v6 = vsel %vm7048_vm7, 0, %v284_v53 }
  0x29   : > { %670 = vst [vmem:[#allocation2 + $0xc] sm:$0xf] %v669_v56  ;;  %671 = vst.msk [vmem:[#allocation2 + $0x10] sm:$0xf] %vm189_vm2, %v360_v55  ;;  %v470_v61 = vor.u32 %v468_v37, %v467_v51  ;;  %v471_v62 = vrot.slane %v467_v51, 4  ;;  %v478_v63 = vor.u32 %v476_v44, %v475_v52  ;;  %v854_v2 = vrot.slane %v853_v50, 4 }
  0x2a   : > { %674 = vst [vmem:[#allocation2 + $0x14] sm:$0x1] %v673_v57  ;;  %v721_v0 = vld [vmem:[#allocation2 + $0x68] sm:$0x1]  ;;  %230 = vst [vmem:[#allocation2 + $0x6c] sm:$0x1] %v229_v59 }
  0x2b   : > { %v5773_v1 = vld [vmem:[%s9743_s1 + $0x4] sm:$0x3]  ;;  %v480_v4 = vrot.slane %v475_v52, 4  ;;  %v482_v8 = vshrl.u32 %v327_v54, 16  ;;  %v207_v9 = vld [vmem:[#allocation2 + $0x18] sm:$0x1]  ;;  %v479_v12 = vsel %vm7091_vm12, %v471_v62, %v478_v63  ;;  %v718_v13 = vsel %vm7083_vm9, %v470_v61, %v717_v58 }
  0x2c   : > { %v784_v10 = vld [vmem:[#allocation2] sm:$0xf]  ;;  %v7112_v11 = vld [vmem:[#allocation2 + $0x8] sm:$0x1]  ;;  %286 = vst [vmem:[#allocation2 + $0x74] sm:$0x1] %v285_v6  ;;  %v7125_v24 = vand.u32 %v5773_v1, %v7035_v3 }
  0x2d   : > { %v485_v14 = vshll.u32 %v327_v54, 16  ;;  %v490_v15 = vshrl.u32 %v328_v60, 16  ;;  %v837_v16 = vshrl.u32 %v784_v10, 16  ;;  %v840_v17 = vshll.u32 %v784_v10, 16  ;;  %719 = vst [vmem:[#allocation2 + $0x60] sm:$0xf] %v718_v13 }
  0x2e   : > { %v856_v18 = vshll.u32 %v7112_v11, 16  ;;  %720 = vst.msk [vmem:[#allocation2 + $0x64] sm:$0xf] %vm189_vm2, %v479_v12  ;;  %v493_v19 = vshll.u32 %v328_v60, 16  ;;  %v722_v21 = vsel %vm7040_vm5, %v480_v4, %v721_v0  ;;  %v484_v22 = vrot.slane %v482_v8, 7  ;;  %6521 = vmatprep.subr.bf16.mxu0 %v7125_v24  ;;  %s6879_s28 = scalar_lea.vmem %s6878_s27, 4096 }
  0x2f   : > { %v7122_v23 = vrot.slane %v490_v15, 7  ;;  %v839_v25 = vrot.slane %v837_v16, 4  ;;  %v842_v26 = vrot.slane %v840_v17, 5  ;;  %723 = vst [vmem:[#allocation2 + $0x68] sm:$0x1] %v722_v21  ;;  %v208_v28 = vsel %vm7040_vm5, 0, %v207_v9 }
  0x30   : > { %v858_v27 = vrot.slane %v856_v18, 5  ;;  %vm1270_vm14 = vcmask 23552   ;;  %v488_v31 = vrot.slane %v484_v22, 4  ;;  %209 = vst [vmem:[#allocation2 + $0x18] sm:$0x1] %v208_v28  ;;  %v487_v37 = vor.u32 %v485_v14, %v484_v22 }
  0x31   : > { %v843_v32 = vor.u32 %v842_v26, %v839_v25  ;;  %v7137_v34 = vld [vmem:[#allocation2 + $0xc] sm:$0xf]  ;;  %v7139_v35 = vld [vmem:[#allocation2 + $0x10] sm:$0xf]  ;;  %v7141_v36 = vld [vmem:[#allocation2 + $0x14] sm:$0x1]  ;;  %v495_v38 = vor.u32 %v493_v19, %v7122_v23 }
  0x32   : > { %v861_v40 = vshrl.u32 %v7137_v34, 16  ;;  %v864_v42 = vshll.u32 %v7137_v34, 16  ;;  %v870_v43 = vshll.u32 %v7139_v35, 16  ;;  %v874_v44 = vshrl.u32 %v7139_v35, 16  ;;  %v724_v0 = vld [vmem:[#allocation2 + $0x6c] sm:$0xf] }
  0x33   : > { %v844_v45 = vrot.slane %v843_v32, 4  ;;  %v859_v46 = vsel %vm7131_vm13, %v854_v2, %v858_v27  ;;  %v880_v47 = vshll.u32 %v7141_v36, 16  ;;  %v497_v48 = vrot.slane %v7122_v23, 4  ;;  %v728_v8 = vld [vmem:[#allocation2 + $0x74] sm:$0x1] }
  0x34   : > { %v863_v49 = vrot.slane %v861_v40, 4  ;;  %v866_v50 = vrot.slane %v864_v42, 5  ;;  %v872_v51 = vrot.slane %v870_v43, 5  ;;  %v876_v52 = vrot.slane %v874_v44, 4  ;;  %v800_v53 = vld [vmem:[#allocation2 + $0x60] sm:$0xf] }
  0x35   : > { %v849_v54 = vsel %vm7131_vm13, %v844_v45, %v7087_v39  ;;  %v882_v55 = vrot.slane %v880_v47, 5  ;;  %v801_v56 = vld [vmem:[#allocation2 + $0x64] sm:$0xf]  ;;  %v1029_v57 = vshrl.u32 %v800_v53, 16  ;;  %v1032_v58 = vshll.u32 %v800_v53, 16 }
  0x36   : > { %v5693_v59 = vcombine.low %v849_v54, %v859_v46  ;;  %v867_v60 = vor.u32 %v866_v50, %v863_v49  ;;  %v877_v61 = vor.u32 %v876_v52, %v872_v51  ;;  %v825_v62 = vld [vmem:[#allocation2 + $0x68] sm:$0x1]  ;;  %v1038_v63 = vshll.u32 %v801_v56, 16  ;;  %v263_v13 = vld [vmem:[#allocation2 + $0x20] sm:$0x1] }
  0x37   : > { %v1031_v1 = vrot.slane %v1029_v57, 4  ;;  %v1034_v2 = vrot.slane %v1032_v58, 5  ;;  %v1042_v4 = vshrl.u32 %v801_v56, 16  ;;  %v1048_v6 = vshll.u32 %v825_v62, 16  ;;  %v313_v18 = vld [vmem:[%s7060_s5 + $0x8] sm:$0xf] }
  0x38   : > { %6455 = vmatprep.mubr.msk.bf16.mxu0 %vm1270_vm14, %v5693_v59  ;;  %v868_v39 = vrot.slane %v867_v60, 4  ;;  %v878_v9 = vrot.slane %v877_v61, 4  ;;  %v1839_v10 = vrot.slane %v7139_v35, 5  ;;  %v1040_v12 = vrot.slane %v1038_v63, 5  ;;  %v314_v19 = vld [vmem:[%s7060_s5 + $0xc] sm:$0xf] }
  0x39   : > { %v1035_v14 = vor.u32 %v1034_v2, %v1031_v1  ;;  %v1044_v15 = vrot.slane %v1042_v4, 4  ;;  %v1050_v16 = vrot.slane %v1048_v6, 5  ;;  %v496_v17 = vsel %vm7091_vm12, %v488_v31, %v495_v38  ;;  %v210_v26 = vld [vmem:[#allocation2 + $0x24] sm:$0x1]  ;;  %v266_v27 = vld [vmem:[#allocation2 + $0x2c] sm:$0x1] }
  0x3a   : > { %v873_v21 = vsel %vm7131_vm13, %v868_v39, %v872_v51  ;;  %v883_v22 = vsel %vm7131_vm13, %v878_v9, %v882_v55  ;;  %v725_v23 = vsel %vm7083_vm9, %v487_v37, %v724_v0  ;;  %727 = vst.msk [vmem:[#allocation2 + $0x70] sm:$0xf] %vm189_vm2, %v496_v17  ;;  %v729_v25 = vsel %vm7040_vm5, %v497_v48, %v728_v8  ;;  %v315_v40 = vld [vmem:[%s7060_s5 + $0x10] sm:$0xf]  ;;  %v316_v42 = vld [vmem:[%s7060_s5 + $0x14] sm:$0xf] }
  0x3b   : > { %v5694_v28 = vcombine.low %v873_v21, %v883_v22  ;;  %v1036_v31 = vrot.slane %v1035_v14, 4  ;;  %v1045_v32 = vor.u32 %v1044_v15, %v1040_v12  ;;  %726 = vst [vmem:[#allocation2 + $0x6c] sm:$0xf] %v725_v23  ;;  %730 = vst [vmem:[#allocation2 + $0x74] sm:$0x1] %v729_v25  ;;  %v264_v38 = vsel %vm7048_vm7, 0, %v263_v13 }
  0x3c   : > { %265 = vst [vmem:[#allocation2 + $0x20] sm:$0x1] %v264_v38  ;;  %v363_v43 = vshrl.u32 %v313_v18, 16  ;;  %v366_v37 = vshll.u32 %v313_v18, 16  ;;  %v371_v44 = vshrl.u32 %v314_v19, 16  ;;  %v374_v45 = vshll.u32 %v314_v19, 16 }
  0x3d   : > { %v231_v46 = vld [vmem:[#allocation2 + $0x78] sm:$0x1]  ;;  %6456 = vmatmul.mubr.msk.bf16.vlgmr.msra.gmra.mxu0 %vm1270_vm14, %v5694_v28  ;;  %v1041_v47 = vsel %vm7131_vm13, %v1036_v31, %v1040_v12  ;;  %v1046_v48 = vrot.slane %v1045_v32, 4  ;;  %v211_v49 = vsel %vm7040_vm5, 0, %v210_v26  ;;  %v267_v50 = vsel %vm7048_vm7, 0, %v266_v27 }
  0x3e   : > { %6522 = vmatpush3.bf16.msra.mxu0 %v7125_v24  ;;  %v365_v51 = vrot.slane %v363_v43, 7  ;;  %v373_v52 = vrot.slane %v371_v44, 7  ;;  %212 = vst [vmem:[#allocation2 + $0x24] sm:$0x1] %v211_v49  ;;  %268 = vst [vmem:[#allocation2 + $0x2c] sm:$0x1] %v267_v50 }
  0x3f   : > { %v380_v53 = vshrl.u32 %v315_v40, 16  ;;  %v383_v54 = vshll.u32 %v315_v40, 16  ;;  %v287_v55 = vld [vmem:[#allocation2 + $0x80] sm:$0x1]  ;;  %v1051_v56 = vsel %vm7131_vm13, %v1046_v48, %v1050_v16  ;;  %v675_v57 = vld [vmem:[#allocation2 + $0x18] sm:$0xf] }
  0x40   : > { %v388_v58 = vshrl.u32 %v316_v42, 16  ;;  %v391_v59 = vshll.u32 %v316_v42, 16  ;;  %v232_v60 = vsel %vm7040_vm5, 0, %v231_v46  ;;  %v5701_v61 = vcombine.low %v1041_v47, %v1051_v56  ;;  %v329_v8 = vld [vmem:[%s7060_s5 + $0x48] sm:$0xf] }
  0x41   : > { %v368_v62 = vor.u32 %v366_v37, %v365_v51  ;;  %v369_v24 = vrot.slane %v365_v51, 4  ;;  %v376_v63 = vor.u32 %v374_v45, %v373_v52  ;;  %233 = vst [vmem:[#allocation2 + $0x78] sm:$0x1] %v232_v60  ;;  %v803_v0 = vld [vmem:[#allocation2 + $0x70] sm:$0xf]  ;;  %v378_v1 = vrot.slane %v373_v52, 4 }
  0x42   : > { %v382_v2 = vrot.slane %v380_v53, 7  ;;  %v390_v4 = vrot.slane %v388_v58, 7  ;;  %v288_v6 = vsel %vm7048_vm7, 0, %v287_v55  ;;  %6471 = vmatprep.mubr.msk.bf16.mxu1 %vm1270_vm14, %v5701_v61  ;;  %v802_v39 = vld [vmem:[#allocation2 + $0x6c] sm:$0xf]  ;;  %v1062_v12 = vshll.u32 %v803_v0, 16 }
  0x43   : > { %v826_v9 = vld [vmem:[#allocation2 + $0x74] sm:$0x1]  ;;  %v1066_v13 = vshrl.u32 %v803_v0, 16  ;;  %v377_v14 = vsel %vm7091_vm12, %v369_v24, %v376_v63  ;;  %v676_v15 = vsel %vm7083_vm9, %v368_v62, %v675_v57  ;;  %289 = vst [vmem:[#allocation2 + $0x80] sm:$0x1] %v288_v6  ;;  %v1053_v17 = vshrl.u32 %v802_v39, 16 }
  0x44   : > { %v330_v16 = vld [vmem:[%s7060_s5 + $0x4c] sm:$0xf]  ;;  %v1056_v18 = vshll.u32 %v802_v39, 16  ;;  %v1072_v19 = vshll.u32 %v826_v9, 16  ;;  %677 = vst [vmem:[#allocation2 + $0x18] sm:$0xf] %v676_v15  ;;  %v385_v22 = vor.u32 %v383_v54, %v382_v2  ;;  %v393_v40 = vor.u32 %v391_v59, %v390_v4 }
  0x45   : > { %678 = vst.msk [vmem:[#allocation2 + $0x1c] sm:$0xf] %vm189_vm2, %v377_v14  ;;  %v679_v21 = vld [vmem:[#allocation2 + $0x20] sm:$0x1]  ;;  %v1064_v23 = vrot.slane %v1062_v12, 5  ;;  %v1068_v25 = vrot.slane %v1066_v13, 4 }
  0x46   : > { %v680_v26 = vsel %vm7040_vm5, %v378_v1, %v679_v21  ;;  %v386_v27 = vrot.slane %v382_v2, 4  ;;  %v234_v28 = vld [vmem:[#allocation2 + $0x84] sm:$0x1]  ;;  %v1055_v31 = vrot.slane %v1053_v17, 4  ;;  %v1058_v32 = vrot.slane %v1056_v18, 5 }
  0x47   : > { %v1074_v38 = vrot.slane %v1072_v19, 5  ;;  %681 = vst [vmem:[#allocation2 + $0x20] sm:$0x1] %v680_v26  ;;  %v682_v42 = vld [vmem:[#allocation2 + $0x24] sm:$0xf]  ;;  %v1069_v43 = vor.u32 %v1068_v25, %v1064_v23  ;;  %v395_v37 = vrot.slane %v390_v4, 4 }
  0x48   : > { %v683_v44 = vsel %vm7083_vm9, %v385_v22, %v682_v42  ;;  %v686_v45 = vld [vmem:[#allocation2 + $0x2c] sm:$0x1]  ;;  %v499_v46 = vshrl.u32 %v329_v8, 16  ;;  %v1059_v48 = vor.u32 %v1058_v32, %v1055_v31  ;;  %v394_v49 = vsel %vm7091_vm12, %v386_v27, %v393_v40  ;;  %v7203_v52 = vld [vmem:[%s7060_s5 + $0x50] sm:$0xf] }
  0x49   : > { %v290_v47 = vld [vmem:[#allocation2 + $0x8c] sm:$0x1]  ;;  %684 = vst [vmem:[#allocation2 + $0x24] sm:$0xf] %v683_v44  ;;  %v502_v50 = vshll.u32 %v329_v8, 16  ;;  %v507_v51 = vshrl.u32 %v330_v16, 16  ;;  %v687_v54 = vsel %vm7040_vm5, %v395_v37, %v686_v45 }
  0x4a   : > { %v1070_v53 = vrot.slane %v1069_v43, 4  ;;  %685 = vst.msk [vmem:[#allocation2 + $0x28] sm:$0xf] %vm189_vm2, %v394_v49  ;;  %v501_v55 = vrot.slane %v499_v46, 7  ;;  %v510_v56 = vshll.u32 %v330_v16, 16  ;;  %v1060_v57 = vrot.slane %v1059_v48, 4 }
  0x4b   : > { %688 = vst [vmem:[#allocation2 + $0x2c] sm:$0x1] %v687_v54  ;;  %v509_v58 = vrot.slane %v507_v51, 7  ;;  %v731_v59 = vld [vmem:[#allocation2 + $0x78] sm:$0xf]  ;;  %v235_v60 = vsel %vm7040_vm5, 0, %v234_v28 }
  0x4c   : > { %v291_v61 = vsel %vm7048_vm7, 0, %v290_v47  ;;  %v1075_v62 = vsel %vm7131_vm13, %v1070_v53, %v1074_v38  ;;  %v788_v24 = vld [vmem:[#allocation2 + $0x18] sm:$0xf]  ;;  %v789_v63 = vld [vmem:[#allocation2 + $0x1c] sm:$0xf]  ;;  %v504_v0 = vor.u32 %v502_v50, %v501_v55  ;;  %v505_v1 = vrot.slane %v501_v55, 4 }
  0x4d   : > { %236 = vst [vmem:[#allocation2 + $0x84] sm:$0x1] %v235_v60  ;;  %292 = vst [vmem:[#allocation2 + $0x8c] sm:$0x1] %v291_v61  ;;  %v516_v2 = vshrl.u32 %v7203_v52, 16  ;;  %v1065_v4 = vsel %vm7131_vm13, %v1060_v57, %v1064_v23  ;;  %v885_v6 = vshrl.u32 %v788_v24, 16  ;;  %v512_v15 = vor.u32 %v510_v56, %v509_v58 }
  0x4e   : > { %v888_v8 = vshll.u32 %v788_v24, 16  ;;  %v894_v39 = vshll.u32 %v789_v63, 16  ;;  %v735_v9 = vld [vmem:[#allocation2 + $0x80] sm:$0x1]  ;;  %v5702_v12 = vcombine.low %v1065_v4, %v1075_v62  ;;  %v898_v14 = vshrl.u32 %v789_v63, 16 }
  0x4f   : > { %v7217_v13 = vld [vmem:[#allocation2 + $0x20] sm:$0x1]  ;;  %v514_v16 = vrot.slane %v509_v58, 4  ;;  %v887_v17 = vrot.slane %v885_v6, 4  ;;  %v513_v23 = vsel %vm7091_vm12, %v505_v1, %v512_v15  ;;  %v732_v26 = vsel %vm7083_vm9, %v504_v0, %v731_v59  ;;  %v332_v49 = vld [vmem:[%s7060_s5 + $0x54] sm:$0xf] }
  0x50   : > { %v890_v18 = vrot.slane %v888_v8, 5  ;;  %v896_v19 = vrot.slane %v894_v39, 5  ;;  %v904_v21 = vshll.u32 %v7217_v13, 16  ;;  %6472 = vmatmul.mubr.msk.bf16.vlgmr.msra.gmra.mxu1 %vm1270_vm14, %v5702_v12  ;;  %v900_v22 = vrot.slane %v898_v14, 4  ;;  %v790_v25 = vld [vmem:[#allocation2 + $0x24] sm:$0xf] }
  0x51   : > { %v736_v27 = vsel %vm7040_vm5, %v514_v16, %v735_v9  ;;  %6488 = vmatpush3.bf16.msra.mxu1 %v7073_v20  ;;  %v7228_v32 = vld [vmem:[#allocation2 + $0x28] sm:$0xf]  ;;  %v909_v38 = vshrl.u32 %v790_v25, 16  ;;  %v912_v40 = vshll.u32 %v790_v25, 16  ;;  %733 = vst [vmem:[#allocation2 + $0x78] sm:$0xf] %v732_v26 }
  0x52   : > { %v891_v28 = vor.u32 %v890_v18, %v887_v17  ;;  %v906_v31 = vrot.slane %v904_v21, 5  ;;  %734 = vst.msk [vmem:[#allocation2 + $0x7c] sm:$0xf] %vm189_vm2, %v513_v23  ;;  %737 = vst [vmem:[#allocation2 + $0x80] sm:$0x1] %v736_v27  ;;  %v901_v42 = vor.u32 %v900_v22, %v896_v19  ;;  %v918_v37 = vshll.u32 %v7228_v32, 16 }
  0x53   : > { %v7231_v43 = vld [vmem:[#allocation2 + $0x2c] sm:$0x1]  ;;  %v922_v44 = vshrl.u32 %v7228_v32, 16  ;;  %v518_v45 = vrot.slane %v516_v2, 7  ;;  %v911_v46 = vrot.slane %v909_v38, 4  ;;  %v914_v47 = vrot.slane %v912_v40, 5 }
  0x54   : > { %v892_v20 = vrot.slane %v891_v28, 4  ;;  %v928_v48 = vshll.u32 %v7231_v43, 16  ;;  %v902_v50 = vrot.slane %v901_v42, 4  ;;  %v920_v51 = vrot.slane %v918_v37, 5  ;;  %v213_v55 = vld [vmem:[#allocation2 + $0x30] sm:$0x1] }
  0x55   : > { %v924_v53 = vrot.slane %v922_v44, 4  ;;  %v519_v54 = vshll.u32 %v7203_v52, 16  ;;  %v915_v57 = vor.u32 %v914_v47, %v911_v46  ;;  %v522_v59 = vrot.slane %v518_v45, 4  ;;  %v738_v60 = vld [vmem:[#allocation2 + $0x84] sm:$0xf] }
  0x56   : > { %v897_v56 = vsel %vm7131_vm13, %v892_v20, %v896_v19  ;;  %v930_v58 = vrot.slane %v928_v48, 5  ;;  %v907_v61 = vsel %vm7131_vm13, %v902_v50, %v906_v31  ;;  %v524_v63 = vshrl.u32 %v332_v49, 16  ;;  %v269_v12 = vld [vmem:[#allocation2 + $0x38] sm:$0x1]  ;;  %v318_v27 = vld [vmem:[%s7060_s5 + $0x1c] sm:$0xf] }
  0x57   : > { %v925_v62 = vor.u32 %v924_v53, %v920_v51  ;;  %v521_v24 = vor.u32 %v519_v54, %v518_v45  ;;  %v5695_v0 = vcombine.low %v897_v56, %v907_v61  ;;  %v916_v1 = vrot.slane %v915_v57, 4  ;;  %v317_v14 = vld [vmem:[%s7060_s5 + $0x18] sm:$0xf]  ;;  %v216_v28 = vld [vmem:[#allocation2 + $0x3c] sm:$0x1] }
  0x58   : > { %v527_v2 = vshll.u32 %v332_v49, 16  ;;  %v214_v52 = vsel %vm7040_vm5, 0, %v213_v55  ;;  %v804_v6 = vld [vmem:[#allocation2 + $0x78] sm:$0xf]  ;;  %v526_v39 = vrot.slane %v524_v63, 7  ;;  %v270_v49 = vsel %vm7048_vm7, 0, %v269_v12 }
  0x59   : > { %v926_v4 = vrot.slane %v925_v62, 4  ;;  %v805_v8 = vld [vmem:[#allocation2 + $0x7c] sm:$0xf]  ;;  %v739_v9 = vsel %vm7083_vm9, %v521_v24, %v738_v60  ;;  %215 = vst [vmem:[#allocation2 + $0x30] sm:$0x1] %v214_v52  ;;  %6459 = vmatprep.mubr.msk.bf16.mxu0 %vm1270_vm14, %v5695_v0  ;;  %v921_v16 = vsel %vm7131_vm13, %v916_v1, %v920_v51  ;;  %v1077_v18 = vshrl.u32 %v804_v6, 16 }
  0x5a   : > { %v827_v17 = vld [vmem:[#allocation2 + $0x80] sm:$0x1]  ;;  %v1080_v19 = vshll.u32 %v804_v6, 16  ;;  %v1086_v21 = vshll.u32 %v805_v8, 16  ;;  %740 = vst [vmem:[#allocation2 + $0x84] sm:$0xf] %v739_v9  ;;  %v529_v26 = vor.u32 %v527_v2, %v526_v39 }
  0x5b   : > { %v931_v22 = vsel %vm7131_vm13, %v926_v4, %v930_v58  ;;  %v1090_v25 = vshrl.u32 %v805_v8, 16  ;;  %v1096_v23 = vshll.u32 %v827_v17, 16  ;;  %v1079_v38 = vrot.slane %v1077_v18, 4  ;;  %v742_v37 = vld [vmem:[#allocation2 + $0x8c] sm:$0x1] }
  0x5c   : > { %v5696_v31 = vcombine.low %v921_v16, %v931_v22  ;;  %v1082_v40 = vrot.slane %v1080_v19, 5  ;;  %v1088_v42 = vrot.slane %v1086_v21, 5  ;;  %v530_v20 = vsel %vm7091_vm12, %v522_v59, %v529_v26  ;;  %v272_v47 = vld [vmem:[#allocation2 + $0x44] sm:$0x1]  ;;  %v319_v53 = vld [vmem:[%s7060_s5 + $0x20] sm:$0xf] }
  0x5d   : > { %v1092_v44 = vrot.slane %v1090_v25, 4  ;;  %v1098_v45 = vrot.slane %v1096_v23, 5  ;;  %v531_v46 = vrot.slane %v526_v39, 4  ;;  %741 = vst.msk [vmem:[#allocation2 + $0x88] sm:$0xf] %vm189_vm2, %v530_v20  ;;  %v397_v50 = vshrl.u32 %v317_v14, 16 }
  0x5e   : > { %6460 = vmatmul.mubr.msk.bf16.gmra.mxu0 %vm1270_vm14, %v5696_v31  ;;  %v1083_v48 = vor.u32 %v1082_v40, %v1079_v38  ;;  %v400_v51 = vshll.u32 %v317_v14, 16  ;;  %271 = vst [vmem:[#allocation2 + $0x38] sm:$0x1] %v270_v49  ;;  %v405_v56 = vshrl.u32 %v318_v27, 16  ;;  %v408_v57 = vshll.u32 %v318_v27, 16 }
  0x5f   : > { %v1093_v54 = vor.u32 %v1092_v44, %v1088_v42  ;;  %v743_v55 = vsel %vm7040_vm5, %v531_v46, %v742_v37  ;;  %v399_v59 = vrot.slane %v397_v50, 7  ;;  %v217_v61 = vsel %vm7040_vm5, 0, %v216_v28  ;;  %v320_v39 = vld [vmem:[%s7060_s5 + $0x24] sm:$0xf]  ;;  %v237_v17 = vld [vmem:[#allocation2 + $0x90] sm:$0x1] }
  0x60   : > { %v1084_v58 = vrot.slane %v1083_v48, 4  ;;  %744 = vst [vmem:[#allocation2 + $0x8c] sm:$0x1] %v743_v55  ;;  %v689_v60 = vld [vmem:[#allocation2 + $0x30] sm:$0xf]  ;;  %v273_v62 = vsel %vm7048_vm7, 0, %v272_v47 }
  0x61   : > { %v1094_v24 = vrot.slane %v1093_v54, 4  ;;  %v806_v63 = vld [vmem:[#allocation2 + $0x84] sm:$0xf]  ;;  %v407_v0 = vrot.slane %v405_v56, 7  ;;  %218 = vst [vmem:[#allocation2 + $0x3c] sm:$0x1] %v217_v61  ;;  %v402_v8 = vor.u32 %v400_v51, %v399_v59 }
  0x62   : > { %274 = vst [vmem:[#allocation2 + $0x44] sm:$0x1] %v273_v62  ;;  %v414_v1 = vshrl.u32 %v319_v53, 16  ;;  %v417_v2 = vshll.u32 %v319_v53, 16  ;;  %v1089_v52 = vsel %vm7131_vm13, %v1084_v58, %v1088_v42  ;;  %v1101_v4 = vshrl.u32 %v806_v63, 16 }
  0x63   : > { %v1104_v6 = vshll.u32 %v806_v63, 16  ;;  %v1099_v9 = vsel %vm7131_vm13, %v1094_v24, %v1098_v45  ;;  %v403_v12 = vrot.slane %v399_v59, 4  ;;  %v410_v14 = vor.u32 %v408_v57, %v407_v0  ;;  %v293_v25 = vld [vmem:[#allocation2 + $0x98] sm:$0x1]  ;;  %v334_v50 = vld [vmem:[%s7060_s5 + $0x5c] sm:$0xf] }
  0x64   : > { %v412_v16 = vrot.slane %v407_v0, 4  ;;  %v5703_v18 = vcombine.low %v1089_v52, %v1099_v9  ;;  %v1103_v19 = vrot.slane %v1101_v4, 4  ;;  %v690_v22 = vsel %vm7083_vm9, %v402_v8, %v689_v60  ;;  %v7275_v23 = vld [vmem:[#allocation2 + $0x88] sm:$0xf]  ;;  %v333_v38 = vld [vmem:[%s7060_s5 + $0x58] sm:$0xf] }
  0x65   : > { %v1106_v21 = vrot.slane %v1104_v6, 5  ;;  %v411_v26 = vsel %vm7091_vm12, %v403_v12, %v410_v14  ;;  %691 = vst [vmem:[#allocation2 + $0x30] sm:$0xf] %v690_v22  ;;  %v416_v27 = vrot.slane %v414_v1, 7  ;;  %v422_v28 = vshrl.u32 %v320_v39, 16 }
  0x66   : > { %v425_v31 = vshll.u32 %v320_v39, 16  ;;  %6475 = vmatprep.mubr.msk.bf16.mxu1 %vm1270_vm14, %v5703_v18  ;;  %v1110_v42 = vshll.u32 %v7275_v23, 16  ;;  %v1114_v37 = vshrl.u32 %v7275_v23, 16  ;;  %692 = vst.msk [vmem:[#allocation2 + $0x34] sm:$0xf] %vm189_vm2, %v411_v26  ;;  %v238_v45 = vsel %vm7040_vm5, 0, %v237_v17 }
  0x67   : > { %v1107_v40 = vor.u32 %v1106_v21, %v1103_v19  ;;  %v693_v44 = vld [vmem:[#allocation2 + $0x38] sm:$0x1]  ;;  %v7286_v20 = vld [vmem:[#allocation2 + $0x8c] sm:$0x1]  ;;  %v419_v47 = vor.u32 %v417_v2, %v416_v27  ;;  %v420_v48 = vrot.slane %v416_v27, 4  ;;  %v424_v49 = vrot.slane %v422_v28, 7 }
  0x68   : > { %v694_v46 = vsel %vm7040_vm5, %v412_v16, %v693_v44  ;;  %239 = vst [vmem:[#allocation2 + $0x90] sm:$0x1] %v238_v45  ;;  %v1112_v53 = vrot.slane %v1110_v42, 5  ;;  %v1116_v54 = vrot.slane %v1114_v37, 4  ;;  %v1120_v55 = vshll.u32 %v7286_v20, 16 }
  0x69   : > { %v1108_v51 = vrot.slane %v1107_v40, 4  ;;  %695 = vst [vmem:[#allocation2 + $0x38] sm:$0x1] %v694_v46  ;;  %v696_v56 = vld [vmem:[#allocation2 + $0x3c] sm:$0xf]  ;;  %v427_v57 = vor.u32 %v425_v31, %v424_v49  ;;  %v429_v58 = vrot.slane %v424_v49, 4 }
  0x6a   : > { %v697_v59 = vsel %vm7083_vm9, %v419_v47, %v696_v56  ;;  %v700_v60 = vld [vmem:[#allocation2 + $0x44] sm:$0x1]  ;;  %v294_v61 = vsel %vm7048_vm7, 0, %v293_v25  ;;  %v240_v62 = vld [vmem:[#allocation2 + $0x9c] sm:$0x1]  ;;  %v1117_v63 = vor.u32 %v1116_v54, %v1112_v53  ;;  %v1122_v0 = vrot.slane %v1120_v55, 5 }
  0x6b   : > { %v1113_v24 = vsel %vm7131_vm13, %v1108_v51, %v1112_v53  ;;  %698 = vst [vmem:[#allocation2 + $0x3c] sm:$0xf] %v697_v59  ;;  %295 = vst [vmem:[#allocation2 + $0x98] sm:$0x1] %v294_v61  ;;  %v533_v1 = vshrl.u32 %v333_v38, 16  ;;  %v428_v52 = vsel %vm7091_vm12, %v420_v48, %v427_v57  ;;  %v701_v4 = vsel %vm7040_vm5, %v429_v58, %v700_v60 }
  0x6c   : > { %v296_v2 = vld [vmem:[#allocation2 + $0xa4] sm:$0x1]  ;;  %v536_v6 = vshll.u32 %v333_v38, 16  ;;  %v541_v8 = vshrl.u32 %v334_v50, 16  ;;  %v1118_v39 = vrot.slane %v1117_v63, 4  ;;  %v544_v14 = vshll.u32 %v334_v50, 16 }
  0x6d   : > { %v7302_v9 = vld [vmem:[#allocation2 + $0x30] sm:$0xf]  ;;  %699 = vst.msk [vmem:[#allocation2 + $0x40] sm:$0xf] %vm189_vm2, %v428_v52  ;;  %702 = vst [vmem:[#allocation2 + $0x44] sm:$0x1] %v701_v4 }
  0x6e   : > { %v535_v12 = vrot.slane %v533_v1, 7  ;;  %v241_v16 = vsel %vm7040_vm5, 0, %v240_v62  ;;  %v7307_v17 = vld [vmem:[#allocation2 + $0x34] sm:$0xf]  ;;  %v933_v18 = vshrl.u32 %v7302_v9, 16  ;;  %v936_v19 = vshll.u32 %v7302_v9, 16 }
  0x6f   : > { %v543_v21 = vrot.slane %v541_v8, 7  ;;  %242 = vst [vmem:[#allocation2 + $0x9c] sm:$0x1] %v241_v16  ;;  %v297_v22 = vsel %vm7048_vm7, 0, %v296_v2  ;;  %v1123_v25 = vsel %vm7131_vm13, %v1118_v39, %v1122_v0  ;;  %v942_v26 = vshll.u32 %v7307_v17, 16 }
  0x70   : > { %v946_v27 = vshrl.u32 %v7307_v17, 16  ;;  %v538_v28 = vor.u32 %v536_v6, %v535_v12  ;;  %v745_v31 = vld [vmem:[#allocation2 + $0x90] sm:$0xf]  ;;  %298 = vst [vmem:[#allocation2 + $0xa4] sm:$0x1] %v297_v22  ;;  %v5704_v40 = vcombine.low %v1113_v24, %v1123_v25  ;;  %v935_v37 = vrot.slane %v933_v18, 4 }
  0x71   : > { %v335_v38 = vld [vmem:[%s7060_s5 + $0x60] sm:$0xf]  ;;  %v7318_v42 = vld [vmem:[#allocation2 + $0x38] sm:$0x1]  ;;  %v938_v44 = vrot.slane %v936_v19, 5  ;;  %v539_v45 = vrot.slane %v535_v12, 4  ;;  %v546_v49 = vor.u32 %v544_v14, %v543_v21 }
  0x72   : > { %v944_v46 = vrot.slane %v942_v26, 5  ;;  %v948_v47 = vrot.slane %v946_v27, 4  ;;  %v952_v48 = vshll.u32 %v7318_v42, 16  ;;  %6476 = vmatmul.mubr.msk.bf16.gmra.mxu1 %vm1270_vm14, %v5704_v40  ;;  %v7322_v51 = vld [vmem:[#allocation2 + $0x3c] sm:$0xf]  ;;  %v548_v53 = vrot.slane %v543_v21, 4 }
  0x73   : > { %v939_v50 = vor.u32 %v938_v44, %v935_v37  ;;  %v746_v54 = vsel %vm7083_vm9, %v538_v28, %v745_v31  ;;  %v749_v55 = vld [vmem:[#allocation2 + $0x98] sm:$0x1]  ;;  %v550_v56 = vshrl.u32 %v335_v38, 16  ;;  %v957_v59 = vshrl.u32 %v7322_v51, 16  ;;  %v336_v1 = vld [vmem:[%s7060_s5 + $0x64] sm:$0xf] }
  0x74   : > { %v949_v57 = vor.u32 %v948_v47, %v944_v46  ;;  %v954_v58 = vrot.slane %v952_v48, 5  ;;  %v960_v60 = vshll.u32 %v7322_v51, 16  ;;  %747 = vst [vmem:[#allocation2 + $0x90] sm:$0xf] %v746_v54  ;;  %v7328_v62 = vld [vmem:[#allocation2 + $0x40] sm:$0xf]  ;;  %v547_v63 = vsel %vm7091_vm12, %v539_v45, %v546_v49 }
  0x75   : > { %v940_v61 = vrot.slane %v939_v50, 4  ;;  %v7330_v24 = vld [vmem:[#allocation2 + $0x44] sm:$0x1]  ;;  %v750_v0 = vsel %vm7040_vm5, %v548_v53, %v749_v55  ;;  %v7337_v2 = vrot.slane %v550_v56, 7  ;;  %v219_v52 = vld [vmem:[#allocation2 + $0x48] sm:$0x1] }
  0x76   : > { %v950_v4 = vrot.slane %v949_v57, 4  ;;  %v959_v6 = vrot.slane %v957_v59, 4  ;;  %v962_v8 = vrot.slane %v960_v60, 5  ;;  %v966_v39 = vshll.u32 %v7328_v62, 16  ;;  %748 = vst.msk [vmem:[#allocation2 + $0x94] sm:$0xf] %vm189_vm2, %v547_v63 }
  0x77   : > { %751 = vst [vmem:[#allocation2 + $0x98] sm:$0x1] %v750_v0  ;;  %v275_v12 = vld [vmem:[#allocation2 + $0x50] sm:$0x1]  ;;  %v945_v14 = vsel %vm7131_vm13, %v940_v61, %v944_v46  ;;  %v970_v16 = vshrl.u32 %v7328_v62, 16  ;;  %v976_v18 = vshll.u32 %v7330_v24, 16 }
  0x78   : > { %v553_v19 = vshll.u32 %v335_v38, 16  ;;  %v7346_v21 = vld [vmem:[%s7060_s5 + $0x28] sm:$0xf]  ;;  %v955_v22 = vsel %vm7131_vm13, %v950_v4, %v954_v58  ;;  %v963_v25 = vor.u32 %v962_v8, %v959_v6  ;;  %v968_v26 = vrot.slane %v966_v39, 5  ;;  %v752_v28 = vld [vmem:[#allocation2 + $0x9c] sm:$0xf] }
  0x79   : > { %v556_v27 = vrot.slane %v7337_v2, 4  ;;  %v5838_v31 = vld [vmem:[%s9743_s1 + $0x6] sm:$0x3]  ;;  %v5697_v40 = vcombine.low %v945_v14, %v955_v22  ;;  %v972_v37 = vrot.slane %v970_v16, 4  ;;  %v978_v44 = vrot.slane %v976_v18, 5 }
  0x7a   : > { %v555_v45 = vor.u32 %v553_v19, %v7337_v2  ;;  %v5919_v38 = vld [vmem:[%s9743_s1 + $0x8] sm:$0x3]  ;;  %v964_v46 = vrot.slane %v963_v25, 4  ;;  %v558_v47 = vshrl.u32 %v336_v1, 16  ;;  %v561_v48 = vshll.u32 %v336_v1, 16 }
  0x7b   : > { %v220_v49 = vsel %vm7040_vm5, 0, %v219_v52  ;;  %6463 = vmatprep.mubr.msk.bf16.mxu0 %vm1270_vm14, %v5697_v40  ;;  %v973_v50 = vor.u32 %v972_v37, %v968_v26  ;;  %v7361_v53 = vld [vmem:[#allocation2 + $0x90] sm:$0xf]  ;;  %v276_v55 = vsel %vm7048_vm7, 0, %v275_v12  ;;  %v431_v56 = vshrl.u32 %v7346_v21, 16 }
  0x7c   : > { %v753_v54 = vsel %vm7083_vm9, %v555_v45, %v752_v28  ;;  %221 = vst [vmem:[#allocation2 + $0x48] sm:$0x1] %v220_v49  ;;  %v969_v57 = vsel %vm7131_vm13, %v964_v46, %v968_v26  ;;  %v1125_v58 = vshrl.u32 %v7361_v53, 16  ;;  %v1128_v59 = vshll.u32 %v7361_v53, 16  ;;  %277 = vst [vmem:[#allocation2 + $0x50] sm:$0x1] %v276_v55 }
  0x7d   : > { %v560_v60 = vrot.slane %v558_v47, 7  ;;  %754 = vst [vmem:[#allocation2 + $0x9c] sm:$0xf] %v753_v54  ;;  %v974_v61 = vrot.slane %v973_v50, 4  ;;  %v7372_v63 = vld [vmem:[#allocation2 + $0x94] sm:$0xf]  ;;  %v7379_v2 = vand.u32 %v5838_v31, %v7035_v3  ;;  %v7382_v52 = vand.u32 %v5919_v38, %v7035_v3 }
  0x7e   : > { %v7374_v0 = vld [vmem:[#allocation2 + $0x98] sm:$0x1]  ;;  %v7376_v1 = vrot.slane %v431_v56, 7  ;;  %v1127_v4 = vrot.slane %v1125_v58, 4  ;;  %v1130_v6 = vrot.slane %v1128_v59, 5  ;;  %v1134_v8 = vshll.u32 %v7372_v63, 16 }
  0x7f   : > { %v1138_v39 = vshrl.u32 %v7372_v63, 16  ;;  %v756_v12 = vld [vmem:[#allocation2 + $0xa4] sm:$0x1]  ;;  %v979_v14 = vsel %vm7131_vm13, %v974_v61, %v978_v44  ;;  %v1144_v16 = vshll.u32 %v7374_v0, 16  ;;  %v563_v18 = vor.u32 %v561_v48, %v560_v60  ;;  %v322_v22 = vld [vmem:[%s7060_s5 + $0x2c] sm:$0xf]  ;;  %6555 = vmatprep.subr.bf16.mxu1 %v7379_v2  ;;  %6589 = vmatprep.subr.bf16.mxu0 %v7382_v52 }
  0x80   : > { %v565_v19 = vrot.slane %v560_v60, 4  ;;  %v222_v25 = vld [vmem:[#allocation2 + $0x54] sm:$0x1]  ;;  %v5698_v26 = vcombine.low %v969_v57, %v979_v14  ;;  %v1131_v28 = vor.u32 %v1130_v6, %v1127_v4  ;;  %v1136_v31 = vrot.slane %v1134_v8, 5  ;;  %v278_v46 = vld [vmem:[#allocation2 + $0x5c] sm:$0x1] }
  0x81   : > { %v1140_v40 = vrot.slane %v1138_v39, 4  ;;  %v564_v44 = vsel %vm7091_vm12, %v556_v27, %v563_v18  ;;  %v434_v38 = vshll.u32 %v7346_v21, 16  ;;  %v323_v47 = vld [vmem:[%s7060_s5 + $0x30] sm:$0xf]  ;;  %v1146_v50 = vrot.slane %v1144_v16, 5 }
  0x82   : > { %v757_v45 = vsel %vm7040_vm5, %v565_v19, %v756_v12  ;;  %6464 = vmatmul.mubr.msk.bf16.gmra.mxu0 %vm1270_vm14, %v5698_v26  ;;  %v1132_v48 = vrot.slane %v1131_v28, 4  ;;  %755 = vst.msk [vmem:[#allocation2 + $0xa0] sm:$0xf] %vm189_vm2, %v564_v44  ;;  %v439_v54 = vshrl.u32 %v322_v22, 16  ;;  %v437_v57 = vrot.slane %v7376_v1, 4 }
  0x83   : > { %v1141_v49 = vor.u32 %v1140_v40, %v1136_v31  ;;  %758 = vst [vmem:[#allocation2 + $0xa4] sm:$0x1] %v757_v45  ;;  %v703_v55 = vld [vmem:[#allocation2 + $0x48] sm:$0xf]  ;;  %v436_v27 = vor.u32 %v434_v38, %v7376_v1  ;;  %v442_v21 = vshll.u32 %v322_v22, 16  ;;  %v223_v58 = vsel %vm7040_vm5, 0, %v222_v25 }
  0x84   : > { %v7401_v56 = vld [vmem:[#allocation2 + $0x9c] sm:$0xf]  ;;  %v1137_v59 = vsel %vm7131_vm13, %v1132_v48, %v1136_v31  ;;  %224 = vst [vmem:[#allocation2 + $0x54] sm:$0x1] %v223_v58  ;;  %v324_v6 = vld [vmem:[%s7060_s5 + $0x34] sm:$0xf] }
  0x85   : > { %v1142_v60 = vrot.slane %v1141_v49, 4  ;;  %v1149_v61 = vshrl.u32 %v7401_v56, 16  ;;  %v1152_v4 = vshll.u32 %v7401_v56, 16  ;;  %v441_v8 = vrot.slane %v439_v54, 7  ;;  %v243_v14 = vld [vmem:[#allocation2 + $0xa8] sm:$0x1] }
  0x86   : > { %v704_v39 = vsel %vm7083_vm9, %v436_v27, %v703_v55  ;;  %v279_v1 = vsel %vm7048_vm7, 0, %v278_v46  ;;  %v448_v12 = vshrl.u32 %v323_v47, 16  ;;  %v707_v22 = vld [vmem:[#allocation2 + $0x50] sm:$0x1]  ;;  %v451_v25 = vshll.u32 %v323_v47, 16 }
  0x87   : > { %v1147_v16 = vsel %vm7131_vm13, %v1142_v60, %v1146_v50  ;;  %v1151_v18 = vrot.slane %v1149_v61, 4  ;;  %v1154_v19 = vrot.slane %v1152_v4, 5  ;;  %705 = vst [vmem:[#allocation2 + $0x48] sm:$0xf] %v704_v39  ;;  %280 = vst [vmem:[#allocation2 + $0x5c] sm:$0x1] %v279_v1  ;;  %v444_v31 = vor.u32 %v442_v21, %v441_v8 }
  0x88   : > { %v299_v26 = vld [vmem:[#allocation2 + $0xb0] sm:$0x1]  ;;  %v5705_v28 = vcombine.low %v1137_v59, %v1147_v16  ;;  %v446_v40 = vrot.slane %v441_v8, 4  ;;  %v450_v44 = vrot.slane %v448_v12, 7  ;;  %v456_v38 = vshrl.u32 %v324_v6, 16 }
  0x89   : > { %v1155_v45 = vor.u32 %v1154_v19, %v1151_v18  ;;  %v459_v46 = vshll.u32 %v324_v6, 16  ;;  %v244_v48 = vsel %vm7040_vm5, 0, %v243_v14  ;;  %v337_v49 = vld [vmem:[%s7060_s5 + $0x68] sm:$0xf]  ;;  %v7422_v50 = vld [vmem:[#allocation2 + $0xa0] sm:$0xf]  ;;  %v445_v47 = vsel %vm7091_vm12, %v437_v57, %v444_v31 }
  0x8a   : > { %6479 = vmatprep.mubr.msk.bf16.mxu1 %vm1270_vm14, %v5705_v28  ;;  %v7424_v54 = vld [vmem:[#allocation2 + $0xa4] sm:$0x1]  ;;  %v708_v55 = vsel %vm7040_vm5, %v446_v40, %v707_v22  ;;  %v453_v27 = vor.u32 %v451_v25, %v450_v44  ;;  %v454_v21 = vrot.slane %v450_v44, 4  ;;  %245 = vst [vmem:[#allocation2 + $0xa8] sm:$0x1] %v244_v48  ;;  %v1158_v59 = vshll.u32 %v7422_v50, 16 }
  0x8b   : > { %v1156_v58 = vrot.slane %v1155_v45, 4  ;;  %v1162_v60 = vshrl.u32 %v7422_v50, 16  ;;  %v1168_v61 = vshll.u32 %v7424_v54, 16  ;;  %706 = vst.msk [vmem:[#allocation2 + $0x4c] sm:$0xf] %vm189_vm2, %v445_v47  ;;  %v458_v4 = vrot.slane %v456_v38, 7 }
  0x8c   : > { %709 = vst [vmem:[#allocation2 + $0x50] sm:$0x1] %v708_v55  ;;  %v710_v6 = vld [vmem:[#allocation2 + $0x54] sm:$0xf]  ;;  %v300_v57 = vsel %vm7048_vm7, 0, %v299_v26  ;;  %v567_v39 = vshrl.u32 %v337_v49, 16 }
  0x8d   : > { %v338_v8 = vld [vmem:[%s7060_s5 + $0x6c] sm:$0xf]  ;;  %v570_v1 = vshll.u32 %v337_v49, 16  ;;  %v1160_v12 = vrot.slane %v1158_v59, 5  ;;  %v1164_v14 = vrot.slane %v1162_v60, 4  ;;  %v1170_v16 = vrot.slane %v1168_v61, 5 }
  0x8e   : > { %v711_v18 = vsel %vm7083_vm9, %v453_v27, %v710_v6  ;;  %301 = vst [vmem:[#allocation2 + $0xb0] sm:$0x1] %v300_v57  ;;  %v246_v19 = vld [vmem:[#allocation2 + $0xb4] sm:$0x1]  ;;  %v7439_v22 = vld [vmem:[#allocation2 + $0x48] sm:$0xf]  ;;  %v461_v25 = vor.u32 %v459_v46, %v458_v4 }
  0x8f   : > { %v463_v28 = vrot.slane %v458_v4, 4  ;;  %712 = vst [vmem:[#allocation2 + $0x54] sm:$0xf] %v711_v18  ;;  %v714_v31 = vld [vmem:[#allocation2 + $0x5c] sm:$0x1]  ;;  %v569_v40 = vrot.slane %v567_v39, 7  ;;  %v1161_v26 = vsel %vm7131_vm13, %v1156_v58, %v1160_v12  ;;  %v1165_v44 = vor.u32 %v1164_v14, %v1160_v12 }
  0x90   : > { %v981_v45 = vshrl.u32 %v7439_v22, 16  ;;  %v984_v38 = vshll.u32 %v7439_v22, 16  ;;  %v302_v48 = vld [vmem:[#allocation2 + $0xbc] sm:$0x1]  ;;  %v462_v49 = vsel %vm7091_vm12, %v454_v21, %v461_v25  ;;  %v7450_v27 = vld [vmem:[%s7060_s5 + $0x70] sm:$0xf] }
  0x91   : > { %v715_v47 = vsel %vm7040_vm5, %v463_v28, %v714_v31  ;;  %v572_v46 = vor.u32 %v570_v1, %v569_v40  ;;  %v573_v55 = vrot.slane %v569_v40, 4  ;;  %v1166_v59 = vrot.slane %v1165_v44, 4  ;;  %713 = vst.msk [vmem:[#allocation2 + $0x58] sm:$0xf] %vm189_vm2, %v462_v49  ;;  %v759_v4 = vld [vmem:[#allocation2 + $0xa8] sm:$0xf] }
  0x92   : > { %v983_v60 = vrot.slane %v981_v45, 4  ;;  %v986_v61 = vrot.slane %v984_v38, 5  ;;  %716 = vst [vmem:[#allocation2 + $0x5c] sm:$0x1] %v715_v47  ;;  %v575_v58 = vshrl.u32 %v338_v8, 16  ;;  %v578_v21 = vshll.u32 %v338_v8, 16 }
  0x93   : > { %v7453_v6 = vld [vmem:[#allocation2 + $0x4c] sm:$0xf]  ;;  %v7455_v57 = vld [vmem:[#allocation2 + $0x50] sm:$0x1]  ;;  %v760_v39 = vsel %vm7083_vm9, %v572_v46, %v759_v4  ;;  %v247_v1 = vsel %vm7040_vm5, 0, %v246_v19  ;;  %v1171_v14 = vsel %vm7131_vm13, %v1166_v59, %v1170_v16  ;;  %v303_v19 = vsel %vm7048_vm7, 0, %v302_v48 }
  0x94   : > { %v987_v18 = vor.u32 %v986_v61, %v983_v60  ;;  %v990_v25 = vshll.u32 %v7453_v6, 16  ;;  %v994_v28 = vshrl.u32 %v7453_v6, 16  ;;  %761 = vst [vmem:[#allocation2 + $0xa8] sm:$0xf] %v760_v39  ;;  %248 = vst [vmem:[#allocation2 + $0xb4] sm:$0x1] %v247_v1  ;;  %v5706_v8 = vcombine.low %v1161_v26, %v1171_v14 }
  0x95   : > { %v1000_v31 = vshll.u32 %v7455_v57, 16  ;;  %v577_v40 = vrot.slane %v575_v58, 7  ;;  %304 = vst [vmem:[#allocation2 + $0xbc] sm:$0x1] %v303_v19  ;;  %v584_v16 = vshrl.u32 %v7450_v27, 16  ;;  %vm1827_vm15 = vcmask 1042432  }
  0x96   : > { %v988_v44 = vrot.slane %v987_v18, 4  ;;  %v992_v45 = vrot.slane %v990_v25, 5  ;;  %v996_v38 = vrot.slane %v994_v28, 4  ;;  %v7470_v49 = vld [vmem:[#allocation2 + $0x54] sm:$0xf]  ;;  %6480 = vmatmul.mubr.msk.bf16.gmra.mxu1 %vm1270_vm14, %v5706_v8  ;;  %vm1828_vm0 = vcmask 1046532  }
  0x97   : > { %v1002_v47 = vrot.slane %v1000_v31, 5  ;;  %v1005_v46 = vshrl.u32 %v7470_v49, 16  ;;  %v1008_v26 = vshll.u32 %v7470_v49, 16  ;;  %v580_v59 = vor.u32 %v578_v21, %v577_v40  ;;  %v763_v60 = vld [vmem:[#allocation2 + $0xb0] sm:$0x1]  ;;  %vm7511_vm1 = vmor %vm1827_vm15, %vm1828_vm0 }
  0x98   : > { %v993_v48 = vsel %vm7131_vm13, %v988_v44, %v992_v45  ;;  %v997_v61 = vor.u32 %v996_v38, %v992_v45  ;;  %v582_v58 = vrot.slane %v577_v40, 4  ;;  %v7478_v4 = vrot.slane %v584_v16, 7  ;;  %v7480_v39 = vld [vmem:[#allocation2 + $0x58] sm:$0xf]  ;;  %v340_v38 = vld [vmem:[%s7060_s5 + $0x74] sm:$0xf] }
  0x99   : > { %v7482_v1 = vld [vmem:[#allocation2 + $0x5c] sm:$0x1]  ;;  %v1007_v14 = vrot.slane %v1005_v46, 4  ;;  %v1010_v18 = vrot.slane %v1008_v26, 5  ;;  %v581_v25 = vsel %vm7091_vm12, %v573_v55, %v580_v59  ;;  %v1014_v8 = vshll.u32 %v7480_v39, 16 }
  0x9a   : > { %v998_v28 = vrot.slane %v997_v61, 4  ;;  %v1018_v31 = vshrl.u32 %v7480_v39, 16  ;;  %v1024_v40 = vshll.u32 %v7482_v1, 16  ;;  %762 = vst.msk [vmem:[#allocation2 + $0xac] sm:$0xf] %vm189_vm2, %v581_v25  ;;  %v764_v44 = vsel %vm7040_vm5, %v582_v58, %v763_v60 }
  0x9b   : > { %v1011_v19 = vor.u32 %v1010_v18, %v1007_v14  ;;  %v7494_v45 = vld [vmem:[#allocation2 + $0xa8] sm:$0xf]  ;;  %v587_v55 = vshll.u32 %v7450_v27, 16  ;;  %v590_v16 = vrot.slane %v7478_v4, 4  ;;  %v1016_v26 = vrot.slane %v1014_v8, 5 }
  0x9c   : > { %v1003_v46 = vsel %vm7131_vm13, %v998_v28, %v1002_v47  ;;  %v1020_v59 = vrot.slane %v1018_v31, 4  ;;  %v1026_v61 = vrot.slane %v1024_v40, 5  ;;  %765 = vst [vmem:[#allocation2 + $0xb0] sm:$0x1] %v764_v44  ;;  %v1173_v14 = vshrl.u32 %v7494_v45, 16 }
  0x9d   : > { %v5699_v21 = vcombine.low %v993_v48, %v1003_v46  ;;  %v1012_v25 = vrot.slane %v1011_v19, 4  ;;  %v1176_v60 = vshll.u32 %v7494_v45, 16  ;;  %v766_v58 = vld [vmem:[#allocation2 + $0xb4] sm:$0xf]  ;;  %v589_v12 = vor.u32 %v587_v55, %v7478_v4  ;;  %v1779_v37 = vld [vmem:[#allocation2] sm:$0xe] }
  0x9e   : > { %v1021_v18 = vor.u32 %v1020_v59, %v1016_v26  ;;  %v592_v27 = vshrl.u32 %v340_v38, 16  ;;  %v595_v15 = vshll.u32 %v340_v38, 16  ;;  %v1780_v30 = vld [vmem:[#allocation2 + $0xc] sm:$0xe]  ;;  %v1175_v28 = vrot.slane %v1173_v14, 4 }
  0x9f   : > { %6467 = vmatprep.mubr.msk.bf16.mxu0 %vm1270_vm14, %v5699_v21  ;;  %v1017_v47 = vsel %vm7131_vm13, %v1012_v25, %v1016_v26  ;;  %v1178_v48 = vrot.slane %v1176_v60, 5  ;;  %v767_v40 = vsel %vm7083_vm9, %v589_v12, %v766_v58  ;;  %v5757_v21 = vrot.slane %v1779_v37, 9  ;;  %v7515_v38 = vld [vmem:[#allocation2 + $0x4] sm:$0xf]  ;;  %v770_v14 = vld [vmem:[#allocation2 + $0xbc] sm:$0x1] }
  0xa0   : > { %v1022_v8 = vrot.slane %v1021_v18, 4  ;;  %v594_v31 = vrot.slane %v592_v27, 7  ;;  %768 = vst [vmem:[#allocation2 + $0xb4] sm:$0xf] %v767_v40  ;;  %v1832_v55 = vrot.slane %v7515_v38, 5  ;;  %v5758_v46 = vrot.slane %v1780_v30, 9 }
  0xa1   : > { %v7509_v19 = vld [vmem:[#allocation2 + $0xac] sm:$0xf]  ;;  %v1179_v4 = vor.u32 %v1178_v48, %v1175_v28  ;;  %v1781_v28 = vld [vmem:[#allocation2 + $0x18] sm:$0xe]  ;;  %v5876_v7 = vld [vmem:[#allocation2 + $0x20] sm:$0x1] }
  0xa2   : > { %v1027_v26 = vsel %vm7131_vm13, %v1022_v8, %v1026_v61  ;;  %v1182_v12 = vshll.u32 %v7509_v19, 16  ;;  %v1186_v59 = vshrl.u32 %v7509_v19, 16  ;;  %v597_v25 = vor.u32 %v595_v15, %v594_v31 }
  0xa3   : > { %v5700_v60 = vcombine.low %v1017_v47, %v1027_v26  ;;  %v7522_v58 = vld [vmem:[#allocation2 + $0xb0] sm:$0x1]  ;;  %v1180_v18 = vrot.slane %v1179_v4, 4  ;;  %v599_v27 = vrot.slane %v594_v31, 4  ;;  %v1833_v37 = vsel %vm7511_vm1, %v5757_v21, %v1832_v55  ;;  %v1782_v4 = vld [vmem:[#allocation2 + $0x24] sm:$0xe] }
  0xa4   : > { %v1184_v48 = vrot.slane %v1182_v12, 5  ;;  %v1188_v30 = vrot.slane %v1186_v59, 4  ;;  %v1192_v40 = vshll.u32 %v7522_v58, 16  ;;  %v598_v61 = vsel %vm7091_vm12, %v590_v16, %v597_v25  ;;  %v1783_v59 = vld [vmem:[#allocation2 + $0x30] sm:$0xe] }
  0xa5   : > { %6468 = vmatmul.mubr.msk.bf16.gmra.mxu0 %vm1270_vm14, %v5700_v60  ;;  %769 = vst.msk [vmem:[#allocation2 + $0xb8] sm:$0xf] %vm189_vm2, %v598_v61  ;;  %v771_v15 = vsel %vm7040_vm5, %v599_v27, %v770_v14  ;;  %v1834_v47 = vrot.slane %v1832_v55, 4  ;;  %v1840_v8 = vsel %vm7511_vm1, %v5758_v46, %v1839_v10  ;;  %v1841_v31 = vrot.slane %v1839_v10, 4  ;;  %v7549_v10 = vld [vmem:[#allocation2 + $0x1c] sm:$0xf] }
  0xa6   : > { %v1185_v16 = vsel %vm7131_vm13, %v1180_v18, %v1184_v48  ;;  %v1189_v21 = vor.u32 %v1188_v30, %v1184_v48  ;;  %v1194_v26 = vrot.slane %v1192_v40, 5  ;;  %772 = vst [vmem:[#allocation2 + $0xbc] sm:$0x1] %v771_v15  ;;  %v5759_v12 = vrot.slane %v1781_v28, 9 }
  0xa7   : > { %v9774_v25 = vrot.slane %v7112_v11, 5  ;;  %v9775_v14 = vrot.slane %v7141_v36, 5  ;;  %v1846_v60 = vrot.slane %v7549_v10, 5  ;;  %v1849_v18 = vrot.slane %v7217_v13, 5  ;;  %v7553_v48 = vld [vmem:[#allocation2 + $0xb4] sm:$0xf] }
  0xa8   : > { %v1190_v27 = vrot.slane %v1189_v21, 4  ;;  %v5760_v11 = vrot.slane %v1782_v4, 9  ;;  %v1197_v40 = vshrl.u32 %v7553_v48, 16  ;;  %v1200_v61 = vshll.u32 %v7553_v48, 16 }
  0xa9   : > { %v1836_v55 = vsel %vm7511_vm1, %v1834_v47, %v9774_v25  ;;  %v1843_v46 = vsel %vm7511_vm1, %v1841_v31, %v9775_v14  ;;  %v1847_v36 = vsel %vm7511_vm1, %v5759_v12, %v1846_v60  ;;  %v1848_v15 = vrot.slane %v1846_v60, 4 }
  0xaa   : > { %v5774_v28 = vcombine.low %v1833_v37, %v1836_v55  ;;  %v5775_v30 = vcombine.low %v1840_v8, %v1843_v46  ;;  %v1195_v47 = vsel %vm7131_vm13, %v1190_v27, %v1194_v26  ;;  %v1853_v13 = vrot.slane %v7228_v32, 5 }
  0xab   : > { %v1856_v31 = vrot.slane %v7231_v43, 5  ;;  %v5761_v37 = vrot.slane %v1783_v59, 9  ;;  %v5707_v8 = vcombine.low %v1185_v16, %v1195_v47  ;;  %v1199_v4 = vrot.slane %v1197_v40, 4  ;;  %v1784_v40 = vld [vmem:[#allocation2 + $0x3c] sm:$0xe] }
  0xac   : > { %6523 = vmatprep.mubr.msk.bf16.mxu0 %vm1270_vm14, %v5774_v28  ;;  %v1202_v21 = vrot.slane %v1200_v61, 5  ;;  %v1850_v25 = vsel %vm7511_vm1, %v1848_v15, %v1849_v18  ;;  %v7566_v55 = vld [vmem:[#allocation2 + $0xb8] sm:$0xf]  ;;  %v1855_v14 = vrot.slane %v1853_v13, 4  ;;  %v1860_v46 = vrot.slane %v7307_v17, 5 }
  0xad   : > { %v5776_v12 = vcombine.low %v1847_v36, %v1850_v25  ;;  %6483 = vmatprep.mubr.msk.bf16.mxu1 %vm1270_vm14, %v5707_v8  ;;  %v7570_v26 = vld [vmem:[#allocation2 + $0xbc] sm:$0x1]  ;;  %v1206_v43 = vshll.u32 %v7566_v55, 16  ;;  %v1210_v16 = vshrl.u32 %v7566_v55, 16  ;;  %6524 = vmatmul.mubr.msk.bf16.vlgmr.msra.gmra.mxu0 %vm1270_vm14, %v5775_v30  ;;  %v1863_v59 = vrot.slane %v7318_v42, 5 }
  0xae   : > { %v1203_v32 = vor.u32 %v1202_v21, %v1199_v4  ;;  %v1216_v60 = vshll.u32 %v7570_v26, 16  ;;  %6590 = vmatpush3.bf16.msra.mxu0 %v7382_v52  ;;  %v1854_v18 = vsel %vm7511_vm1, %v5760_v11, %v1853_v13  ;;  %v1857_v27 = vsel %vm7511_vm1, %v1855_v14, %v1856_v31  ;;  %v1785_v47 = vld [vmem:[#allocation2 + $0x48] sm:$0xe]  ;;  %v1786_v14 = vld [vmem:[#allocation2 + $0x54] sm:$0xe] }
  0xaf   : > { %6527 = vmatprep.mubr.msk.bf16.mxu0 %vm1270_vm14, %v5776_v12  ;;  %v1862_v28 = vrot.slane %v1860_v46, 4  ;;  %v1208_v36 = vrot.slane %v1206_v43, 5  ;;  %v1212_v15 = vrot.slane %v1210_v16, 4  ;;  %v1861_v42 = vsel %vm7511_vm1, %v5761_v37, %v1860_v46 }
  0xb0   : > { %v1204_v61 = vrot.slane %v1203_v32, 4  ;;  %v1867_v52 = vrot.slane %v7328_v62, 5  ;;  %v1218_v4 = vrot.slane %v1216_v60, 5  ;;  %v5777_v11 = vcombine.low %v1854_v18, %v1857_v27  ;;  %v6855_v18 = vld [vmem:[#allocation2] sm:$0xf] }
  0xb1   : > { %v1864_v30 = vsel %vm7511_vm1, %v1862_v28, %v1863_v59  ;;  %v1213_v8 = vor.u32 %v1212_v15, %v1208_v36  ;;  %v5762_v13 = vrot.slane %v1784_v40, 9  ;;  %v1870_v25 = vrot.slane %v7330_v24, 5  ;;  %v1787_v40 = vld [vmem:[#allocation2 + $0x60] sm:$0xe] }
  0xb2   : > { %v5778_v21 = vcombine.low %v1861_v42, %v1864_v30  ;;  %v1869_v31 = vrot.slane %v1867_v52, 4  ;;  %v1874_v12 = vrot.slane %v7453_v6, 5  ;;  %v1209_v37 = vsel %vm7131_vm13, %v1204_v61, %v1208_v36  ;;  %v1788_v42 = vld [vmem:[#allocation2 + $0x6c] sm:$0xe] }
  0xb3   : > { %v1214_v46 = vrot.slane %v1213_v8, 4  ;;  %v5763_v32 = vrot.slane %v1785_v47, 9  ;;  %v1877_v43 = vrot.slane %v7455_v57, 5  ;;  %v1881_v59 = vrot.slane %v7480_v39, 5  ;;  %v7608_v47 = vld [vmem:[#allocation2 + $0x64] sm:$0xf] }
  0xb4   : > { %v1876_v16 = vrot.slane %v1874_v12, 4  ;;  %v5725_v27 = vcombine.low %v6855_v18, %v7515_v38  ;;  %v1868_v24 = vsel %vm7511_vm1, %v5762_v13, %v1867_v52  ;;  %v5764_v28 = vrot.slane %v1786_v14, 9  ;;  %v6857_v8 = vld [vmem:[#allocation2 + $0x68] sm:$0x1] }
  0xb5   : > { %v1219_v60 = vsel %vm7131_vm13, %v1214_v46, %v1218_v4  ;;  %6528 = vmatmul.mubr.msk.bf16.gmra.mxu0 %vm1270_vm14, %v5777_v11  ;;  %v1871_v57 = vsel %vm7511_vm1, %v1869_v31, %v1870_v25  ;;  %v1883_v36 = vrot.slane %v1881_v59, 4  ;;  %v1884_v15 = vrot.slane %v7482_v1, 5  ;;  %v7613_v31 = vld [vmem:[#allocation2 + $0x70] sm:$0xf]  ;;  %v1789_v46 = vld [vmem:[#allocation2 + $0x78] sm:$0xe] }
  0xb6   : > { %v5708_v61 = vcombine.low %v1209_v37, %v1219_v60  ;;  %6531 = vmatprep.mubr.msk.bf16.mxu0 %vm1270_vm14, %v5778_v21  ;;  %v1875_v38 = vsel %vm7511_vm1, %v5763_v32, %v1874_v12  ;;  %v1878_v30 = vsel %vm7511_vm1, %v1876_v16, %v1877_v43  ;;  %v1888_v52 = vrot.slane %v7608_v47, 5  ;;  %v6859_v32 = vld [vmem:[#allocation2 + $0x18] sm:$0xf]  ;;  %v7623_v16 = vld [vmem:[#allocation2 + $0x24] sm:$0xf] }
  0xb7   : > { %v1891_v4 = vrot.slane %v6857_v8, 5  ;;  %v5765_v11 = vrot.slane %v1787_v40, 9  ;;  %v5779_v13 = vcombine.low %v1868_v24, %v1871_v57  ;;  %v5766_v21 = vrot.slane %v1788_v42, 9  ;;  %v7625_v60 = vld [vmem:[#allocation2 + $0x28] sm:$0xf] }
  0xb8   : > { %6484 = vmatmul.mubr.msk.bf16.gmra.mxu1 %vm1270_vm14, %v5708_v61  ;;  %v1890_v1 = vrot.slane %v1888_v52, 4  ;;  %v1895_v25 = vrot.slane %v7613_v31, 5  ;;  %v5780_v12 = vcombine.low %v1875_v38, %v1878_v30  ;;  %v7618_v14 = vsel %vm7511_vm1, %v5764_v28, %v1881_v59  ;;  %v7631_v24 = vld [vmem:[#allocation2 + $0x7c] sm:$0xf]  ;;  %v1791_v28 = vld [vmem:[#allocation2 + $0x90] sm:$0xe] }
  0xb9   : > { %6489 = vmatprep.mubr.msk.bf16.mxu1 %vm1270_vm14, %v5725_v27  ;;  %v1885_v37 = vsel %vm7511_vm1, %v1883_v36, %v1884_v15  ;;  %v5727_v43 = vcombine.low %v6859_v32, %v7549_v10  ;;  %v5728_v18 = vcombine.low %v7623_v16, %v7625_v60  ;;  %v1902_v59 = vrot.slane %v7631_v24, 5  ;;  %v6863_v57 = vld [vmem:[#allocation2 + $0x74] sm:$0x1]  ;;  %v1790_v15 = vld [vmem:[#allocation2 + $0x84] sm:$0xe] }
  0xba   : > { %v1889_v10 = vsel %vm7511_vm1, %v5765_v11, %v1888_v52  ;;  %v1892_v61 = vsel %vm7511_vm1, %v1890_v1, %v1891_v4  ;;  %v1898_v36 = vrot.slane %v6863_v57, 5  ;;  %v5781_v42 = vcombine.low %v7618_v14, %v1885_v37  ;;  %v1792_v32 = vld [vmem:[#allocation2 + $0x9c] sm:$0xe]  ;;  %v6864_v52 = vld [vmem:[#allocation2 + $0x80] sm:$0x1] }
  0xbb   : > { %v7644_v38 = vsel %vm7511_vm1, %v5766_v21, %v1895_v25  ;;  %v1897_v30 = vrot.slane %v1895_v25, 4  ;;  %v5767_v8 = vrot.slane %v1789_v46, 9  ;;  %v1905_v11 = vrot.slane %v6864_v52, 5  ;;  %v5873_v52 = vld [vmem:[#allocation2 + $0x14] sm:$0x1] }
  0xbc   : > { %v5769_v40 = vrot.slane %v1791_v28, 9  ;;  %v1916_v4 = vrot.slane %v7372_v63, 5  ;;  %v1919_v1 = vrot.slane %v7374_v0, 5  ;;  %v5782_v57 = vcombine.low %v1889_v10, %v1892_v61  ;;  %v5871_v10 = vld [vmem:[#allocation2 + $0xc] sm:$0xf] }
  0xbd   : > { %6532 = vmatmul.mubr.msk.bf16.gmra.mxu0 %vm1270_vm14, %v5779_v13  ;;  %v1904_v13 = vrot.slane %v1902_v59, 4  ;;  %v5768_v27 = vrot.slane %v1790_v15, 9  ;;  %v1909_v14 = vrot.slane %v7275_v23, 5  ;;  %v9776_v21 = vcombine.low %v7137_v34, %v7139_v35  ;;  %v5874_v0 = vld [vmem:[#allocation2 + $0x18] sm:$0xf] }
  0xbe   : > { %6535 = vmatprep.mubr.msk.bf16.mxu0 %vm1270_vm14, %v5780_v12  ;;  %v7656_v25 = vsel %vm7511_vm1, %v5769_v40, %v1916_v4  ;;  %v1918_v12 = vrot.slane %v1916_v4, 4  ;;  %v5770_v37 = vrot.slane %v1792_v32, 9  ;;  %v1923_v46 = vrot.slane %v7422_v50, 5  ;;  %v7697_v32 = vld [vmem:[#allocation2 + $0x78] sm:$0xf] }
  0xbf   : > { %v7663_v23 = vsel %vm7511_vm1, %v1897_v30, %v1898_v36  ;;  %v7667_v34 = vsel %vm7511_vm1, %v5767_v8, %v1902_v59  ;;  %v1926_v35 = vrot.slane %v7424_v54, 5  ;;  %v1912_v28 = vrot.slane %v7286_v20, 5  ;;  %v7689_v36 = vld [vmem:[#allocation2 + $0x60] sm:$0xf]  ;;  %v7693_v30 = vld [vmem:[#allocation2 + $0x6c] sm:$0xf] }
  0xc0   : > { %6490 = vmatmul.mubr.msk.bf16.vlgmr.msra.gmra.mxu1 %vm1270_vm14, %v9776_v21  ;;  %v1925_v40 = vrot.slane %v1923_v46, 4  ;;  %v7683_v59 = vsel %vm7511_vm1, %v1904_v13, %v1905_v11  ;;  %v1911_v54 = vrot.slane %v1909_v14, 4  ;;  %v7705_v4 = vld [vmem:[#allocation2 + $0x10] sm:$0xf]  ;;  %v7710_v13 = vld [vmem:[#allocation2 + $0x84] sm:$0xf]  ;;  %v9778_v8 = vcombine.low %v7302_v9, %v7307_v17 }
  0xc1   : > { %6556 = vmatpush3.bf16.msra.mxu1 %v7379_v2  ;;  %6493 = vmatprep.mubr.msk.bf16.mxu1 %vm1270_vm14, %v5727_v43  ;;  %v7675_v2 = vsel %vm7511_vm1, %v1918_v12, %v1919_v1  ;;  %v7679_v43 = vsel %vm7511_vm1, %v5770_v37, %v1923_v46  ;;  %9777 = vst [vmem:[#allocation10_spill] sm:$0xff] %v7705_v4  ;;  %v7712_v21 = vld [vmem:[#allocation2 + $0x88] sm:$0xf]  ;;  %v2650_v20 = vshll.u32 %v5871_v10, 16  ;;  %v2671_v15 = vshrl.u32 %v5874_v0, 16 }
  0xc2   : > { %v7703_v11 = vsel %vm7511_vm1, %v1925_v40, %v1926_v35  ;;  %v5783_v1 = vcombine.low %v7644_v38, %v7663_v23  ;;  %v1793_v46 = vld [vmem:[#allocation2 + $0xa8] sm:$0xe]  ;;  %v7725_v38 = vsel %vm7511_vm1, %v5768_v27, %v1909_v14  ;;  %v1794_v23 = vld [vmem:[#allocation2 + $0xb4] sm:$0xe]  ;;  %v2647_v40 = vshrl.u32 %v5871_v10, 16 }
  0xc3   : > { %v7729_v12 = vsel %vm7511_vm1, %v1911_v54, %v1912_v28  ;;  %v5984_v27 = vld [vmem:[%s9743_s1 + $0xa] sm:$0x3]  ;;  %v5771_v14 = vrot.slane %v1793_v46, 9  ;;  %v1930_v28 = vrot.slane %v7509_v19, 5  ;;  %v1933_v10 = vrot.slane %v7522_v58, 5 }
  0xc4   : > { %v1937_v54 = vrot.slane %v7566_v55, 5  ;;  %v6049_v35 = vld [vmem:[%s9743_s1 + $0xc] sm:$0x3]  ;;  %v5772_v37 = vrot.slane %v1794_v23, 9  ;;  %v2649_v16 = vrot.slane %v2647_v40, 4  ;;  %v2652_v60 = vrot.slane %v2650_v20, 5 }
  0xc5   : > { %6536 = vmatmul.mubr.msk.bf16.gmra.mxu0 %vm1270_vm14, %v5781_v42  ;;  %v5784_v42 = vcombine.low %v7667_v34, %v7683_v59  ;;  %v2660_v34 = vshrl.u32 %v7705_v4, 16  ;;  %v5875_v59 = vld [vmem:[#allocation2 + $0x1c] sm:$0xf]  ;;  %v2674_v61 = vshll.u32 %v5874_v0, 16  ;;  %v5785_v33 = vcombine.low %v7725_v38, %v7729_v12  ;;  %v7760_v40 = vld [vmem:[#allocation2 + $0x28] sm:$0xf] }
  0xc6   : > { %6539 = vmatprep.mubr.msk.bf16.mxu0 %vm1270_vm14, %v5782_v57  ;;  %v2656_v57 = vshll.u32 %v7705_v4, 16  ;;  %v2680_v58 = vshll.u32 %v5875_v59, 16  ;;  %v5877_v4 = vld [vmem:[#allocation2 + $0x24] sm:$0xf]  ;;  %v1940_v41 = vrot.slane %v7570_v26, 5  ;;  %v2684_v5 = vshrl.u32 %v5875_v59, 16 }
  0xc7   : > { %v2662_v46 = vrot.slane %v2660_v34, 4  ;;  %v7758_v9 = vand.u32 %v5984_v27, %v7035_v3  ;;  %v1932_v17 = vrot.slane %v1930_v28, 4  ;;  %v2666_v20 = vshll.u32 %v5873_v52, 16  ;;  %9779 = vst [vmem:[#allocation11_spill] sm:$0xff] %v7760_v40  ;;  %v7771_v52 = vld [vmem:[#allocation2 + $0x2c] sm:$0x1] }
  0xc8   : > { %6494 = vmatmul.mubr.msk.bf16.gmra.mxu1 %vm1270_vm14, %v5728_v18  ;;  %v7752_v18 = vrot.slane %v2656_v57, 5  ;;  %v2673_v23 = vrot.slane %v2671_v15, 4  ;;  %v2676_v0 = vrot.slane %v2674_v61, 5  ;;  %v7763_v57 = vrot.slane %v2680_v58, 5  ;;  %v5880_v27 = vld [vmem:[#allocation2 + $0x30] sm:$0xf] }
  0xc9   : > { %6497 = vmatprep.mubr.msk.bf16.mxu1 %vm1270_vm14, %v9778_v8  ;;  %v1939_v8 = vrot.slane %v1937_v54, 4  ;;  %v2686_v34 = vrot.slane %v2684_v5, 4  ;;  %6623 = vmatprep.subr.bf16.mxu1 %v7758_v9  ;;  %v7767_v26 = vand.u32 %v6049_v35, %v7035_v3  ;;  %v2653_v12 = vor.u32 %v2652_v60, %v2649_v16  ;;  %v7790_v60 = vld [vmem:[#allocation2 + $0x34] sm:$0xf] }
  0xca   : > { %v2663_v38 = vor.u32 %v2662_v46, %v7752_v18  ;;  %v2695_v15 = vshrl.u32 %v5877_v4, 16  ;;  %v2698_v59 = vshll.u32 %v5877_v4, 16  ;;  %v7775_v61 = vsel %vm7511_vm1, %v5771_v14, %v1930_v28 }
  0xcb   : > { %v7779_v5 = vsel %vm7511_vm1, %v5772_v37, %v1937_v54  ;;  %6657 = vmatprep.subr.bf16.mxu0 %v7767_v26  ;;  %v2708_v35 = vshrl.u32 %v7760_v40, 16  ;;  %v7788_v4 = vrot.slane %v2666_v20, 5  ;;  %v2690_v16 = vshll.u32 %v5876_v7, 16 }
  0xcc   : > { %v2697_v14 = vrot.slane %v2695_v15, 4  ;;  %v2700_v28 = vrot.slane %v2698_v59, 5  ;;  %v9781_v37 = vcombine.low %v7439_v22, %v7453_v6  ;;  %v2677_v54 = vor.u32 %v2676_v0, %v2673_v23  ;;  %v7806_v6 = vld [vmem:[#allocation2 + $0x38] sm:$0x1] }
  0xcd   : > { %6540 = vmatmul.mubr.msk.bf16.gmra.mxu0 %vm1270_vm14, %v5783_v1  ;;  %v2704_v1 = vshll.u32 %v7760_v40, 16  ;;  %v2687_v46 = vor.u32 %v2686_v34, %v7763_v57  ;;  %v7801_v20 = vrot.slane %v2663_v38, 4  ;;  %v2719_v7 = vshrl.u32 %v5880_v27, 16 }
  0xce   : > { %6543 = vmatprep.mubr.msk.bf16.mxu0 %vm1270_vm14, %v5784_v42  ;;  %v9780_v42 = vcombine.low %v7322_v51, %v7328_v62  ;;  %v2710_v51 = vrot.slane %v2708_v35, 4  ;;  %v5883_v62 = vld [vmem:[#allocation2 + $0x3c] sm:$0xf]  ;;  %v2722_v15 = vshll.u32 %v5880_v27, 16  ;;  %v1934_v59 = vsel %vm7511_vm1, %v1932_v17, %v1933_v10  ;;  %v7810_v35 = vld [vmem:[#allocation2 + $0x40] sm:$0xf] }
  0xcf   : > { %v7797_v58 = vrot.slane %v2704_v1, 5  ;;  %v2701_v40 = vor.u32 %v2700_v28, %v2697_v14  ;;  %v2714_v22 = vshll.u32 %v7771_v52, 16  ;;  %v2728_v23 = vshll.u32 %v7790_v60, 16  ;;  %v5886_v17 = vld [vmem:[#allocation2 + $0x48] sm:$0xf] }
  0xd0   : > { %6498 = vmatmul.mubr.msk.bf16.gmra.mxu1 %vm1270_vm14, %v9780_v42  ;;  %v7799_v42 = vrot.slane %v2653_v12, 4  ;;  %v2692_v0 = vrot.slane %v2690_v16, 5  ;;  %v2721_v1 = vrot.slane %v2719_v7, 4  ;;  %v2724_v12 = vrot.slane %v2722_v15, 5 }
  0xd1   : > { %6501 = vmatprep.mubr.msk.bf16.mxu1 %vm1270_vm14, %v9781_v37  ;;  %v2711_v34 = vor.u32 %v2710_v51, %v7797_v58  ;;  %v2678_v38 = vrot.slane %v2677_v54, 4  ;;  %v2688_v27 = vrot.slane %v2687_v46, 4  ;;  %v7813_v37 = vrot.slane %v2728_v23, 5 }
  0xd2   : > { %v2732_v10 = vshrl.u32 %v7790_v60, 16  ;;  %v9782_v14 = vcombine.low %v7656_v25, %v7675_v2  ;;  %v5788_v16 = vcombine.low %v7775_v61, %v1934_v59  ;;  %v7823_v28 = vsel %vm7511_vm1, %v1939_v8, %v1940_v41  ;;  %v7831_v59 = vld [vmem:[#allocation2 + $0x44] sm:$0x1] }
  0xd3   : > { %v2743_v51 = vshrl.u32 %v5883_v62, 16  ;;  %v2702_v54 = vrot.slane %v2701_v40, 4  ;;  %v2716_v46 = vrot.slane %v2714_v22, 5  ;;  %v2752_v15 = vshll.u32 %v7810_v35, 16 }
  0xd4   : > { %v2734_v7 = vrot.slane %v2732_v10, 4  ;;  %v9783_v23 = vcombine.low %v7470_v49, %v7480_v39  ;;  %v2712_v25 = vrot.slane %v2711_v34, 4  ;;  %v2725_v2 = vor.u32 %v2724_v12, %v2721_v1  ;;  %v7841_v39 = vld [vmem:[#allocation2 + $0x4c] sm:$0xf]  ;;  %v5889_v12 = vld [vmem:[#allocation2 + $0x54] sm:$0xf] }
  0xd5   : > { %6544 = vmatmul.mubr.msk.bf16.gmra.mxu0 %vm1270_vm14, %v5785_v33  ;;  %v2746_v33 = vshll.u32 %v5883_v62, 16  ;;  %v2738_v61 = vshll.u32 %v7806_v6, 16  ;;  %v2745_v41 = vrot.slane %v2743_v51, 4  ;;  %v9784_v8 = vcombine.low %v7689_v36, %v7608_v47 }
  0xd6   : > { %6547 = vmatprep.mubr.msk.bf16.mxu0 %vm1270_vm14, %v9782_v14  ;;  %v2735_v40 = vor.u32 %v2734_v7, %v7813_v37  ;;  %v7838_v22 = vrot.slane %v2752_v15, 5  ;;  %v2756_v49 = vshrl.u32 %v7810_v35, 16  ;;  %v2659_v34 = vsel %vm7131_vm13, %v7799_v42, %v7752_v18  ;;  %v7859_v42 = vld [vmem:[#allocation2 + $0x58] sm:$0xf] }
  0xd7   : > { %v2748_v62 = vrot.slane %v2746_v33, 5  ;;  %v2669_v47 = vsel %vm7131_vm13, %v7801_v20, %v7788_v4  ;;  %v2767_v36 = vshrl.u32 %v5886_v17, 16  ;;  %v2770_v1 = vshll.u32 %v5886_v17, 16 }
  0xd8   : > { %6502 = vmatmul.mubr.msk.bf16.gmra.mxu1 %vm1270_vm14, %v9783_v23  ;;  %v2683_v10 = vsel %vm7131_vm13, %v2678_v38, %v7763_v57  ;;  %v2693_v14 = vsel %vm7131_vm13, %v2688_v27, %v2692_v0  ;;  %v2707_v51 = vsel %vm7131_vm13, %v2702_v54, %v7797_v58  ;;  %v2758_v18 = vrot.slane %v2756_v49, 4 }
  0xd9   : > { %6505 = vmatprep.mubr.msk.bf16.mxu1 %vm1270_vm14, %v9784_v8  ;;  %v2726_v33 = vrot.slane %v2725_v2, 4  ;;  %v2736_v7 = vrot.slane %v2735_v40, 4  ;;  %v2740_v4 = vrot.slane %v2738_v61, 5  ;;  %v2762_v20 = vshll.u32 %v7831_v59, 16  ;;  %v7876_v2 = vld [vmem:[#allocation2 + $0x50] sm:$0x1] }
  0xda   : > { %v9785_v17 = vcombine.low %v7679_v43, %v7703_v11  ;;  %v2717_v57 = vsel %vm7131_vm13, %v2712_v25, %v2716_v46  ;;  %v2749_v0 = vor.u32 %v2748_v62, %v2745_v41  ;;  %v2769_v38 = vrot.slane %v2767_v36, 4  ;;  %v5892_v8 = vld [vmem:[#allocation2 + $0x60] sm:$0xf] }
  0xdb   : > { %v2772_v27 = vrot.slane %v2770_v1, 5  ;;  %v5789_v58 = vcombine.low %v7779_v5, %v7823_v28  ;;  %v2759_v54 = vor.u32 %v2758_v18, %v7838_v22  ;;  %v2776_v15 = vshll.u32 %v7841_v39, 16 }
  0xdc   : > { %v2780_v23 = vshrl.u32 %v7841_v39, 16  ;;  %v5920_v43 = vcombine.low %v2659_v34, %v2669_v47  ;;  %v7874_v11 = vcombine.low %v2683_v10, %v2693_v14  ;;  %v2791_v46 = vshrl.u32 %v5889_v12, 16  ;;  %v7895_v34 = vld [vmem:[#allocation2 + $0x64] sm:$0xf] }
  0xdd   : > { %6548 = vmatmul.mubr.msk.bf16.gmra.mxu0 %vm1270_vm14, %v9785_v17  ;;  %v2794_v25 = vshll.u32 %v5889_v12, 16  ;;  %v9786_v61 = vcombine.low %v7693_v30, %v7613_v31  ;;  %v2731_v5 = vsel %vm7131_vm13, %v2726_v33, %v7813_v37  ;;  %v2800_v28 = vshll.u32 %v7859_v42, 16 }
  0xde   : > { %6551 = vmatprep.mubr.msk.bf16.mxu0 %vm1270_vm14, %v5788_v16  ;;  %v7882_v16 = vcombine.low %v2707_v51, %v2717_v57  ;;  %v2804_v41 = vshrl.u32 %v7859_v42, 16  ;;  %v9787_v40 = vcombine.low %v7697_v32, %v7631_v24  ;;  %v2741_v31 = vsel %vm7131_vm13, %v2736_v7, %v2740_v4  ;;  %v5895_v7 = vld [vmem:[#allocation2 + $0x6c] sm:$0xf]  ;;  %v7912_v57 = vld [vmem:[#allocation2 + $0x5c] sm:$0x1] }
  0xdf   : > { %v2750_v30 = vrot.slane %v2749_v0, 4  ;;  %v2764_v62 = vrot.slane %v2762_v20, 5  ;;  %v2773_v49 = vor.u32 %v2772_v27, %v2769_v38  ;;  %v2760_v47 = vrot.slane %v2759_v54, 4  ;;  %v7914_v38 = vld [vmem:[#allocation2 + $0x70] sm:$0xf] }
  0xe0   : > { %6506 = vmatmul.mubr.msk.bf16.gmra.mxu1 %vm1270_vm14, %v9786_v61  ;;  %v7897_v37 = vrot.slane %v2776_v15, 5  ;;  %v2782_v36 = vrot.slane %v2780_v23, 4  ;;  %v2786_v1 = vshll.u32 %v7876_v2, 16  ;;  %v2793_v12 = vrot.slane %v2791_v46, 4  ;;  %v7918_v54 = vld [vmem:[#allocation2 + $0x68] sm:$0x1] }
  0xe1   : > { %6509 = vmatprep.mubr.msk.bf16.mxu1 %vm1270_vm14, %v9787_v40  ;;  %v2796_v10 = vrot.slane %v2794_v25, 5  ;;  %v7900_v14 = vrot.slane %v2800_v28, 5  ;;  %v2815_v24 = vshrl.u32 %v5892_v8, 16  ;;  %v2806_v32 = vrot.slane %v2804_v41, 4  ;;  %v5898_v40 = vld [vmem:[#allocation2 + $0x78] sm:$0xf] }
  0xe2   : > { %v2818_v51 = vshll.u32 %v5892_v8, 16  ;;  %v2824_v18 = vshll.u32 %v7895_v34, 16  ;;  %v2828_v33 = vshrl.u32 %v7895_v34, 16  ;;  %v7905_v4 = vcombine.low %v2731_v5, %v2741_v31 }
  0xe3   : > { %v2755_v20 = vsel %vm7131_vm13, %v2750_v30, %v7838_v22  ;;  %v7910_v17 = vrot.slane %v2773_v49, 4  ;;  %v2817_v0 = vrot.slane %v2815_v24, 4  ;;  %v2783_v27 = vor.u32 %v2782_v36, %v7897_v37  ;;  %v7940_v49 = vld [vmem:[#allocation2 + $0x7c] sm:$0xf] }
  0xe4   : > { %v7920_v15 = vrot.slane %v2824_v18, 5  ;;  %v2830_v23 = vrot.slane %v2828_v33, 4  ;;  %v2765_v22 = vsel %vm7131_vm13, %v2760_v47, %v2764_v62  ;;  %v7924_v46 = vrot.slane %v2786_v1, 5 }
  0xe5   : > { %6552 = vmatmul.mubr.msk.bf16.gmra.mxu0 %vm1270_vm14, %v5789_v58  ;;  %v2820_v58 = vrot.slane %v2818_v51, 5  ;;  %v2839_v25 = vshrl.u32 %v5895_v7, 16  ;;  %v2842_v61 = vshll.u32 %v5895_v7, 16  ;;  %v9788_v5 = vcombine.low %v7710_v13, %v7712_v21 }
  0xe6   : > { %6591 = vmatprep.mubr.msk.bf16.mxu0 %vm1270_vm14, %v5920_v43  ;;  %v2797_v43 = vor.u32 %v2796_v10, %v2793_v12  ;;  %v2807_v28 = vor.u32 %v2806_v32, %v7900_v14  ;;  %v2810_v41 = vshll.u32 %v7912_v57, 16  ;;  %v2848_v8 = vshll.u32 %v7914_v38, 16 }
  0xe7   : > { %v9789_v31 = vcombine.low %v7361_v53, %v7372_v63  ;;  %v2821_v30 = vor.u32 %v2820_v58, %v2817_v0  ;;  %v2831_v62 = vor.u32 %v2830_v23, %v7920_v15  ;;  %v2834_v13 = vshll.u32 %v7918_v54, 16  ;;  %v7948_v63 = vld [vmem:[#allocation2 + $0x74] sm:$0x1]  ;;  %v7955_v58 = vld [vmem:[#allocation2 + $0x88] sm:$0xf] }
  0xe8   : > { %6510 = vmatmul.mubr.msk.bf16.gmra.mxu1 %vm1270_vm14, %v9788_v5  ;;  %v2852_v21 = vshrl.u32 %v7914_v38, 16  ;;  %v7942_v47 = vcombine.low %v2755_v20, %v2765_v22  ;;  %v2779_v36 = vsel %vm7131_vm13, %v7910_v17, %v7897_v37  ;;  %v2784_v1 = vrot.slane %v2783_v27, 4  ;;  %v5901_v20 = vld [vmem:[#allocation2 + $0x84] sm:$0xf]  ;;  %v7960_v23 = vld [vmem:[#allocation2 + $0x80] sm:$0x1] }
  0xe9   : > { %6513 = vmatprep.mubr.msk.bf16.mxu1 %vm1270_vm14, %v9789_v31  ;;  %v2841_v53 = vrot.slane %v2839_v25, 4  ;;  %v2844_v12 = vrot.slane %v2842_v61, 5  ;;  %v7950_v10 = vrot.slane %v2848_v8, 5  ;;  %v2863_v32 = vshrl.u32 %v5898_v40, 16 }
  0xea   : > { %v2854_v24 = vrot.slane %v2852_v21, 4  ;;  %v2798_v51 = vrot.slane %v2797_v43, 4  ;;  %v2812_v18 = vrot.slane %v2810_v41, 5  ;;  %v2866_v33 = vshll.u32 %v5898_v40, 16 }
  0xeb   : > { %v2872_v7 = vshll.u32 %v7940_v49, 16  ;;  %v2808_v0 = vrot.slane %v2807_v28, 4  ;;  %v2822_v37 = vrot.slane %v2821_v30, 4  ;;  %v2832_v17 = vrot.slane %v2831_v62, 4 }
  0xec   : > { %v2836_v27 = vrot.slane %v2834_v13, 5  ;;  %v2865_v22 = vrot.slane %v2863_v32, 4  ;;  %v2868_v25 = vrot.slane %v2866_v33, 5  ;;  %v2876_v5 = vshrl.u32 %v7940_v49, 16 }
  0xed   : > { %6592 = vmatmul.mubr.msk.bf16.vlgmr.msra.gmra.mxu0 %vm1270_vm14, %v7874_v11  ;;  %v7962_v61 = vrot.slane %v2872_v7, 5  ;;  %v2845_v11 = vor.u32 %v2844_v12, %v2841_v53  ;;  %v2855_v43 = vor.u32 %v2854_v24, %v7950_v10  ;;  %v2858_v28 = vshll.u32 %v7948_v63, 16  ;;  %v5904_v53 = vld [vmem:[#allocation2 + $0x90] sm:$0xf] }
  0xee   : > { %6658 = vmatpush3.bf16.msra.mxu0 %v7767_v26  ;;  %6595 = vmatprep.mubr.msk.bf16.mxu0 %vm1270_vm14, %v7882_v16  ;;  %v2887_v41 = vshrl.u32 %v5901_v20, 16  ;;  %v9790_v26 = vcombine.low %v7401_v56, %v7422_v50  ;;  %v2869_v16 = vor.u32 %v2868_v25, %v2865_v22  ;;  %v2878_v8 = vrot.slane %v2876_v5, 4  ;;  %v5907_v22 = vld [vmem:[#allocation2 + $0x9c] sm:$0xf] }
  0xef   : > { %v2890_v40 = vshll.u32 %v5901_v20, 16  ;;  %v2896_v31 = vshll.u32 %v7955_v58, 16  ;;  %v9791_v30 = vcombine.low %v7494_v45, %v7509_v19  ;;  %v2789_v62 = vsel %vm7131_vm13, %v2784_v1, %v7924_v46  ;;  %v7992_v1 = vld [vmem:[#allocation2 + $0x8c] sm:$0x1] }
  0xf0   : > { %6514 = vmatmul.mubr.msk.bf16.gmra.mxu1 %vm1270_vm14, %v9790_v26  ;;  %v2803_v56 = vsel %vm7131_vm13, %v2798_v51, %v7900_v14  ;;  %v2882_v50 = vshll.u32 %v7960_v23, 16  ;;  %v2900_v13 = vshrl.u32 %v7955_v58, 16  ;;  %v2813_v21 = vsel %vm7131_vm13, %v2808_v0, %v2812_v18  ;;  %v7996_v51 = vld [vmem:[#allocation2 + $0x94] sm:$0xf] }
  0xf1   : > { %6517 = vmatprep.mubr.msk.bf16.mxu1 %vm1270_vm14, %v9791_v30  ;;  %v2827_v45 = vsel %vm7131_vm13, %v2822_v37, %v7920_v15  ;;  %v2837_v19 = vsel %vm7131_vm13, %v2832_v17, %v2836_v27  ;;  %v2879_v46 = vor.u32 %v2878_v8, %v7962_v61  ;;  %v2889_v14 = vrot.slane %v2887_v41, 4  ;;  %v6821_v15 = vld [vmem:[#allocation2 + $0xc] sm:$0xff]  }
  0xf2   : > { %v2892_v12 = vrot.slane %v2890_v40, 5  ;;  %v7994_v24 = vrot.slane %v2896_v31, 5  ;;  %v2902_v32 = vrot.slane %v2900_v13, 4  ;;  %v2846_v18 = vrot.slane %v2845_v11, 4  ;;  %v8022_v31 = vld [vmem:[#allocation2 + $0x98] sm:$0x1] }
  0xf3   : > { %v2856_v33 = vrot.slane %v2855_v43, 4  ;;  %v2860_v7 = vrot.slane %v2858_v28, 5  ;;  %v2870_v20 = vrot.slane %v2869_v16, 4  ;;  %v5925_v0 = vcombine.low %v2779_v36, %v2789_v62  ;;  %v8005_v28 = vld [vmem:[#allocation2 + $0xa0] sm:$0xf] }
  0xf4   : > { %v2884_v37 = vrot.slane %v2882_v50, 5  ;;  %v2911_v17 = vshrl.u32 %v5904_v53, 16  ;;  %v2914_v27 = vshll.u32 %v5904_v53, 16  ;;  %v2880_v25 = vrot.slane %v2879_v46, 4  ;;  %v5910_v50 = vld [vmem:[#allocation2 + $0xa8] sm:$0xf] }
  0xf5   : > { %6596 = vmatmul.mubr.msk.bf16.gmra.mxu0 %vm1270_vm14, %v7905_v4  ;;  %v2906_v5 = vshll.u32 %v7992_v1, 16  ;;  %v2920_v11 = vshll.u32 %v7996_v51, 16  ;;  %v2924_v43 = vshrl.u32 %v7996_v51, 16  ;;  %v5926_v41 = vcombine.low %v2803_v56, %v2813_v21 }
  0xf6   : > { %6599 = vmatprep.mubr.msk.bf16.mxu0 %vm1270_vm14, %v7942_v47  ;;  %v8007_v26 = vcombine.low %v2827_v45, %v2837_v19  ;;  %v2893_v4 = vor.u32 %v2892_v12, %v2889_v14  ;;  %v2903_v36 = vor.u32 %v2902_v32, %v7994_v24  ;;  %v9792_v16 = vcombine.low %v7553_v48, %v7566_v55  ;;  %v6822_v19 = vld [vmem:[#allocation2 + $0x18] sm:$0xff]   ;;  %v8039_v32 = vld [vmem:[#allocation2 + $0xa4] sm:$0x1] }
  0xf7   : > { %v2851_v47 = vsel %vm7131_vm13, %v2846_v18, %v7950_v10  ;;  %v2861_v8 = vsel %vm7131_vm13, %v2856_v33, %v2860_v7  ;;  %v2875_v40 = vsel %vm7131_vm13, %v2870_v20, %v7962_v61  ;;  %v2935_v30 = vshrl.u32 %v5907_v22, 16  ;;  %v8032_v61 = vld [vmem:[#allocation2 + $0xac] sm:$0xf] }
  0xf8   : > { %6518 = vmatmul.mubr.msk.bf16.gmra.mxu1 %vm1270_vm14, %v9792_v16  ;;  %v2913_v62 = vrot.slane %v2911_v17, 4  ;;  %v2916_v48 = vrot.slane %v2914_v27, 5  ;;  %v2938_v55 = vshll.u32 %v5907_v22, 16  ;;  %v2944_v56 = vshll.u32 %v8005_v28, 16  ;;  %9793 = vst [vmem:[#allocation12_spill] sm:$0xff] %v8032_v61 }
  0xf9   : > { %6557 = vmatprep.mubr.msk.bf16.mxu1 %vm1270_vm14, %v6821_v15  ;;  %v2885_v10 = vsel %vm7131_vm13, %v2880_v25, %v2884_v37  ;;  %v8028_v13 = vrot.slane %v2906_v5, 5  ;;  %v8030_v21 = vrot.slane %v2920_v11, 5  ;;  %v2926_v45 = vrot.slane %v2924_v43, 4  ;;  %v6823_v15 = vld [vmem:[#allocation2 + $0x24] sm:$0xff]   ;;  %v5913_v25 = vld [vmem:[#allocation2 + $0xb4] sm:$0xf] }
  0xfa   : > { %v8034_v46 = vrot.slane %v2893_v4, 4  ;;  %v8036_v53 = vrot.slane %v2903_v36, 4  ;;  %v2937_v14 = vrot.slane %v2935_v30, 4  ;;  %v2948_v12 = vshrl.u32 %v8005_v28, 16  ;;  %v8049_v36 = vld [vmem:[#allocation2 + $0xb8] sm:$0xf] }
  0xfb   : > { %v2940_v18 = vrot.slane %v2938_v55, 5  ;;  %v8041_v33 = vrot.slane %v2944_v56, 5  ;;  %v2959_v7 = vshrl.u32 %v5910_v50, 16  ;;  %v2962_v20 = vshll.u32 %v5910_v50, 16  ;;  %v8058_v55 = vld [vmem:[#allocation2 + $0xb0] sm:$0x1] }
  0xfc   : > { %v2917_v37 = vor.u32 %v2916_v48, %v2913_v62  ;;  %v2930_v17 = vshll.u32 %v8022_v31, 16  ;;  %v2950_v27 = vrot.slane %v2948_v12, 4  ;;  %v2968_v22 = vshll.u32 %v8032_v61, 16 }
  0xfd   : > { %6600 = vmatmul.mubr.msk.bf16.gmra.mxu0 %vm1270_vm14, %v5925_v0  ;;  %v2927_v5 = vor.u32 %v2926_v45, %v8030_v21  ;;  %v2961_v11 = vrot.slane %v2959_v7, 4  ;;  %v2964_v43 = vrot.slane %v2962_v20, 5  ;;  %v2972_v4 = vshrl.u32 %v8032_v61, 16  ;;  %v249_v45 = vld [vmem:[#allocation2 + $0xc0] sm:$0x1]  ;;  %v6824_v7 = vld [vmem:[#allocation2 + $0x30] sm:$0xff]  }
  0xfe   : > { %6603 = vmatprep.mubr.msk.bf16.mxu0 %vm1270_vm14, %v5926_v41  ;;  %v5928_v16 = vcombine.low %v2851_v47, %v2861_v8  ;;  %v8051_v30 = vcombine.low %v2875_v40, %v2885_v10  ;;  %v2954_v0 = vshll.u32 %v8039_v32, 16  ;;  %v8054_v62 = vrot.slane %v2968_v22, 5  ;;  %v6825_v61 = vld [vmem:[#allocation2 + $0x3c] sm:$0xff]  }
  0xff   : > { %v2941_v48 = vor.u32 %v2940_v18, %v2937_v14  ;;  %v2951_v41 = vor.u32 %v2950_v27, %v8041_v33  ;;  %v2974_v56 = vrot.slane %v2972_v4, 4  ;;  %v2983_v50 = vshrl.u32 %v5913_v25, 16  ;;  %v305_v18 = vld [vmem:[#allocation2 + $0xc8] sm:$0x1]  ;;  %v341_v27 = vld [vmem:[%s7060_s5 + $0x78] sm:$0xf] }
 0x100   : > { %6558 = vmatmul.mubr.msk.bf16.vlgmr.msra.gmra.mxu1 %vm1270_vm14, %v6822_v19  ;;  %v2899_v47 = vsel %vm7131_vm13, %v8034_v46, %v7994_v24  ;;  %v2909_v8 = vsel %vm7131_vm13, %v8036_v53, %v8028_v13  ;;  %v2986_v40 = vshll.u32 %v5913_v25, 16  ;;  %v2992_v10 = vshll.u32 %v8049_v36, 16  ;;  %v342_v4 = vld [vmem:[%s7060_s5 + $0x7c] sm:$0xf]  ;;  %s175_s5 = sand.u32 1, %s6933_s13  }
 0x101   : > { %6624 = vmatpush3.bf16.msra.mxu1 %v7758_v9  ;;  %6561 = vmatprep.mubr.msk.bf16.mxu1 %vm1270_vm14, %v6823_v15  ;;  %v2918_v19 = vrot.slane %v2917_v37, 4  ;;  %v2928_v9 = vrot.slane %v2927_v5, 4  ;;  %v2932_v14 = vrot.slane %v2930_v17, 5  ;;  %v2965_v12 = vor.u32 %v2964_v43, %v2961_v11  ;;  %s5689_s8 = sshll.u32 %s175_s5, 7  ;;  %s9697_s15 = scalar_lea.sflag [#allocation4], %s175_s5 }
 0x102   : > { %v2956_v20 = vrot.slane %v2954_v0, 5  ;;  %v2975_v15 = vor.u32 %v2974_v56, %v8054_v62  ;;  %v2978_v24 = vshll.u32 %v8058_v55, 16  ;;  %v2996_v46 = vshrl.u32 %v8049_v36, 16  ;;  %v8088_v56 = vld [vmem:[#allocation2 + $0xbc] sm:$0x1]  ;;  %s9479_s9 = scalar_lea.vmem [#allocation3], %s5689_s8 }
 0x103   : > { %v2942_v13 = vrot.slane %v2941_v48, 4  ;;  %v2952_v53 = vrot.slane %v2951_v41, 4  ;;  %v2985_v22 = vrot.slane %v2983_v50, 4  ;;  %v2988_v25 = vrot.slane %v2986_v40, 5  ;;  %s5601_s11 = sshll.u32 %s9479_s9, 4  ;;  %s9689_s11 = int_to_ptr.vmem [resolvable:$true] %s5601_s11 }
 0x104   : > { %v8078_v37 = vrot.slane %v2992_v10, 5  ;;  %v2998_v17 = vrot.slane %v2996_v46, 4  ;;  %v250_v11 = vsel %vm7040_vm5, 0, %v249_v45  ;;  %v306_v0 = vsel %vm7048_vm7, 0, %v305_v18  ;;  %v6130_v18 = vld [vmem:[%s9743_s1 + $0xe] sm:$0x3]  ;;  %p6880_p1 = scmp.lt.s32.totalorder %s9689_s11, %s6878_s27 }
 0x105   : > { %6604 = vmatmul.mubr.msk.bf16.gmra.mxu0 %vm1270_vm14, %v8007_v26  ;;  %v2923_v48 = vsel %vm7131_vm13, %v2918_v19, %v8030_v21  ;;  %v2966_v41 = vrot.slane %v2965_v12, 4  ;;  %251 = vst [vmem:[#allocation2 + $0xc0] sm:$0x1] %v250_v11  ;;  %307 = vst [vmem:[#allocation2 + $0xc8] sm:$0x1] %v306_v0  ;;  %v601_v26 = vshrl.u32 %v341_v27, 16  ;;  %v2933_v40 = vsel %vm7131_vm13, %v2928_v9, %v2932_v14 }
 0x106   : > { %6607 = vmatprep.mubr.msk.bf16.mxu0 %vm1270_vm14, %v5928_v16  ;;  %v604_v50 = vshll.u32 %v341_v27, 16  ;;  %v2976_v10 = vrot.slane %v2975_v15, 4  ;;  %v2980_v45 = vrot.slane %v2978_v24, 5  ;;  %v609_v46 = vshrl.u32 %v342_v4, 16  ;;  %v5955_v0 = vld [vmem:[#allocation2 + $0x30] sm:$0xe] }
 0x107   : > { %v2947_v16 = vsel %vm7131_vm13, %v2942_v13, %v8041_v33  ;;  %v2989_v21 = vor.u32 %v2988_v25, %v2985_v22  ;;  %v603_v19 = vrot.slane %v601_v26, 7  ;;  %v612_v12 = vshll.u32 %v342_v4, 16  ;;  %v6195_v22 = vld [vmem:[%s9743_s1 + $0x10] sm:$0x3]  ;;  %s6873_s23 = scalar_lea.vmem %s9689_s11, 2048 }
 0x108   : > { %6562 = vmatmul.mubr.msk.bf16.gmra.mxu1 %vm1270_vm14, %v6824_v7  ;;  %v2957_v9 = vsel %vm7131_vm13, %v2952_v53, %v2956_v20  ;;  %v2999_v14 = vor.u32 %v2998_v17, %v8078_v37  ;;  %v3002_v7 = vshll.u32 %v8088_v56, 16  ;;  %v611_v15 = vrot.slane %v609_v46, 7  ;;  %p6874_p12 = scmp.ne.s32.totalorder %s9689_s11, %s6873_s23  ;;  %p6881_p2 = scmp.lt.s32.totalorder %s6879_s28, %s6873_s23 }
 0x109   : > { %6565 = vmatprep.mubr.msk.bf16.mxu1 %vm1270_vm14, %v6825_v61  ;;  %v5930_v24 = vcombine.low %v2899_v47, %v2909_v8  ;;  %v2971_v33 = vsel %vm7131_vm13, %v2966_v41, %v8054_v62  ;;  %v606_v27 = vor.u32 %v604_v50, %v603_v19  ;;  %v607_v13 = vrot.slane %v603_v19, 4  ;;  %v6826_v61 = vld [vmem:[#allocation2 + $0x48] sm:$0xff]   ;;  %v5954_v47 = vld [vmem:[#allocation2 + $0x24] sm:$0xe]  ;;  %v6827_v8 = vld [vmem:[#allocation2 + $0x54] sm:$0xff]  }
 0x10a   : > { %v2981_v20 = vsel %vm7131_vm13, %v2976_v10, %v2980_v45  ;;  %v614_v53 = vor.u32 %v612_v12, %v611_v15  ;;  %v616_v25 = vrot.slane %v611_v15, 4  ;;  %v8113_v4 = vand.u32 %v6130_v18, %v7035_v3  ;;  %v5956_v41 = vld [vmem:[#allocation2 + $0x3c] sm:$0xe]  ;;  %p6875_p13 = pnand %p6874_p12, %p7016_p4  ;;  %p6882_p3 = por %p6881_p2, %p6880_p1 }
 0x10b   : > { %v5931_v17 = vcombine.low %v2923_v48, %v2933_v40  ;;  %v5932_v11 = vcombine.low %v2947_v16, %v2957_v9  ;;  %v2990_v62 = vrot.slane %v2989_v21, 4  ;;  %v3000_v26 = vrot.slane %v2999_v14, 4  ;;  %v9798_v21 = vld [vmem:[#allocation10_spill] sm:$0xff]  ;;  %v9799_v9 = vld [vmem:[#allocation11_spill] sm:$0xff] }
 0x10c   : > { %v3004_v50 = vrot.slane %v3002_v7, 5  ;;  %v615_v10 = vsel %vm7091_vm12, %v607_v13, %v614_v53  ;;  %v773_v45 = vld [vmem:[#allocation2 + $0xc0] sm:$0xf]  ;;  %v777_v19 = vld [vmem:[#allocation2 + $0xc8] sm:$0x1]  ;;  %6691 = vmatprep.subr.bf16.mxu1 %v8113_v4  ;;  %v8121_v12 = vand.u32 %v6195_v22, %v7035_v3  ;;  %v8124_v48 = vcombine.low %v2971_v33, %v2981_v20  ;;  %p6876_p0 = pneg %p6875_p13 }
 0x10d   : > { %6608 = vmatmul.mubr.msk.bf16.gmra.mxu0 %vm1270_vm14, %v8051_v30  ;;  %v774_v16 = vsel %vm7083_vm9, %v606_v27, %v773_v45  ;;  %776 = vst.msk [vmem:[#allocation2 + $0xc4] sm:$0xf] %vm189_vm2, %v615_v10  ;;  %v778_v30 = vsel %vm7040_vm5, %v616_v25, %v777_v19  ;;  %v3390_v18 = vrot.slane %v9798_v21, 5  ;;  %v5970_v3 = vrot.slane %v5954_v47, 9  ;;  %v5958_v25 = vld [vmem:[#allocation2 + $0x54] sm:$0xe] }
 0x10e   : > { %6611 = vmatprep.mubr.msk.bf16.mxu0 %vm1270_vm14, %v5930_v24  ;;  %775 = vst [vmem:[#allocation2 + $0xc0] sm:$0xf] %v774_v16  ;;  %779 = vst [vmem:[#allocation2 + $0xc8] sm:$0x1] %v778_v30  ;;  %6725 = vmatprep.subr.bf16.mxu0 %v8121_v12  ;;  %v3404_v14 = vrot.slane %v9799_v9, 5  ;;  %v3407_v7 = vrot.slane %v7771_v52, 5  ;;  %v2995_v33 = vsel %vm7131_vm13, %v2990_v62, %v8078_v37  ;;  %p6883_p5 = pnand %p6882_p3, %p6876_p0 }
 0x10f   : > { %v5971_v15 = vrot.slane %v5955_v0, 9  ;;  %v5957_v24 = vld [vmem:[#allocation2 + $0x48] sm:$0xe]  ;;  %v3411_v27 = vrot.slane %v7790_v60, 5  ;;  %v3414_v13 = vrot.slane %v7806_v6, 5  ;;  %v5972_v22 = vrot.slane %v5956_v41, 9 }
 0x110   : > { %6566 = vmatmul.mubr.msk.bf16.gmra.mxu1 %vm1270_vm14, %v6826_v61  ;;  %v3005_v20 = vsel %vm7131_vm13, %v3000_v26, %v3004_v50  ;;  %v8146_v52 = vsel %vm7511_vm1, %v5970_v3, %v3404_v14  ;;  %v3406_v53 = vrot.slane %v3404_v14, 4  ;;  %v3418_v61 = vrot.slane %v7810_v35, 5  ;;  %v6828_v41 = vld [vmem:[#allocation2 + $0x60] sm:$0xff]   ;;  %v6829_v10 = vld [vmem:[#allocation2 + $0x6c] sm:$0xff]  }
 0x111   : > { %6569 = vmatprep.mubr.msk.bf16.mxu1 %vm1270_vm14, %v6827_v8  ;;  %v8151_v37 = vsel %vm7511_vm1, %v5971_v15, %v3411_v27  ;;  %v3413_v60 = vrot.slane %v3411_v27, 4  ;;  %v3421_v6 = vrot.slane %v7831_v59, 5  ;;  %v5973_v47 = vrot.slane %v5957_v24, 9  ;;  %v5959_v30 = vld [vmem:[#allocation2 + $0x60] sm:$0xe] }
 0x112   : > { %v8156_v8 = vsel %vm7511_vm1, %v3406_v53, %v3407_v7  ;;  %v8160_v62 = vsel %vm7511_vm1, %v5972_v22, %v3418_v61  ;;  %v3420_v0 = vrot.slane %v3418_v61, 4  ;;  %v3425_v35 = vrot.slane %v7841_v39, 5  ;;  %v5960_v15 = vld [vmem:[#allocation2 + $0x6c] sm:$0xe] }
 0x113   : > { %v5987_v26 = vcombine.low %v8146_v52, %v8156_v8  ;;  %v8167_v50 = vsel %vm7511_vm1, %v3413_v60, %v3414_v13  ;;  %v3428_v59 = vrot.slane %v7876_v2, 5  ;;  %v5974_v46 = vrot.slane %v5958_v25, 9  ;;  %v6089_v8 = vld [vmem:[#allocation2 + $0x34] sm:$0xf] }
 0x114   : > { %v8171_v45 = vld [vmem:[#allocation2 + $0xc4] sm:$0xf]  ;;  %v8177_v39 = vsel %vm7511_vm1, %v3420_v0, %v3421_v6  ;;  %v8181_v40 = vsel %vm7511_vm1, %v5973_v47, %v3425_v35  ;;  %v3427_v16 = vrot.slane %v3425_v35, 4  ;;  %v5934_v2 = vcombine.low %v2995_v33, %v3005_v20  ;;  %v8395_v20 = vld [vmem:[#allocation2 + $0x38] sm:$0x1] }
 0x115   : > { %6612 = vmatmul.mubr.msk.bf16.gmra.mxu0 %vm1270_vm14, %v5931_v17  ;;  %v5916_v3 = vld [vmem:[#allocation2 + $0xc0] sm:$0xf]  ;;  %v8184_v17 = vld [vmem:[#allocation2 + $0xc8] sm:$0x1]  ;;  %v3016_v9 = vshll.u32 %v8171_v45, 16  ;;  %v3020_v14 = vshrl.u32 %v8171_v45, 16 }
 0x116   : > { %6615 = vmatprep.mubr.msk.bf16.mxu0 %vm1270_vm14, %v5932_v11  ;;  %v3007_v24 = vshrl.u32 %v5916_v3, 16  ;;  %v3010_v27 = vshll.u32 %v5916_v3, 16  ;;  %v3026_v13 = vshll.u32 %v8184_v17, 16  ;;  %v8193_v22 = vsel %vm7511_vm1, %v3427_v16, %v3428_v59 }
 0x117   : > { %v3018_v11 = vrot.slane %v3016_v9, 5  ;;  %v3022_v33 = vrot.slane %v3020_v14, 4  ;;  %v3432_v53 = vrot.slane %v7859_v42, 5  ;;  %v3435_v6 = vrot.slane %v7912_v57, 5  ;;  %v5961_v9 = vld [vmem:[#allocation2 + $0x78] sm:$0xe] }
 0x118   : > { %6570 = vmatmul.mubr.msk.bf16.gmra.mxu1 %vm1270_vm14, %v6828_v41  ;;  %v3009_v61 = vrot.slane %v3007_v24, 4  ;;  %v3012_v25 = vrot.slane %v3010_v27, 5  ;;  %v3028_v60 = vrot.slane %v3026_v13, 5  ;;  %v5975_v41 = vrot.slane %v5959_v30, 9  ;;  %v6831_v27 = vld [vmem:[#allocation2 + $0x84] sm:$0xff]  }
 0x119   : > { %6573 = vmatprep.mubr.msk.bf16.mxu1 %vm1270_vm14, %v6829_v10  ;;  %v3023_v47 = vor.u32 %v3022_v33, %v3018_v11  ;;  %v8203_v0 = vsel %vm7511_vm1, %v5974_v46, %v3432_v53  ;;  %v3434_v35 = vrot.slane %v3432_v53, 4  ;;  %v3439_v16 = vrot.slane %v7895_v34, 5  ;;  %v6830_v10 = vld [vmem:[#allocation2 + $0x78] sm:$0xff]   ;;  %v5962_v13 = vld [vmem:[#allocation2 + $0x84] sm:$0xe] }
 0x11a   : > { %v3013_v59 = vor.u32 %v3012_v25, %v3009_v61  ;;  %v3442_v3 = vrot.slane %v7918_v54, 5  ;;  %v5976_v42 = vrot.slane %v5960_v15, 9  ;;  %v3446_v57 = vrot.slane %v7914_v38, 5 }
 0x11b   : > { %v3024_v14 = vrot.slane %v3023_v47, 4  ;;  %v8209_v24 = vsel %vm7511_vm1, %v3434_v35, %v3435_v6  ;;  %v3449_v46 = vrot.slane %v7948_v63, 5  ;;  %v8219_v54 = vsel %vm7511_vm1, %v5975_v41, %v3439_v16  ;;  %v5963_v6 = vld [vmem:[#allocation2 + $0x90] sm:$0xe]  ;;  %v5964_v41 = vld [vmem:[#allocation2 + $0x9c] sm:$0xe] }
 0x11c   : > { %v3014_v30 = vrot.slane %v3013_v59, 4  ;;  %v3441_v15 = vrot.slane %v3439_v16, 4  ;;  %v8226_v63 = vsel %vm7511_vm1, %v5976_v42, %v3446_v57  ;;  %v5977_v33 = vrot.slane %v5961_v9, 9  ;;  %v6837_v59 = vld [vmem:[#allocation2 + $0x18] sm:$0xff]  }
 0x11d   : > { %6616 = vmatmul.mubr.msk.bf16.gmra.mxu0 %vm1270_vm14, %v8124_v48  ;;  %v3029_v38 = vsel %vm7131_vm13, %v3024_v14, %v3028_v60  ;;  %v3448_v48 = vrot.slane %v3446_v57, 4  ;;  %v3453_v25 = vrot.slane %v7940_v49, 5  ;;  %v3463_v42 = vrot.slane %v7992_v1, 5  ;;  %v5965_v57 = vld [vmem:[#allocation2 + $0xa8] sm:$0xe] }
 0x11e   : > { %6619 = vmatprep.mubr.msk.bf16.mxu0 %vm1270_vm14, %v5934_v2  ;;  %v3019_v53 = vsel %vm7131_vm13, %v3014_v30, %v3018_v11  ;;  %v8232_v61 = vsel %vm7511_vm1, %v3441_v15, %v3442_v3  ;;  %v3456_v2 = vrot.slane %v7960_v23, 5  ;;  %v5978_v11 = vrot.slane %v5962_v13, 9  ;;  %v6832_v13 = vld [vmem:[#allocation2 + $0x90] sm:$0xff]  }
 0x11f   : > { %v5935_v60 = vcombine.low %v3019_v53, %v3029_v38  ;;  %v8241_v35 = vsel %vm7511_vm1, %v3448_v48, %v3449_v46  ;;  %v8248_v23 = vsel %vm7511_vm1, %v5977_v33, %v3453_v25  ;;  %v3455_v16 = vrot.slane %v3453_v25, 4  ;;  %v6833_v38 = vld [vmem:[#allocation2 + $0x9c] sm:$0xff]   ;;  %v9800_v25 = vld [vmem:[#allocation12_spill] sm:$0xff] }
 0x120   : > { %6574 = vmatmul.mubr.msk.bf16.gmra.mxu1 %vm1270_vm14, %v6830_v10  ;;  %v3460_v3 = vrot.slane %v7955_v58, 5  ;;  %v5979_v9 = vrot.slane %v5963_v6, 9  ;;  %v3467_v10 = vrot.slane %v7996_v51, 5  ;;  %v3470_v14 = vrot.slane %v8022_v31, 5  ;;  %v5966_v6 = vld [vmem:[#allocation2 + $0xb4] sm:$0xe] }
 0x121   : > { %6577 = vmatprep.mubr.msk.bf16.mxu1 %vm1270_vm14, %v6831_v27  ;;  %v8256_v46 = vsel %vm7511_vm1, %v3455_v16, %v3456_v2  ;;  %v5980_v15 = vrot.slane %v5964_v41, 9  ;;  %v3474_v31 = vrot.slane %v8005_v28, 5  ;;  %v3477_v33 = vrot.slane %v8039_v32, 5  ;;  %v252_v16 = vld [vmem:[#allocation2 + $0xcc] sm:$0x1] }
 0x122   : > { %v8260_v27 = vsel %vm7511_vm1, %v5978_v11, %v3460_v3  ;;  %v3462_v30 = vrot.slane %v3460_v3, 4  ;;  %v8266_v1 = vsel %vm7511_vm1, %v5979_v9, %v3467_v10  ;;  %v3469_v51 = vrot.slane %v3467_v10, 4  ;;  %v5967_v32 = vld [vmem:[#allocation2 + $0xc0] sm:$0xe]  ;;  %v6087_v11 = vld [vmem:[#allocation2 + $0x2c] sm:$0x1] }
 0x123   : > { %v5981_v53 = vrot.slane %v5965_v57, 9  ;;  %v3481_v2 = vrot.slane %v9800_v25, 5  ;;  %v3476_v41 = vrot.slane %v3474_v31, 4  ;;  %v3484_v9 = vrot.slane %v8058_v55, 5  ;;  %v5952_v25 = vld [vmem:[#allocation2 + $0xc] sm:$0xe] }
 0x124   : > { %v8272_v48 = vsel %vm7511_vm1, %v3462_v30, %v3463_v42  ;;  %v8281_v28 = vsel %vm7511_vm1, %v3469_v51, %v3470_v14  ;;  %v5982_v14 = vrot.slane %v5966_v6, 9  ;;  %v3488_v57 = vrot.slane %v8049_v36, 5  ;;  %v6834_v6 = vld [vmem:[#allocation2 + $0xa8] sm:$0xff]   ;;  %v6163_v36 = vld [vmem:[#allocation2 + $0x18] sm:$0xe] }
 0x125   : > { %6620 = vmatmul.mubr.msk.bf16.gmra.mxu0 %vm1270_vm14, %v5935_v60  ;;  %v8285_v60 = vsel %vm7511_vm1, %v5980_v15, %v3474_v31  ;;  %v3483_v42 = vrot.slane %v3481_v2, 4  ;;  %v8297_v10 = vsel %vm7511_vm1, %v3476_v41, %v3477_v33  ;;  %v3491_v30 = vrot.slane %v8088_v56, 5  ;;  %v6838_v15 = vld [vmem:[#allocation2 + $0x24] sm:$0xff]   ;;  %v6839_v33 = vld [vmem:[#allocation2 + $0x30] sm:$0xff]  }
 0x126   : > { %6659 = vmatprep.mubr.msk.bf16.mxu0 %vm1270_vm14, %v6837_v59  ;;  %v8291_v59 = vsel %vm7511_vm1, %v5981_v53, %v3481_v2  ;;  %v5983_v31 = vrot.slane %v5967_v32, 9  ;;  %v8314_v56 = vsel %vm7511_vm1, %v5982_v14, %v3488_v57  ;;  %v3495_v53 = vrot.slane %v8171_v45, 5  ;;  %v6835_v32 = vld [vmem:[#allocation2 + $0xb4] sm:$0xff]  }
 0x127   : > { %v8306_v55 = vsel %vm7511_vm1, %v3483_v42, %v3484_v9  ;;  %v3498_v2 = vrot.slane %v8184_v17, 5  ;;  %v5968_v45 = vrot.slane %v5952_v25, 9  ;;  %v3392_v17 = vrot.slane %v3390_v18, 4  ;;  %v6870_v9 = vld [vmem:[#allocation2 + $0x14] sm:$0x1]  ;;  %v6836_v25 = vld [vmem:[#allocation2 + $0xc0] sm:$0xff]  }
 0x128   : > { %6578 = vmatmul.mubr.msk.bf16.gmra.mxu1 %vm1270_vm14, %v6832_v13  ;;  %v253_v13 = vsel %vm7040_vm5, 0, %v252_v16  ;;  %v8324_v41 = vsel %vm7511_vm1, %v5983_v31, %v3495_v53  ;;  %v3497_v16 = vrot.slane %v3495_v53, 4  ;;  %v3393_v14 = vrot.slane %v6870_v9, 5  ;;  %v6840_v31 = vld [vmem:[#allocation2 + $0x3c] sm:$0xff]   ;;  %v6841_v53 = vld [vmem:[#allocation2 + $0x48] sm:$0xff]  }
 0x129   : > { %6581 = vmatprep.mubr.msk.bf16.mxu1 %vm1270_vm14, %v6833_v38  ;;  %v3490_v38 = vrot.slane %v3488_v57, 4  ;;  %254 = vst [vmem:[#allocation2 + $0xcc] sm:$0x1] %v253_v13  ;;  %v6179_v49 = vrot.slane %v6163_v36, 9  ;;  %v4262_v19 = vshll.u32 %v6089_v8, 16  ;;  %vm5551_vm2 = vcmask 257024  }
 0x12a   : > { %v8335_v57 = vsel %vm7511_vm1, %v3497_v16, %v3498_v2 }
 0x12b   : > { %v8320_v5 = vsel %vm7511_vm1, %v3490_v38, %v3491_v30  ;;  %v5953_v38 = vld [vmem:[#allocation2 + $0x18] sm:$0xe]  ;;  %v8410_v43 = vrot.slane %v4262_v19, 5 }
 0x12c   : > { %v5969_v16 = vrot.slane %v5953_v38, 9 }
 0x12d   : > { %6660 = vmatmul.mubr.msk.bf16.vlgmr.msra.gmra.mxu0 %vm1270_vm14, %v6838_v15  ;;  %v6871_v15 = vld [vmem:[#allocation2 + $0x1c] sm:$0xf] }
 0x12e   : > { %6726 = vmatpush3.bf16.msra.mxu0 %v8121_v12  ;;  %6663 = vmatprep.mubr.msk.bf16.mxu0 %vm1270_vm14, %v6839_v33  ;;  %v3397_v13 = vrot.slane %v6871_v15, 5  ;;  %v3391_v12 = vsel %vm7511_vm1, %v5968_v45, %v3390_v18  ;;  %v3394_v33 = vsel %vm7511_vm1, %v3392_v17, %v3393_v14  ;;  %v6842_v45 = vld [vmem:[#allocation2 + $0x54] sm:$0xff]   ;;  %v6843_v15 = vld [vmem:[#allocation2 + $0x60] sm:$0xff]  }
 0x12f   : > { %v5985_v2 = vcombine.low %v3391_v12, %v3394_v33  ;;  %v6082_v14 = vld [vmem:[#allocation2 + $0x18] sm:$0xf]  ;;  %v8361_v12 = vld [vmem:[#allocation2 + $0x28] sm:$0xf]  ;;  %v6085_v33 = vld [vmem:[#allocation2 + $0x24] sm:$0xf] }
 0x130   : > { %6582 = vmatmul.mubr.msk.bf16.gmra.mxu1 %vm1270_vm14, %v6834_v6  ;;  %v3399_v9 = vrot.slane %v3397_v13, 4  ;;  %v6872_v6 = vld [vmem:[#allocation2 + $0x20] sm:$0x1]  ;;  %v3398_v21 = vsel %vm7511_vm1, %v5969_v16, %v3397_v13  ;;  %v4229_v16 = vshrl.u32 %v6085_v33, 16  ;;  %v4242_v42 = vshrl.u32 %v8361_v12, 16 }
 0x131   : > { %6585 = vmatprep.mubr.msk.bf16.mxu1 %vm1270_vm14, %v6835_v32  ;;  %v3400_v30 = vrot.slane %v6872_v6, 5  ;;  %v8348_v32 = vpop.f32.mrf.mxu0  ;;  %v4238_v6 = vshll.u32 %v8361_v12, 16 }
 0x132   : > { %9801 = vst [vmem:[#allocation6_spill] sm:$0xff] %v8348_v32  ;;  %v4231_v58 = vrot.slane %v4229_v16, 4  ;;  %v4955_v16 = vrot.slane %v8361_v12, 5  ;;  %v8401_v12 = vpop.f32.mrf.mxu1 }
 0x133   : > { %v3401_v18 = vsel %vm7511_vm1, %v3399_v9, %v3400_v30  ;;  %v8357_v17 = vpop.f32.mrf.mxu0  ;;  %v4232_v9 = vshll.u32 %v6085_v33, 16  ;;  %9807 = vst [vmem:[#allocation12_spill] sm:$0xff] %v8401_v12 }
 0x134   : > { %9802 = vst [vmem:[#allocation9_spill] sm:$0xff] %v8357_v17  ;;  %v5986_v38 = vcombine.low %v3398_v21, %v3401_v18  ;;  %v6844_v21 = vld [vmem:[#allocation2 + $0x6c] sm:$0xff]   ;;  %v8372_v18 = vld [vmem:[#allocation2 + $0x20] sm:$0x1]  ;;  %v4957_v17 = vrot.slane %v4955_v16, 4 }
 0x135   : > { %6664 = vmatmul.mubr.msk.bf16.gmra.mxu0 %vm1270_vm14, %v6840_v31  ;;  %v8359_v31 = vld [vmem:[#allocation2 + $0x1c] sm:$0xf]  ;;  %v4224_v52 = vshll.u32 %v8372_v18, 16 }
 0x136   : > { %6667 = vmatprep.mubr.msk.bf16.mxu0 %vm1270_vm14, %v6841_v53  ;;  %v4205_v53 = vshrl.u32 %v6082_v14, 16  ;;  %v4214_v13 = vshll.u32 %v8359_v31, 16  ;;  %v4218_v30 = vshrl.u32 %v8359_v31, 16  ;;  %v4948_v51 = vrot.slane %v8359_v31, 5 }
 0x137   : > { %v4951_v31 = vrot.slane %v8372_v18, 5  ;;  %v4266_v18 = vshrl.u32 %v6089_v8, 16 }
 0x138   : > { %6586 = vmatmul.mubr.msk.bf16.gmra.mxu1 %vm1270_vm14, %v6836_v25  ;;  %v4208_v25 = vshll.u32 %v6082_v14, 16  ;;  %v8382_v3 = vrot.slane %v4214_v13, 5  ;;  %v4950_v36 = vrot.slane %v4948_v51, 4 }
 0x139   : > { %6625 = vmatprep.mubr.msk.bf16.mxu1 %vm1270_vm14, %v5985_v2  ;;  %v8364_v2 = vpop.f32.mrf.mxu0 }
 0x13a   : > { %9803 = vst [vmem:[#allocation8_spill] sm:$0xff] %v8364_v2  ;;  %v4210_v14 = vrot.slane %v4208_v25, 5  ;;  %v8384_v25 = vrot.slane %v4238_v6, 5 }
 0x13b   : > { %v8379_v33 = vpop.f32.mrf.mxu0 }
 0x13c   : > { %9804 = vst [vmem:[#allocation10_spill] sm:$0xff] %v8379_v33  ;;  %v6846_v33 = vld [vmem:[#allocation2 + $0x84] sm:$0xff]  }
 0x13d   : > { %6668 = vmatmul.mubr.msk.bf16.gmra.mxu0 %vm1270_vm14, %v6842_v45  ;;  %v4207_v45 = vrot.slane %v4205_v53, 4  ;;  %v4234_v53 = vrot.slane %v4232_v9, 5  ;;  %v8388_v34 = vpop.f32.mrf.mxu0  ;;  %v4248_v9 = vshll.u32 %v6087_v11, 16 }
 0x13e   : > { %6671 = vmatprep.mubr.msk.bf16.mxu0 %vm1270_vm14, %v6843_v15  ;;  %v6845_v15 = vld [vmem:[#allocation2 + $0x78] sm:$0xff]   ;;  %9805 = vst [vmem:[#allocation11_spill] sm:$0xff] %v8388_v34  ;;  %v4226_v34 = vrot.slane %v4224_v52, 5 }
 0x13f   : > { %v4211_v47 = vor.u32 %v4210_v14, %v4207_v45  ;;  %v6165_v45 = vld [vmem:[#allocation2 + $0x30] sm:$0xe]  ;;  %v4962_v14 = vrot.slane %v6089_v8, 5  ;;  %v8407_v2 = vpop.f32.mrf.mxu0  ;;  %v6091_v52 = vld [vmem:[#allocation2 + $0x3c] sm:$0xf] }
 0x140   : > { %6626 = vmatmul.mubr.msk.bf16.vlgmr.msra.gmra.mxu1 %vm1270_vm14, %v5986_v38  ;;  %v4220_v38 = vrot.slane %v4218_v30, 4  ;;  %v6164_v30 = vld [vmem:[#allocation2 + $0x24] sm:$0xe]  ;;  %9809 = vst [vmem:[#allocation13_spill] sm:$0xff] %v8407_v2 }
 0x141   : > { %6692 = vmatpush3.bf16.msra.mxu1 %v8113_v4  ;;  %6629 = vmatprep.mubr.msk.bf16.mxu1 %vm1270_vm14, %v5987_v26  ;;  %v4244_v4 = vrot.slane %v4242_v42, 4  ;;  %v6088_v26 = vld [vmem:[#allocation2 + $0x30] sm:$0xf]  ;;  %v4235_v42 = vor.u32 %v4234_v53, %v4231_v58  ;;  %v6180_v58 = vrot.slane %v6164_v30, 9  ;;  %v4958_v53 = vrot.slane %v6087_v11, 5  ;;  %v8430_v19 = vpop.f32.mrf.mxu0 }
 0x142   : > { %v4221_v13 = vor.u32 %v4220_v38, %v8382_v3  ;;  %v4256_v7 = vshll.u32 %v6088_v26, 16  ;;  %v9806_v38 = vcombine.low %v8151_v37, %v8167_v50  ;;  %v4250_v37 = vrot.slane %v4248_v9, 5  ;;  %9811 = vst [vmem:[#allocation15_spill] sm:$0xff] %v8430_v19 }
 0x143   : > { %v4245_v6 = vor.u32 %v4244_v4, %v8384_v25  ;;  %v9808_v4 = vcombine.low %v8160_v62, %v8177_v39  ;;  %v6181_v50 = vrot.slane %v6165_v45, 9  ;;  %v4964_v12 = vrot.slane %v4962_v14, 4  ;;  %v8412_v39 = vpop.f32.mrf.mxu1 }
 0x144   : > { %v4222_v8 = vrot.slane %v4221_v13, 4  ;;  %v4258_v30 = vrot.slane %v4256_v7, 5  ;;  %v4268_v62 = vrot.slane %v4266_v18, 4  ;;  %9810 = vst [vmem:[#allocation14_spill] sm:$0xff] %v8412_v39  ;;  %v8420_v13 = vsel %vm7511_vm1, %v4950_v36, %v4951_v31  ;;  %v6092_v31 = vld [vmem:[#allocation2 + $0x40] sm:$0xf] }
 0x145   : > { %6672 = vmatmul.mubr.msk.bf16.gmra.mxu0 %vm1270_vm14, %v6844_v21  ;;  %v4253_v21 = vshrl.u32 %v6088_v26, 16  ;;  %v6847_v26 = vld [vmem:[#allocation2 + $0x90] sm:$0xff]   ;;  %v4246_v32 = vrot.slane %v4245_v6, 4  ;;  %v8427_v7 = vsel %vm7511_vm1, %v6180_v58, %v4955_v16  ;;  %v4277_v36 = vshrl.u32 %v6091_v52, 16 }
 0x146   : > { %6675 = vmatprep.mubr.msk.bf16.mxu0 %vm1270_vm14, %v6845_v15  ;;  %v4212_v15 = vrot.slane %v4211_v47, 4  ;;  %v4965_v47 = vrot.slane %v8395_v20, 5  ;;  %v8446_v16 = vsel %vm7511_vm1, %v6181_v50, %v4962_v14  ;;  %v4969_v18 = vrot.slane %v6092_v31, 5  ;;  %v6094_v50 = vld [vmem:[#allocation2 + $0x48] sm:$0xf] }
 0x147   : > { %v4255_v11 = vrot.slane %v4253_v21, 4  ;;  %v4269_v21 = vor.u32 %v4268_v62, %v8410_v43  ;;  %v4290_v58 = vshrl.u32 %v6092_v31, 16 }
 0x148   : > { %6630 = vmatmul.mubr.msk.bf16.gmra.mxu1 %vm1270_vm14, %v9806_v38  ;;  %v4236_v38 = vrot.slane %v4235_v42, 4  ;;  %v4217_v9 = vsel %vm7131_vm13, %v4212_v15, %v8382_v3  ;;  %v4280_v42 = vshll.u32 %v6091_v52, 16  ;;  %v8451_v6 = vsel %vm7511_vm1, %v4964_v12, %v4965_v47 }
 0x149   : > { %6633 = vmatprep.mubr.msk.bf16.mxu1 %vm1270_vm14, %v9808_v4  ;;  %v8416_v4 = vsel %vm7511_vm1, %v6179_v49, %v4948_v51  ;;  %v4227_v49 = vsel %vm7131_vm13, %v4222_v8, %v4226_v34  ;;  %v8436_v51 = vsel %vm7511_vm1, %v4957_v17, %v4958_v53  ;;  %v4272_v34 = vshll.u32 %v8395_v20, 16  ;;  %v6166_v17 = vld [vmem:[#allocation2 + $0x3c] sm:$0xe]  ;;  %v8462_v20 = vld [vmem:[#allocation2 + $0x44] sm:$0x1] }
 0x14a   : > { %v4241_v3 = vsel %vm7131_vm13, %v4236_v38, %v8384_v25  ;;  %v4259_v45 = vor.u32 %v4258_v30, %v4255_v11  ;;  %v9812_v25 = vcombine.low %v8181_v40, %v8193_v22  ;;  %v4286_v15 = vshll.u32 %v6092_v31, 16  ;;  %v6848_v53 = vld [vmem:[#allocation2 + $0x9c] sm:$0xff]   ;;  %v6849_v38 = vld [vmem:[#allocation2 + $0xa8] sm:$0xff]   ;;  %v8478_v30 = vld [vmem:[#allocation2 + $0x58] sm:$0xf] }
 0x14b   : > { %v9814_v12 = vcombine.low %v8203_v0, %v8209_v24  ;;  %v6182_v22 = vrot.slane %v6166_v17, 9  ;;  %v4279_v8 = vrot.slane %v4277_v36, 4  ;;  %v8472_v47 = vcombine.low %v4217_v9, %v4227_v49  ;;  %v6095_v11 = vld [vmem:[#allocation2 + $0x4c] sm:$0xf]  ;;  %v6097_v36 = vld [vmem:[#allocation2 + $0x54] sm:$0xf] }
 0x14c   : > { %v4274_v24 = vrot.slane %v4272_v34, 5  ;;  %v4260_v62 = vrot.slane %v4259_v45, 4  ;;  %v4270_v31 = vrot.slane %v4269_v21, 4  ;;  %v4972_v17 = vrot.slane %v8462_v20, 5  ;;  %v6167_v21 = vld [vmem:[#allocation2 + $0x48] sm:$0xe] }
 0x14d   : > { %6676 = vmatmul.mubr.msk.bf16.gmra.mxu0 %vm1270_vm14, %v6846_v33  ;;  %v4251_v33 = vsel %vm7131_vm13, %v4246_v32, %v4250_v37  ;;  %v8458_v32 = vpop.f32.mrf.mxu1  ;;  %v4282_v37 = vrot.slane %v4280_v42, 5  ;;  %v4292_v9 = vrot.slane %v4290_v58, 4  ;;  %v4301_v49 = vshrl.u32 %v6094_v50, 16 }
 0x14e   : > { %6679 = vmatprep.mubr.msk.bf16.mxu0 %vm1270_vm14, %v6847_v26  ;;  %9813 = vst [vmem:[#allocation16_spill] sm:$0xff] %v8458_v32  ;;  %v8468_v26 = vpop.f32.mrf.mxu0  ;;  %v8474_v52 = vcombine.low %v4241_v3, %v4251_v33  ;;  %v4304_v3 = vshll.u32 %v6094_v50, 16  ;;  %v8490_v34 = vsel %vm7511_vm1, %v6182_v22, %v4969_v18  ;;  %v4310_v0 = vshll.u32 %v6095_v11, 16 }
 0x14f   : > { %9815 = vst [vmem:[#allocation17_spill] sm:$0xff] %v8468_v26  ;;  %v8481_v42 = vpop.f32.mrf.mxu1  ;;  %v4283_v45 = vor.u32 %v4282_v37, %v4279_v8  ;;  %v4314_v40 = vshrl.u32 %v6095_v11, 16  ;;  %v4325_v14 = vshrl.u32 %v6097_v36, 16  ;;  %v4334_v58 = vshll.u32 %v8478_v30, 16 }
 0x150   : > { %6634 = vmatmul.mubr.msk.bf16.gmra.mxu1 %vm1270_vm14, %v9812_v25  ;;  %v4971_v25 = vrot.slane %v4969_v18, 4  ;;  %9816 = vst [vmem:[#allocation18_spill] sm:$0xff] %v8481_v42  ;;  %v8486_v33 = vpop.f32.mrf.mxu0  ;;  %v4338_v50 = vshrl.u32 %v8478_v30, 16  ;;  %v4275_v18 = vsel %vm7131_vm13, %v4270_v31, %v4274_v24  ;;  %v4296_v8 = vshll.u32 %v8462_v20, 16 }
 0x151   : > { %6637 = vmatprep.mubr.msk.bf16.mxu1 %vm1270_vm14, %v9814_v12  ;;  %v8483_v12 = vrot.slane %v4286_v15, 5  ;;  %9817 = vst [vmem:[#allocation19_spill] sm:$0xff] %v8486_v33  ;;  %v4328_v15 = vshll.u32 %v6097_v36, 16  ;;  %v9818_v37 = vcombine.low %v8219_v54, %v8232_v61  ;;  %v6850_v36 = vld [vmem:[#allocation2 + $0xb4] sm:$0xff]   ;;  %v4303_v24 = vrot.slane %v4301_v49, 4 }
 0x152   : > { %v8502_v22 = vsel %vm7511_vm1, %v4971_v25, %v4972_v17  ;;  %v4306_v31 = vrot.slane %v4304_v3, 5  ;;  %v9820_v25 = vcombine.low %v8226_v63, %v8241_v35  ;;  %v8518_v20 = vpop.f32.mrf.mxu0  ;;  %v8520_v54 = vrot.slane %v4283_v45, 4 }
 0x153   : > { %v4293_v42 = vor.u32 %v4292_v9, %v8483_v12  ;;  %9821 = vst [vmem:[#allocation21_spill] sm:$0xff] %v8518_v20  ;;  %v4976_v61 = vrot.slane %v6095_v11, 5  ;;  %v8522_v17 = vrot.slane %v4310_v0, 5  ;;  %v6851_v9 = vld [vmem:[#allocation2 + $0xc0] sm:$0xff]   ;;  %v4327_v32 = vrot.slane %v4325_v14, 4 }
 0x154   : > { %v8526_v49 = vrot.slane %v4334_v58, 5  ;;  %v4340_v3 = vrot.slane %v4338_v50, 4  ;;  %v8532_v35 = vrot.slane %v4296_v8, 5  ;;  %v4307_v45 = vor.u32 %v4306_v31, %v4303_v24  ;;  %v6101_v58 = vld [vmem:[#allocation2 + $0x64] sm:$0xf] }
 0x155   : > { %6680 = vmatmul.mubr.msk.bf16.gmra.mxu0 %vm1270_vm14, %v6848_v53  ;;  %v4265_v53 = vsel %vm7131_vm13, %v4260_v62, %v8410_v43  ;;  %v8512_v43 = vld [vmem:[#allocation2 + $0x50] sm:$0x1]  ;;  %v6183_v62 = vrot.slane %v6167_v21, 9  ;;  %v4330_v21 = vrot.slane %v4328_v15, 5  ;;  %v6100_v50 = vld [vmem:[#allocation2 + $0x60] sm:$0xf]  ;;  %v9824_v20 = vcombine.low %v8248_v23, %v8256_v46 }
 0x156   : > { %6683 = vmatprep.mubr.msk.bf16.mxu0 %vm1270_vm14, %v6849_v38  ;;  %v8509_v38 = vpop.f32.mrf.mxu1  ;;  %v8528_v39 = vcombine.low %v4265_v53, %v4275_v18  ;;  %v4979_v11 = vrot.slane %v8512_v43, 5  ;;  %v4320_v15 = vshll.u32 %v8512_v43, 16  ;;  %v8545_v53 = vpop.f32.mrf.mxu0  ;;  %v4978_v18 = vrot.slane %v4976_v61, 4  ;;  %v6169_v24 = vld [vmem:[#allocation2 + $0x60] sm:$0xe] }
 0x157   : > { %9819 = vst [vmem:[#allocation20_spill] sm:$0xff] %v8509_v38  ;;  %v8524_v38 = vld [vmem:[#allocation2 + $0x5c] sm:$0x1]  ;;  %v8541_v14 = vsel %vm7511_vm1, %v6183_v62, %v4976_v61  ;;  %9823 = vst [vmem:[#allocation23_spill] sm:$0xff] %v8545_v53  ;;  %v4289_v43 = vsel %vm7131_vm13, %v8520_v54, %v8483_v12  ;;  %v4331_v62 = vor.u32 %v4330_v21, %v4327_v32  ;;  %v4990_v31 = vrot.slane %v6101_v58, 5 }
 0x158   : > { %6638 = vmatmul.mubr.msk.bf16.gmra.mxu1 %vm1270_vm14, %v9818_v37  ;;  %v4316_v37 = vrot.slane %v4314_v40, 4  ;;  %v8535_v0 = vpop.f32.mrf.mxu1  ;;  %v8537_v40 = vrot.slane %v4293_v42, 4  ;;  %v4983_v42 = vrot.slane %v8478_v30, 5  ;;  %v4344_v63 = vshll.u32 %v8524_v38, 16  ;;  %v8556_v61 = vld [vmem:[#allocation2 + $0x68] sm:$0x1] }
 0x159   : > { %6641 = vmatprep.mubr.msk.bf16.mxu1 %vm1270_vm14, %v9820_v25  ;;  %9822 = vst [vmem:[#allocation22_spill] sm:$0xff] %v8535_v0  ;;  %v6168_v25 = vld [vmem:[#allocation2 + $0x54] sm:$0xe]  ;;  %v4352_v0 = vshll.u32 %v6100_v50, 16  ;;  %v4358_v53 = vshll.u32 %v6101_v58, 16  ;;  %v4362_v30 = vshrl.u32 %v6101_v58, 16  ;;  %v9826_v21 = vcombine.low %v8260_v27, %v8272_v48 }
 0x15a   : > { %v4317_v8 = vor.u32 %v4316_v37, %v8522_v17  ;;  %v4349_v37 = vshrl.u32 %v6100_v50, 16  ;;  %v4308_v33 = vrot.slane %v4307_v45, 4  ;;  %v4322_v12 = vrot.slane %v4320_v15, 5  ;;  %v6852_v58 = vld [vmem:[#allocation2 + $0xcc] sm:$0xff]  }
 0x15b   : > { %v6184_v32 = vrot.slane %v6168_v25, 9  ;;  %v4986_v54 = vrot.slane %v8524_v38, 5  ;;  %v4985_v26 = vrot.slane %v4983_v42, 4  ;;  %v4346_v23 = vrot.slane %v4344_v63, 5  ;;  %v6104_v27 = vld [vmem:[#allocation2 + $0x70] sm:$0xf] }
 0x15c   : > { %v4318_v50 = vrot.slane %v4317_v8, 4  ;;  %v6185_v46 = vrot.slane %v6169_v24, 9  ;;  %v4993_v45 = vrot.slane %v8556_v61, 5  ;;  %v4351_v15 = vrot.slane %v4349_v37, 4 }
 0x15d   : > { %6684 = vmatmul.mubr.msk.bf16.gmra.mxu0 %vm1270_vm14, %v6850_v36  ;;  %v4341_v36 = vor.u32 %v4340_v3, %v8526_v49  ;;  %v8569_v3 = vpop.f32.mrf.mxu0  ;;  %v4354_v25 = vrot.slane %v4352_v0, 5  ;;  %v8572_v38 = vrot.slane %v4358_v53, 5  ;;  %v4364_v2 = vrot.slane %v4362_v30, 4  ;;  %v6103_v53 = vld [vmem:[#allocation2 + $0x6c] sm:$0xf] }
 0x15e   : > { %6687 = vmatprep.mubr.msk.bf16.mxu0 %vm1270_vm14, %v6851_v9  ;;  %v8562_v9 = vpop.f32.mrf.mxu1  ;;  %v4299_v8 = vsel %vm7131_vm13, %v8537_v40, %v8532_v35  ;;  %v8582_v63 = vsel %vm7511_vm1, %v4978_v18, %v4979_v11  ;;  %v4997_v0 = vrot.slane %v6104_v27, 5  ;;  %v4313_v24 = vsel %vm7131_vm13, %v4308_v33, %v8522_v17  ;;  %v8604_v18 = vld [vmem:[#allocation2 + $0x74] sm:$0x1] }
 0x15f   : > { %9825 = vst [vmem:[#allocation24_spill] sm:$0xff] %v8562_v9  ;;  %v4342_v19 = vrot.slane %v4341_v36, 4  ;;  %v4992_v9 = vrot.slane %v4990_v31, 4  ;;  %v4323_v35 = vsel %vm7131_vm13, %v4318_v50, %v4322_v12  ;;  %v8598_v11 = vsel %vm7511_vm1, %v4985_v26, %v4986_v54 }
 0x160   : > { %6642 = vmatmul.mubr.msk.bf16.gmra.mxu1 %vm1270_vm14, %v9824_v20  ;;  %v4332_v20 = vrot.slane %v4331_v62, 4  ;;  %v8574_v48 = vpop.f32.mrf.mxu1  ;;  %v8586_v62 = vsel %vm7511_vm1, %v6184_v32, %v4983_v42  ;;  %v8602_v40 = vsel %vm7511_vm1, %v6185_v46, %v4990_v31  ;;  %v6170_v42 = vld [vmem:[#allocation2 + $0x6c] sm:$0xe]  ;;  %v9828_v37 = vcombine.low %v8416_v4, %v8420_v13 }
 0x161   : > { %6645 = vmatprep.mubr.msk.bf16.mxu1 %vm1270_vm14, %v9826_v21  ;;  %9827 = vst [vmem:[#allocation25_spill] sm:$0xff] %v8574_v48  ;;  %v4347_v26 = vsel %vm7131_vm13, %v4342_v19, %v4346_v23  ;;  %v8617_v17 = vsel %vm7511_vm1, %v4992_v9, %v4993_v45  ;;  %v4368_v31 = vshll.u32 %v8556_v61, 16  ;;  %v4355_v12 = vor.u32 %v4354_v25, %v4351_v15  ;;  %v6106_v23 = vld [vmem:[#allocation2 + $0x78] sm:$0xf]  ;;  %v8648_v45 = vld [vmem:[#allocation2 + $0x7c] sm:$0xf] }
 0x162   : > { %v4337_v33 = vsel %vm7131_vm13, %v4332_v20, %v8526_v49  ;;  %v4365_v4 = vor.u32 %v4364_v2, %v8572_v38  ;;  %v4373_v13 = vshrl.u32 %v6103_v53, 16  ;;  %v4376_v32 = vshll.u32 %v6103_v53, 16  ;;  %v8627_v49 = vpop.f32.mrf.mxu1  ;;  %v8650_v15 = vld [vmem:[#allocation2 + $0x88] sm:$0xf] }
 0x163   : > { %v9829_v54 = vcombine.low %v8266_v1, %v8281_v28  ;;  %9830 = vst [vmem:[#allocation26_spill] sm:$0xff] %v8627_v49  ;;  %v8629_v19 = vcombine.low %v4289_v43, %v4299_v8  ;;  %v6186_v9 = vrot.slane %v6170_v42, 9  ;;  %v4999_v21 = vrot.slane %v4997_v0, 4 }
 0x164   : > { %v5000_v61 = vrot.slane %v8604_v18, 5  ;;  %v4382_v50 = vshll.u32 %v6104_v27, 16  ;;  %v4386_v43 = vshrl.u32 %v6104_v27, 16  ;;  %v8642_v46 = vcombine.low %v4313_v24, %v4323_v35  ;;  %v6109_v27 = vld [vmem:[#allocation2 + $0x84] sm:$0xf] }
 0x165   : > { %v8588_v36 = vpop.f32.mrf.mxu0  ;;  %6688 = vmatmul.mubr.msk.bf16.gmra.mxu0 %vm1270_vm14, %v6852_v58  ;;  %v9831_v58 = vcombine.low %v8285_v60, %v8297_v10  ;;  %v8644_v20 = vcombine.low %v4337_v33, %v4347_v26  ;;  %v4370_v10 = vrot.slane %v4368_v31, 5  ;;  %v4356_v8 = vrot.slane %v4355_v12, 4  ;;  %v8698_v60 = vld [vmem:[#allocation2 + $0x80] sm:$0x1] }
 0x166   : > { %6727 = vmatprep.mubr.msk.bf16.mxu0 %vm1270_vm14, %v9828_v37  ;;  %v4366_v53 = vrot.slane %v4365_v4, 4  ;;  %v4375_v42 = vrot.slane %v4373_v13, 4  ;;  %v4378_v37 = vrot.slane %v4376_v32, 5  ;;  %v8658_v24 = vsel %vm7511_vm1, %v6186_v9, %v4997_v0  ;;  %v8672_v32 = vld [vmem:[#allocation2 + $0x78] sm:$0xe] }
 0x167   : > { %v8620_v30 = vpop.f32.mrf.mxu0  ;;  %v8662_v35 = vsel %vm7511_vm1, %v4999_v21, %v5000_v61  ;;  %v4397_v33 = vshrl.u32 %v6106_v23, 16  ;;  %v4400_v26 = vshll.u32 %v6106_v23, 16  ;;  %v9835_v12 = vcombine.low %v8427_v7, %v8436_v51 }
 0x168   : > { %6646 = vmatmul.mubr.msk.bf16.gmra.mxu1 %vm1270_vm14, %v9829_v54  ;;  %v8654_v54 = vpop.f32.mrf.mxu1  ;;  %v8670_v4 = vrot.slane %v4382_v50, 5  ;;  %v4388_v13 = vrot.slane %v4386_v43, 4  ;;  %v4406_v0 = vshll.u32 %v8648_v45, 16  ;;  %v4410_v9 = vshrl.u32 %v8648_v45, 16 }
 0x169   : > { %6649 = vmatprep.mubr.msk.bf16.mxu1 %vm1270_vm14, %v9831_v58  ;;  %v8636_v2 = vpop.f32.mrf.mxu0  ;;  %9834 = vst [vmem:[#allocation29_spill] sm:$0xff] %v8654_v54  ;;  %v9836_v21 = vcombine.low %v8446_v16, %v8451_v6  ;;  %v4421_v61 = vshrl.u32 %v6109_v27, 16  ;;  %v4424_v58 = vshll.u32 %v6109_v27, 16  ;;  %v4430_v7 = vshll.u32 %v8650_v15, 16 }
 0x16a   : > { %9832 = vst [vmem:[#allocation27_spill] sm:$0xff] %v8636_v2  ;;  %v4434_v51 = vshrl.u32 %v8650_v15, 16  ;;  %v4361_v43 = vsel %vm7131_vm13, %v4356_v8, %v8572_v38  ;;  %v4371_v23 = vsel %vm7131_vm13, %v4366_v53, %v4370_v10  ;;  %v4392_v16 = vshll.u32 %v8604_v18, 16  ;;  %v8694_v27 = vpop.f32.mrf.mxu1 }
 0x16b   : > { %v8652_v25 = vpop.f32.mrf.mxu0  ;;  %v9837_v6 = vcombine.low %v8291_v59, %v8306_v55  ;;  %9838 = vst [vmem:[#allocation30_spill] sm:$0xff] %v8694_v27  ;;  %v4399_v8 = vrot.slane %v4397_v33, 4  ;;  %v4402_v28 = vrot.slane %v4400_v26, 5  ;;  %v9839_v10 = vcombine.low %v8314_v56, %v8320_v5 }
 0x16c   : > { %9833 = vst [vmem:[#allocation28_spill] sm:$0xff] %v8652_v25  ;;  %v4389_v59 = vor.u32 %v4388_v13, %v8670_v4  ;;  %v5004_v55 = vrot.slane %v8648_v45, 5  ;;  %v8709_v53 = vrot.slane %v4406_v0, 5  ;;  %v4426_v33 = vrot.slane %v4424_v58, 5  ;;  %v6172_v0 = vld [vmem:[#allocation2 + $0x84] sm:$0xe] }
 0x16d   : > { %v8664_v31 = vpop.f32.mrf.mxu0  ;;  %6728 = vmatmul.mubr.msk.bf16.vlgmr.msra.gmra.mxu0 %vm1270_vm14, %v9835_v12  ;;  %v4379_v12 = vor.u32 %v4378_v37, %v4375_v42  ;;  %v4412_v42 = vrot.slane %v4410_v9, 4  ;;  %v6112_v37 = vld [vmem:[#allocation2 + $0x90] sm:$0xf]  ;;  %v8713_v26 = vrot.slane %v4430_v7, 5  ;;  %v4436_v38 = vrot.slane %v4434_v51, 4  ;;  %v8724_v9 = vpop.f32.mrf.mxu1 }
 0x16e   : > { %6731 = vmatprep.mubr.msk.bf16.mxu0 %vm1270_vm14, %v9836_v21  ;;  %v4423_v21 = vrot.slane %v4421_v61, 4  ;;  %v8717_v5 = vcombine.low %v4361_v43, %v4371_v23  ;;  %v8721_v13 = vrot.slane %v4392_v16, 5  ;;  %v4416_v45 = vshll.u32 %v8698_v60, 16  ;;  %9840 = vst [vmem:[#allocation31_spill] sm:$0xff] %v8724_v9  ;;  %v8727_v58 = vld [vmem:[#allocation2 + $0x94] sm:$0xf] }
 0x16f   : > { %v8682_v50 = vpop.f32.mrf.mxu0  ;;  %v5007_v1 = vrot.slane %v8698_v60, 5  ;;  %v4403_v61 = vor.u32 %v4402_v28, %v4399_v8  ;;  %v4445_v7 = vshrl.u32 %v6112_v37, 16  ;;  %v4448_v51 = vshll.u32 %v6112_v37, 16 }
 0x170   : > { %6650 = vmatmul.mubr.msk.bf16.gmra.mxu1 %vm1270_vm14, %v9837_v6  ;;  %v8711_v6 = vld [vmem:[#allocation2 + $0x8c] sm:$0x1]  ;;  %v9841_v43 = vcombine.low %v8490_v34, %v8502_v22  ;;  %v8735_v23 = vrot.slane %v4389_v59, 4  ;;  %v5011_v16 = vrot.slane %v8650_v15, 5  ;;  %v9842_v28 = vcombine.low %v8541_v14, %v8582_v63  ;;  %v6173_v34 = vld [vmem:[#allocation2 + $0x90] sm:$0xe] }
 0x171   : > { %6653 = vmatprep.mubr.msk.bf16.mxu1 %vm1270_vm14, %v9839_v10  ;;  %v8705_v18 = vpop.f32.mrf.mxu0  ;;  %v8719_v10 = vrot.slane %v4379_v12, 4  ;;  %v4413_v12 = vor.u32 %v4412_v42, %v8709_v53  ;;  %v4440_v60 = vshll.u32 %v8711_v6, 16  ;;  %v5006_v8 = vrot.slane %v5004_v55, 4  ;;  %v8750_v15 = vld [vmem:[#allocation2 + $0x98] sm:$0x1] }
 0x172   : > { %v4427_v37 = vor.u32 %v4426_v33, %v4423_v21  ;;  %v4437_v9 = vor.u32 %v4436_v38, %v8713_v26  ;;  %v5018_v22 = vrot.slane %v8727_v58, 5  ;;  %v6188_v42 = vrot.slane %v6172_v0, 9 }
 0x173   : > { %v8715_v56 = vpop.f32.mrf.mxu0  ;;  %v4454_v54 = vshll.u32 %v8727_v58, 16  ;;  %v4458_v14 = vshrl.u32 %v8727_v58, 16  ;;  %v9844_v21 = vcombine.low %v8324_v41, %v8335_v57  ;;  %v4404_v38 = vrot.slane %v4403_v61, 4 }
 0x174   : > { %v5014_v33 = vrot.slane %v8711_v6, 5  ;;  %v4414_v49 = vrot.slane %v4413_v12, 4  ;;  %v5013_v48 = vrot.slane %v5011_v16, 4  ;;  %v4442_v58 = vrot.slane %v4440_v60, 5 }
 0x175   : > { %v8729_v27 = vpop.f32.mrf.mxu0  ;;  %6732 = vmatmul.mubr.msk.bf16.gmra.mxu0 %vm1270_vm14, %v9841_v43  ;;  %v8748_v43 = vrot.slane %v4416_v45, 5  ;;  %v4450_v45 = vrot.slane %v4448_v51, 5  ;;  %v6189_v25 = vrot.slane %v6173_v34, 9  ;;  %v4428_v2 = vrot.slane %v4427_v37, 4  ;;  %v6115_v34 = vld [vmem:[#allocation2 + $0x9c] sm:$0xf] }
 0x176   : > { %6735 = vmatprep.mubr.msk.bf16.mxu0 %vm1270_vm14, %v9842_v28  ;;  %v4447_v28 = vrot.slane %v4445_v7, 4  ;;  %v4438_v41 = vrot.slane %v4437_v9, 4  ;;  %v5020_v57 = vrot.slane %v5018_v22, 4  ;;  %v5021_v61 = vrot.slane %v8750_v15, 5  ;;  %v6116_v9 = vld [vmem:[#allocation2 + $0xa0] sm:$0xf] }
 0x177   : > { %v8746_v59 = vpop.f32.mrf.mxu0  ;;  %v9846_v6 = vrot.slane %v8672_v32, 9  ;;  %v8780_v51 = vrot.slane %v4454_v54, 5  ;;  %v4460_v12 = vrot.slane %v4458_v14, 4  ;;  %v4395_v37 = vsel %vm7131_vm13, %v8735_v23, %v8721_v13 }
 0x178   : > { %v8754_v63 = vpop.f32.mrf.mxu1  ;;  %6654 = vmatmul.mubr.msk.bf16.gmra.mxu1 %vm1270_vm14, %v9844_v21  ;;  %v4451_v32 = vor.u32 %v4450_v45, %v4447_v28  ;;  %v9848_v54 = vcombine.low %v8586_v62, %v8598_v11  ;;  %v4409_v14 = vsel %vm7131_vm13, %v4404_v38, %v8709_v53  ;;  %v4419_v13 = vsel %vm7131_vm13, %v4414_v49, %v8748_v43  ;;  %v6174_v62 = vld [vmem:[#allocation2 + $0x9c] sm:$0xe] }
 0x179   : > { %9843 = vst [vmem:[#allocation32_spill] sm:$0xff] %v8754_v63  ;;  %6693 = vmatprep.mubr.msk.bf16.mxu1 %vm1270_vm14, %v8472_v47  ;;  %v8763_v0 = vpop.f32.mrf.mxu0  ;;  %v4385_v47 = vsel %vm7131_vm13, %v8719_v10, %v8670_v4  ;;  %v8778_v7 = vsel %vm7511_vm1, %v9846_v6, %v5004_v55  ;;  %v8790_v4 = vsel %vm7511_vm1, %v5006_v8, %v5007_v1  ;;  %v5025_v10 = vrot.slane %v6116_v9, 5  ;;  %v8812_v8 = vld [vmem:[#allocation2 + $0xa4] sm:$0x1] }
 0x17a   : > { %v8765_v63 = vpop.f32.mrf.mxu1  ;;  %v8806_v1 = vsel %vm7511_vm1, %v6188_v42, %v5011_v16  ;;  %v8810_v23 = vsel %vm7511_vm1, %v5013_v48, %v5014_v33  ;;  %v9850_v53 = vcombine.low %v8602_v40, %v8617_v17  ;;  %v4433_v49 = vsel %vm7131_vm13, %v4428_v2, %v8713_v26 }
 0x17b   : > { %9845 = vst [vmem:[#allocation33_spill] sm:$0xff] %v8765_v63  ;;  %v8768_v21 = vpop.f32.mrf.mxu0  ;;  %v4443_v16 = vsel %vm7131_vm13, %v4438_v41, %v4442_v58  ;;  %v8827_v48 = vsel %vm7511_vm1, %v6189_v25, %v5018_v22  ;;  %v8831_v43 = vsel %vm7511_vm1, %v5020_v57, %v5021_v61  ;;  %v4461_v40 = vor.u32 %v4460_v12, %v8780_v51 }
 0x17c   : > { %v8782_v60 = vpop.f32.mrf.mxu1  ;;  %v4464_v17 = vshll.u32 %v8750_v15, 16  ;;  %v4469_v38 = vshrl.u32 %v6115_v34, 16  ;;  %v4472_v33 = vshll.u32 %v6115_v34, 16  ;;  %v8839_v26 = vrot.slane %v4451_v32, 4  ;;  %v6118_v32 = vld [vmem:[#allocation2 + $0xa8] sm:$0xf] }
 0x17d   : > { %9847 = vst [vmem:[#allocation34_spill] sm:$0xff] %v8782_v60  ;;  %v8792_v55 = vpop.f32.mrf.mxu0  ;;  %6736 = vmatmul.mubr.msk.bf16.gmra.mxu0 %vm1270_vm14, %v9848_v54  ;;  %v6190_v25 = vrot.slane %v6174_v62, 9  ;;  %v5027_v22 = vrot.slane %v5025_v10, 4  ;;  %v5028_v28 = vrot.slane %v8812_v8, 5  ;;  %v8846_v58 = vcombine.low %v4385_v47, %v4395_v37  ;;  %v308_v34 = vld [vmem:[#allocation2 + $0xd4] sm:$0x1] }
 0x17e   : > { %v8814_v11 = vpop.f32.mrf.mxu1  ;;  %6739 = vmatprep.mubr.msk.bf16.mxu0 %vm1270_vm14, %v9850_v53  ;;  %v6204_v15 = vcombine.low %v8778_v7, %v8790_v4  ;;  %v4478_v41 = vshll.u32 %v6116_v9, 16  ;;  %v4482_v57 = vshrl.u32 %v6116_v9, 16  ;;  %v8854_v12 = vcombine.low %v4433_v49, %v4443_v16  ;;  %v6119_v54 = vld [vmem:[#allocation2 + $0xac] sm:$0xf]  ;;  %v6175_v49 = vld [vmem:[#allocation2 + $0xa8] sm:$0xe] }
 0x17f   : > { %9849 = vst [vmem:[#allocation35_spill] sm:$0xff] %v8814_v11  ;;  %v8833_v42 = vpop.f32.mrf.mxu0  ;;  %v8860_v37 = vrot.slane %v4461_v40, 4  ;;  %v8862_v7 = vrot.slane %v4464_v17, 5  ;;  %v4471_v9 = vrot.slane %v4469_v38, 4  ;;  %v4474_v4 = vrot.slane %v4472_v33, 5  ;;  %v9855_v11 = vld [vmem:[#allocation8_spill] sm:$0xff] }
 0x180   : > { %v6491_v2 = vpop.f32.mrf.mxu1  ;;  %6694 = vmatmul.mubr.msk.bf16.vlgmr.msra.gmra.mxu1 %vm1270_vm14, %v8474_v52  ;;  %v8850_v52 = vcombine.low %v4409_v14, %v4419_v13  ;;  %v4457_v13 = vsel %vm7131_vm13, %v8839_v26, %v8780_v51  ;;  %v8870_v62 = vsel %vm7511_vm1, %v6190_v25, %v5025_v10  ;;  %v8874_v53 = vsel %vm7511_vm1, %v5027_v22, %v5028_v28  ;;  %v8884_v33 = vld [vmem:[#allocation2 + $0xb0] sm:$0x1]  ;;  %v9853_v22 = vld [vmem:[#allocation6_spill] sm:$0xff] }
 0x181   : > { %6697 = vmatprep.mubr.msk.bf16.mxu1 %vm1270_vm14, %v8528_v39  ;;  %v8844_v45 = vpop.f32.mrf.mxu0  ;;  %v5032_v16 = vrot.slane %v6119_v54, 5  ;;  %v9851_v17 = vcombine.low %v8658_v24, %v8662_v35  ;;  %v8882_v38 = vrot.slane %v4478_v41, 5  ;;  %v4484_v51 = vrot.slane %v4482_v57, 4  ;;  %v9854_v39 = vld [vmem:[#allocation9_spill] sm:$0xff] }
 0x182   : > { %v1652_v61 = vpop.f32.mrf.mxu1  ;;  %v4493_v10 = vshrl.u32 %v6118_v32, 16  ;;  %v309_v25 = vsel %vm7048_vm7, 0, %v308_v34  ;;  %v1661_v28 = vadd.f32 %v6491_v2, %v9853_v22  ;;  %v4496_v24 = vshll.u32 %v6118_v32, 16  ;;  %v9858_v22 = vld [vmem:[#allocation13_spill] sm:$0xff] }
 0x183   : > { %v8858_v47 = vpop.f32.mrf.mxu0  ;;  %v1653_v6 = vadd.f32 %v1652_v61, %v9854_v39  ;;  %310 = vst [vmem:[#allocation2 + $0xd4] sm:$0x1] %v309_v25  ;;  %v4467_v41 = vsel %vm7131_vm13, %v8860_v37, %v8862_v7  ;;  %v4475_v57 = vor.u32 %v4474_v4, %v4471_v9  ;;  %v4488_v34 = vshll.u32 %v8812_v8, 16 }
 0x184   : > { %v6492_v14 = vpop.f32.mrf.mxu1  ;;  %v6191_v2 = vrot.slane %v6175_v49, 9  ;;  %v5035_v32 = vrot.slane %v8884_v33, 5  ;;  %v4495_v8 = vrot.slane %v4493_v10, 4  ;;  %v4502_v7 = vshll.u32 %v6119_v54, 16 }
 0x185   : > { %v8876_v40 = vpop.f32.mrf.mxu0  ;;  %6740 = vmatmul.mubr.msk.bf16.gmra.mxu0 %vm1270_vm14, %v9851_v17  ;;  %v1664_v60 = vadd.f32 %v6492_v14, %v9855_v11  ;;  %v9856_v17 = vld [vmem:[#allocation10_spill] sm:$0xff]  ;;  %v9857_v14 = vld [vmem:[#allocation11_spill] sm:$0xff]  ;;  %v4498_v4 = vrot.slane %v4496_v24, 5  ;;  %v8914_v49 = vadd.f32 %v8682_v50, %v1653_v6  ;;  %v4485_v10 = vor.u32 %v4484_v51, %v8882_v38 }
 0x186   : > { %v1655_v63 = vpop.f32.mrf.mxu1  ;;  %6743 = vmatprep.mubr.msk.bf16.mxu0 %vm1270_vm14, %v6204_v15  ;;  %v5034_v15 = vrot.slane %v5032_v16, 4  ;;  %v6124_v11 = vld [vmem:[#allocation2 + $0xc0] sm:$0xf] }
 0x187   : > { %v8892_v35 = vpop.f32.mrf.mxu0  ;;  %v1656_v61 = vadd.f32 %v1655_v63, %v9856_v17  ;;  %v4506_v63 = vshrl.u32 %v6119_v54, 16  ;;  %v8917_v25 = vadd.f32 %v8705_v18, %v1664_v60  ;;  %v8927_v54 = vsel %vm7511_vm1, %v6191_v2, %v5032_v16 }
 0x188   : > { %v6495_v39 = vpop.f32.mrf.mxu1  ;;  %6698 = vmatmul.mubr.msk.bf16.gmra.mxu1 %vm1270_vm14, %v8629_v19  ;;  %v8911_v19 = vadd.f32 %v8664_v31, %v1661_v28  ;;  %v8931_v50 = vsel %vm7511_vm1, %v5034_v15, %v5035_v32  ;;  %v4512_v18 = vshll.u32 %v8884_v33, 16  ;;  %v9859_v28 = vld [vmem:[#allocation15_spill] sm:$0xff]  ;;  %v9860_v16 = vcombine.low %v8806_v1, %v8810_v23  ;;  %v8949_v15 = vld [vmem:[#allocation2 + $0xb8] sm:$0xf]  ;;  %v6176_v33 = vld [vmem:[#allocation2 + $0xb4] sm:$0xe] }
 0x189   : > { %v1677_v26 = vadd.f32 %v6495_v39, %v9857_v14  ;;  %6701 = vmatprep.mubr.msk.bf16.mxu1 %vm1270_vm14, %v8642_v46  ;;  %v8908_v37 = vpop.f32.mrf.mxu0  ;;  %v8922_v46 = vrot.slane %v4475_v57, 4  ;;  %v8935_v60 = vadd.f32 %v8715_v56, %v1656_v61  ;;  %v8947_v57 = vrot.slane %v4502_v7, 5  ;;  %v8963_v7 = vld [vmem:[#allocation2 + $0xc4] sm:$0xf] }
 0x18a   : > { %v1668_v9 = vpop.f32.mrf.mxu1  ;;  %v4508_v2 = vrot.slane %v4506_v63, 4  ;;  %v9862_v61 = vcombine.low %v8827_v48, %v8831_v43  ;;  %v8958_v32 = vcombine.low %v4457_v13, %v4467_v41  ;;  %v8960_v1 = vrot.slane %v4488_v34, 5  ;;  %v9863_v63 = vld [vmem:[#allocation17_spill] sm:$0xff]  ;;  %v6177_v48 = vld [vmem:[#allocation2 + $0xc0] sm:$0xe] }
 0x18b   : > { %v1669_v17 = vadd.f32 %v1668_v9, %v9858_v22  ;;  %v8920_v39 = vpop.f32.mrf.mxu0  ;;  %v8938_v6 = vadd.f32 %v8729_v27, %v1677_v26  ;;  %v4499_v23 = vor.u32 %v4498_v4, %v4495_v8  ;;  %v5039_v14 = vrot.slane %v8949_v15, 5  ;;  %v6121_v26 = vld [vmem:[#allocation2 + $0xb4] sm:$0xf] }
 0x18c   : > { %v6496_v31 = vpop.f32.mrf.mxu1  ;;  %v8968_v22 = vrot.slane %v4485_v10, 4  ;;  %v5046_v43 = vrot.slane %v8963_v7, 5  ;;  %v6208_v8 = vcombine.low %v8927_v54, %v8931_v50  ;;  %v8984_v4 = vrot.slane %v4512_v18, 5 }
 0x18d   : > { %v1680_v24 = vadd.f32 %v6496_v31, %v9859_v28  ;;  %v8941_v51 = vpop.f32.mrf.mxu0  ;;  %6744 = vmatmul.mubr.msk.bf16.gmra.mxu0 %vm1270_vm14, %v9860_v16  ;;  %v8952_v56 = vadd.f32 %v8746_v59, %v1669_v17  ;;  %v8970_v17 = vld [vmem:[#allocation2 + $0xbc] sm:$0x1]  ;;  %v6192_v10 = vrot.slane %v6176_v33, 9  ;;  %v8986_v31 = vld [vmem:[#allocation2 + $0xc8] sm:$0x1]  ;;  %v9865_v28 = vld [vmem:[#allocation19_spill] sm:$0xff] }
 0x18e   : > { %v1671_v27 = vpop.f32.mrf.mxu1  ;;  %6747 = vmatprep.mubr.msk.bf16.mxu0 %vm1270_vm14, %v9862_v61  ;;  %v4517_v16 = vshrl.u32 %v6121_v26, 16  ;;  %v8997_v54 = vrot.slane %v4499_v23, 4  ;;  %v5041_v50 = vrot.slane %v5039_v14, 4  ;;  %v5042_v18 = vrot.slane %v8970_v17, 5 }
 0x18f   : > { %9861 = vst [vmem:[#allocation7_spill] sm:$0xff] %v8952_v56  ;;  %v1672_v9 = vadd.f32 %v1671_v27, %v9863_v63  ;;  %v8966_v59 = vpop.f32.mrf.mxu0  ;;  %v8974_v13 = vadd.f32 %v8763_v0, %v1680_v24  ;;  %v6193_v33 = vrot.slane %v6177_v48, 9  ;;  %v9867_v63 = vld [vmem:[#allocation21_spill] sm:$0xff]  ;;  %v5049_v34 = vrot.slane %v8986_v31, 5 }
 0x190   : > { %v6499_v41 = vpop.f32.mrf.mxu1  ;;  %6702 = vmatmul.mubr.msk.bf16.gmra.mxu1 %vm1270_vm14, %v8644_v20  ;;  %v4509_v20 = vor.u32 %v4508_v2, %v8947_v57  ;;  %v5040_v23 = vsel %vm7511_vm1, %v6192_v10, %v5039_v14  ;;  %v4530_v48 = vshrl.u32 %v8949_v15, 16  ;;  %v9870_v56 = vcombine.low %v8870_v62, %v8874_v53 }
 0x191   : > { %9864 = vst [vmem:[#allocation6_spill] sm:$0xff] %v8974_v13  ;;  %v1693_v0 = vadd.f32 %v6499_v41, %v9865_v28  ;;  %6705 = vmatprep.mubr.msk.bf16.mxu1 %vm1270_vm14, %v8717_v5  ;;  %v8991_v24 = vpop.f32.mrf.mxu0  ;;  %v8995_v27 = vadd.f32 %v8768_v21, %v1672_v9  ;;  %v5048_v5 = vrot.slane %v5046_v43, 4  ;;  %v4520_v9 = vshll.u32 %v6121_v26, 16  ;;  %v9869_v13 = vld [vmem:[#allocation23_spill] sm:$0xff] }
 0x192   : > { %v1684_v61 = vpop.f32.mrf.mxu1  ;;  %v4544_v10 = vshll.u32 %v6124_v11, 16 }
 0x193   : > { %9866 = vst [vmem:[#allocation9_spill] sm:$0xff] %v8995_v27  ;;  %v1685_v41 = vadd.f32 %v1684_v61, %v9867_v63  ;;  %v9001_v28 = vpop.f32.mrf.mxu0  ;;  %v9005_v2 = vadd.f32 %v8792_v55, %v1693_v0  ;;  %v4526_v27 = vshll.u32 %v8949_v15, 16  ;;  %v9018_v55 = vrot.slane %v4509_v20, 4 }
 0x194   : > { %v6500_v21 = vpop.f32.mrf.mxu1  ;;  %v9020_v0 = vrot.slane %v4517_v16, 4  ;;  %v5043_v15 = vsel %vm7511_vm1, %v5041_v50, %v5042_v18  ;;  %v5047_v20 = vsel %vm7511_vm1, %v6193_v33, %v5046_v43  ;;  %v9038_v16 = vld [vmem:[#allocation2 + $0xd4] sm:$0x1]  ;;  %v4550_v18 = vshll.u32 %v8963_v7, 16 }
 0x195   : > { %9868 = vst [vmem:[#allocation8_spill] sm:$0xff] %v9005_v2  ;;  %v1696_v61 = vadd.f32 %v6500_v21, %v9869_v13  ;;  %v9012_v63 = vpop.f32.mrf.mxu0  ;;  %6748 = vmatmul.mubr.msk.bf16.gmra.mxu0 %vm1270_vm14, %v9870_v56  ;;  %v9022_v2 = vld [vmem:[#allocation2 + $0xd0] sm:$0xf]  ;;  %v9025_v14 = vadd.f32 %v8833_v42, %v1685_v41  ;;  %v4541_v13 = vshrl.u32 %v6124_v11, 16  ;;  %v5050_v42 = vsel %vm7511_vm1, %v5048_v5, %v5049_v34 }
 0x196   : > { %v1687_v26 = vpop.f32.mrf.mxu1  ;;  %6751 = vmatprep.mubr.msk.bf16.mxu0 %vm1270_vm14, %v6208_v8  ;;  %v5053_v62 = vrot.slane %v9022_v2, 5  ;;  %v6178_v8 = vld [vmem:[#allocation2 + $0xcc] sm:$0xe]  ;;  %v4522_v11 = vrot.slane %v4520_v9, 5  ;;  %v4554_v43 = vshrl.u32 %v8963_v7, 16  ;;  %v4532_v5 = vrot.slane %v4530_v48, 4 }
 0x197   : > { %v1688_v53 = vadd.f32 %v1687_v26, %v8569_v3  ;;  %v9032_v56 = vpop.f32.mrf.mxu0  ;;  %v9041_v41 = vadd.f32 %v8844_v45, %v1696_v61  ;;  %v9045_v3 = vrot.slane %v4526_v27, 5  ;;  %v6209_v45 = vcombine.low %v5040_v23, %v5043_v15 }
 0x198   : > { %v6503_v50 = vpop.f32.mrf.mxu1  ;;  %6706 = vmatmul.mubr.msk.bf16.gmra.mxu1 %vm1270_vm14, %v8846_v58  ;;  %v6210_v9 = vcombine.low %v5047_v20, %v5050_v42  ;;  %v6194_v27 = vrot.slane %v6178_v8, 9  ;;  %v5055_v61 = vrot.slane %v5053_v62, 4  ;;  %v5056_v26 = vrot.slane %v9038_v16, 5 }
 0x199   : > { %9871 = vst [vmem:[#allocation10_spill] sm:$0xff] %v9041_v41  ;;  %v1709_v33 = vadd.f32 %v6503_v50, %v8588_v36  ;;  %6709 = vmatprep.mubr.msk.bf16.mxu1 %vm1270_vm14, %v8850_v52  ;;  %v9052_v34 = vpop.f32.mrf.mxu0  ;;  %v9055_v21 = vadd.f32 %v8858_v47, %v1688_v53  ;;  %v4543_v36 = vrot.slane %v4541_v13, 4  ;;  %v4546_v50 = vrot.slane %v4544_v10, 5  ;;  %v9872_v53 = vld [vmem:[#allocation27_spill] sm:$0xff] }
 0x19a   : > { %v1700_v58 = vpop.f32.mrf.mxu1  ;;  %v4491_v47 = vsel %vm7131_vm13, %v8968_v22, %v8960_v1  ;;  %v4505_v48 = vsel %vm7131_vm13, %v8997_v54, %v8947_v57  ;;  %v9072_v15 = vrot.slane %v4550_v18, 5  ;;  %v4536_v1 = vshll.u32 %v8970_v17, 16  ;;  %v6127_v22 = vld [vmem:[#allocation2 + $0xcc] sm:$0xf] }
 0x19b   : > { %v1701_v7 = vadd.f32 %v1700_v58, %v8620_v30  ;;  %v9059_v41 = vpop.f32.mrf.mxu0  ;;  %v9062_v52 = vadd.f32 %v8876_v40, %v1709_v33  ;;  %v4556_v30 = vrot.slane %v4554_v43, 4  ;;  %v4515_v40 = vsel %vm7131_vm13, %v9018_v55, %v8984_v4  ;;  %v9873_v55 = vld [vmem:[#allocation28_spill] sm:$0xff] }
 0x19c   : > { %v6504_v23 = vpop.f32.mrf.mxu1  ;;  %v4523_v54 = vor.u32 %v4522_v11, %v9020_v0  ;;  %v4533_v42 = vor.u32 %v4532_v5, %v9045_v3  ;;  %v5054_v8 = vsel %vm7511_vm1, %v6194_v27, %v5053_v62  ;;  %v5057_v4 = vsel %vm7511_vm1, %v5055_v61, %v5056_v26  ;;  %v9874_v5 = vld [vmem:[#allocation12_spill] sm:$0xff] }
 0x19d   : > { %v1712_v13 = vadd.f32 %v6504_v23, %v9872_v53  ;;  %v9075_v10 = vpop.f32.mrf.mxu0  ;;  %6752 = vmatmul.mubr.msk.bf16.gmra.mxu0 %vm1270_vm14, %v6209_v45  ;;  %v9084_v20 = vadd.f32 %v8892_v35, %v1701_v7  ;;  %v4547_v43 = vor.u32 %v4546_v50, %v4543_v36  ;;  %v4560_v35 = vshll.u32 %v8986_v31, 16  ;;  %v9876_v23 = vld [vmem:[#allocation14_spill] sm:$0xff] }
 0x19e   : > { %v1703_v57 = vpop.f32.mrf.mxu1  ;;  %6755 = vmatprep.mubr.msk.bf16.mxu0 %vm1270_vm14, %v6210_v9  ;;  %v4557_v11 = vor.u32 %v4556_v30, %v9072_v15  ;;  %v4565_v62 = vshrl.u32 %v6127_v22, 16  ;;  %v4568_v45 = vshll.u32 %v6127_v22, 16  ;;  %v4574_v44 = vshll.u32 %v9022_v2, 16 }
 0x19f   : > { %v1704_v18 = vadd.f32 %v1703_v57, %v9873_v55  ;;  %v9094_v17 = vpop.f32.mrf.mxu0  ;;  %v9098_v33 = vadd.f32 %v8908_v37, %v1712_v13  ;;  %v6211_v31 = vcombine.low %v5054_v8, %v5057_v4  ;;  %v4578_v37 = vshrl.u32 %v9022_v2, 16  ;;  %v9877_v55 = vld [vmem:[#allocation16_spill] sm:$0xff] }
 0x1a0   : > { %v6507_v0 = vpop.f32.mrf.mxu1  ;;  %6710 = vmatmul.mubr.msk.bf16.gmra.mxu1 %vm1270_vm14, %v8854_v12  ;;  %v9875_v61 = vsel %vm7131_vm13, %v8922_v46, %v8882_v38  ;;  %v6143_v7 = vcombine.low %v4505_v48, %v4515_v40  ;;  %v4524_v36 = vrot.slane %v4523_v54, 4  ;;  %v4538_v50 = vrot.slane %v4536_v1, 5  ;;  %v9878_v54 = vld [vmem:[#allocation18_spill] sm:$0xff] }
 0x1a1   : > { %v1725_v58 = vadd.f32 %v6507_v0, %v9874_v5  ;;  %6713 = vmatprep.mubr.msk.bf16.mxu1 %vm1270_vm14, %v8958_v32  ;;  %v9107_v9 = vpop.f32.mrf.mxu0  ;;  %v9111_v27 = vadd.f32 %v8920_v39, %v1704_v18  ;;  %v6142_v26 = vcombine.low %v9875_v61, %v4491_v47  ;;  %v4534_v30 = vrot.slane %v4533_v42, 4 }
 0x1a2   : > { %v1716_v12 = vpop.f32.mrf.mxu1  ;;  %v4548_v13 = vrot.slane %v4547_v43, 4  ;;  %v4558_v22 = vrot.slane %v4557_v11, 4  ;;  %v4562_v57 = vrot.slane %v4560_v35, 5  ;;  %v4567_v8 = vrot.slane %v4565_v62, 4 }
 0x1a3   : > { %v1717_v32 = vadd.f32 %v1716_v12, %v9876_v23  ;;  %v9119_v53 = vpop.f32.mrf.mxu0  ;;  %v9122_v2 = vadd.f32 %v8941_v51, %v1725_v58  ;;  %v4570_v4 = vrot.slane %v4568_v45, 5  ;;  %v4576_v47 = vrot.slane %v4574_v44, 5 }
 0x1a4   : > { %v6508_v39 = vpop.f32.mrf.mxu1  ;;  %v4580_v48 = vrot.slane %v4578_v37, 4  ;;  %v4529_v42 = vsel %vm7131_vm13, %v4524_v36, %v9045_v3  ;;  %v4539_v0 = vsel %vm7131_vm13, %v4534_v30, %v4538_v50  ;;  %v4563_v11 = vsel %vm7131_vm13, %v4558_v22, %v4562_v57  ;;  %v9879_v3 = vld [vmem:[#allocation20_spill] sm:$0xff]  ;;  %v9880_v37 = vld [vmem:[#allocation22_spill] sm:$0xff]  ;;  %v9882_v22 = vld [vmem:[#allocation25_spill] sm:$0xff] }
 0x1a5   : > { %v1728_v38 = vadd.f32 %v6508_v39, %v9877_v55  ;;  %v9125_v46 = vpop.f32.mrf.mxu0  ;;  %6756 = vmatmul.mubr.msk.bf16.gmra.mxu0 %vm1270_vm14, %v6211_v31  ;;  %v9129_v40 = vadd.f32 %v8966_v59, %v1717_v32  ;;  %v4553_v59 = vsel %vm7131_vm13, %v4548_v13, %v9072_v15  ;;  %v4571_v62 = vor.u32 %v4570_v4, %v4567_v8  ;;  %v9881_v32 = vld [vmem:[#allocation24_spill] sm:$0xff]  ;;  %v9883_v55 = vld [vmem:[#allocation26_spill] sm:$0xff] }
 0x1a6   : > { %v1719_v1 = vpop.f32.mrf.mxu1  ;;  %v4584_v44 = vshll.u32 %v9038_v16, 16  ;;  %v6144_v36 = vcombine.low %v4529_v42, %v4539_v0  ;;  %v6145_v50 = vcombine.low %v4553_v59, %v4563_v11 }
 0x1a7   : > { %v1720_v51 = vadd.f32 %v1719_v1, %v9878_v54  ;;  %v9135_v18 = vpop.f32.mrf.mxu0  ;;  %v9138_v43 = vadd.f32 %v8991_v24, %v1728_v38  ;;  %v4581_v24 = vor.u32 %v4580_v48, %v4576_v47  ;;  %v4572_v23 = vrot.slane %v4571_v62, 4  ;;  %v9885_v62 = vld [vmem:[#allocation30_spill] sm:$0xff] }
 0x1a8   : > { %v6511_v35 = vpop.f32.mrf.mxu1  ;;  %6714 = vmatmul.mubr.msk.bf16.gmra.mxu1 %vm1270_vm14, %v6142_v26  ;;  %v4586_v13 = vrot.slane %v4584_v44, 5 }
 0x1a9   : > { %v1741_v45 = vadd.f32 %v6511_v35, %v9879_v3  ;;  %6717 = vmatprep.mubr.msk.bf16.mxu1 %vm1270_vm14, %v6143_v7  ;;  %v6554_v5 = vpop.f32.mrf.mxu0  ;;  %v9152_v58 = vadd.f32 %v9001_v28, %v1720_v51  ;;  %v4582_v30 = vrot.slane %v4581_v24, 4  ;;  %v4577_v48 = vsel %vm7131_vm13, %v4572_v23, %v4576_v47  ;;  %v9886_v24 = vld [vmem:[#allocation31_spill] sm:$0xff]  ;;  %v9888_v23 = vld [vmem:[#allocation33_spill] sm:$0xff] }
 0x1aa   : > { %v1732_v31 = vpop.f32.mrf.mxu1 }
 0x1ab   : > { %v1733_v12 = vadd.f32 %v1732_v31, %v9880_v37  ;;  %v2192_v61 = vpop.f32.mrf.mxu0  ;;  %v9156_v15 = vadd.f32 %v9012_v63, %v1741_v45 }
 0x1ac   : > { %v6512_v26 = vpop.f32.mrf.mxu1 }
 0x1ad   : > { %v1744_v7 = vadd.f32 %v6512_v26, %v9881_v32  ;;  %v6593_v16 = vpop.f32.mrf.mxu0  ;;  %v9160_v39 = vadd.f32 %v9032_v56, %v1733_v12  ;;  %v4587_v56 = vsel %vm7131_vm13, %v4582_v30, %v4586_v13  ;;  %v9889_v13 = vld [vmem:[#allocation34_spill] sm:$0xff] }
 0x1ae   : > { %v1735_v28 = vpop.f32.mrf.mxu1  ;;  %v6146_v11 = vcombine.low %v4577_v48, %v4587_v56 }
 0x1af   : > { %v1736_v57 = vadd.f32 %v1735_v28, %v9882_v22  ;;  %v3165_v8 = vpop.f32.mrf.mxu0  ;;  %v9164_v4 = vadd.f32 %v9052_v34, %v1744_v7  ;;  %v9884_v34 = vld [vmem:[#allocation29_spill] sm:$0xff] }
 0x1b0   : > { %v6515_v63 = vpop.f32.mrf.mxu1  ;;  %6718 = vmatmul.mubr.msk.bf16.gmra.mxu1 %vm1270_vm14, %v6144_v36 }
 0x1b1   : > { %v1757_v38 = vadd.f32 %v6515_v63, %v9883_v55  ;;  %6721 = vmatprep.mubr.msk.bf16.mxu1 %vm1270_vm14, %v6145_v50  ;;  %v6594_v1 = vpop.f32.mrf.mxu0  ;;  %v9174_v54 = vadd.f32 %v9059_v41, %v1736_v57  ;;  %v9890_v63 = vld [vmem:[#allocation35_spill] sm:$0xff] }
 0x1b2   : > { %v1748_v51 = vpop.f32.mrf.mxu1 }
 0x1b3   : > { %v1749_v42 = vadd.f32 %v1748_v51, %v9884_v34  ;;  %v3168_v35 = vpop.f32.mrf.mxu0  ;;  %v9178_v0 = vadd.f32 %v9075_v10, %v1757_v38  ;;  %v9887_v10 = vld [vmem:[#allocation32_spill] sm:$0xff] }
 0x1b4   : > { %v6516_v59 = vpop.f32.mrf.mxu1 }
 0x1b5   : > { %v1760_v3 = vadd.f32 %v6516_v59, %v9885_v62  ;;  %v6597_v45 = vpop.f32.mrf.mxu0  ;;  %v9182_v47 = vadd.f32 %v9094_v17, %v1749_v42 }
 0x1b6   : > { %v1751_v29 = vpop.f32.mrf.mxu1 }
 0x1b7   : > { %v1752_v44 = vadd.f32 %v1751_v29, %v9886_v24  ;;  %v3181_v41 = vpop.f32.mrf.mxu0  ;;  %v9186_v31 = vadd.f32 %v9107_v9, %v1760_v3 }
 0x1b8   : > { %v6519_v37 = vpop.f32.mrf.mxu1  ;;  %6722 = vmatmul.mubr.msk.bf16.gmra.mxu1 %vm1270_vm14, %v6146_v11 }
 0x1b9   : > { %v1773_v12 = vadd.f32 %v6519_v37, %v9887_v10  ;;  %v6598_v26 = vpop.f32.mrf.mxu0  ;;  %v9191_v36 = vadd.f32 %v9119_v53, %v1752_v44 }
 0x1ba   : > { %v1764_v50 = vpop.f32.mrf.mxu1 }
 0x1bb   : > { %v1765_v17 = vadd.f32 %v1764_v50, %v9888_v23  ;;  %v3184_v32 = vpop.f32.mrf.mxu0  ;;  %v9195_v7 = vadd.f32 %v9125_v46, %v1773_v12  ;;  %v9891_v12 = vld [vmem:[#allocation7_spill] sm:$0xff] }
 0x1bc   : > { %v6520_v30 = vpop.f32.mrf.mxu1 }
 0x1bd   : > { %v1776_v9 = vadd.f32 %v6520_v30, %v9889_v13  ;;  %v6601_v28 = vpop.f32.mrf.mxu0  ;;  %v9199_v22 = vadd.f32 %v9135_v18, %v1765_v17  ;;  %v9892_v17 = vld [vmem:[#allocation6_spill] sm:$0xff] }
 0x1be   : > { %v1767_v57 = vpop.f32.mrf.mxu1 }
 0x1bf   : > { %v1768_v55 = vadd.f32 %v1767_v57, %v9890_v63  ;;  %v3197_v38 = vpop.f32.mrf.mxu0  ;;  %v9202_v53 = vadd.f32 %v6554_v5, %v1776_v9  ;;  %v9893_v9 = vld [vmem:[#allocation9_spill] sm:$0xff] }
 0x1c0   : > { %v6559_v48 = vpop.f32.mrf.mxu1 }
 0x1c1   : > { %v2568_v56 = vadd.f32 %v6559_v48, %v8911_v19  ;;  %v6602_v51 = vpop.f32.mrf.mxu0  ;;  %v9205_v34 = vadd.f32 %v2192_v61, %v1768_v55  ;;  %v9894_v55 = vld [vmem:[#allocation8_spill] sm:$0xff] }
 0x1c2   : > { %v2439_v46 = vpop.f32.mrf.mxu1 }
 0x1c3   : > { %v2566_v42 = vadd.f32 %v2439_v46, %v8914_v49  ;;  %v3200_v59 = vpop.f32.mrf.mxu0  ;;  %v9208_v11 = vadd.f32 %v6593_v16, %v2568_v56 }
 0x1c4   : > { %v6560_v18 = vpop.f32.mrf.mxu1 }
 0x1c5   : > { %v2569_v62 = vadd.f32 %v6560_v18, %v8917_v25  ;;  %v6605_v3 = vpop.f32.mrf.mxu0  ;;  %v9211_v29 = vadd.f32 %v3165_v8, %v2566_v42 }
 0x1c6   : > { %v2442_v5 = vpop.f32.mrf.mxu1 }
 0x1c7   : > { %v2567_v24 = vadd.f32 %v2442_v5, %v8935_v60  ;;  %v3213_v44 = vpop.f32.mrf.mxu0  ;;  %v9214_v19 = vadd.f32 %v6594_v1, %v2569_v62  ;;  %v9895_v5 = vld [vmem:[#allocation10_spill] sm:$0xff] }
 0x1c8   : > { %v6563_v61 = vpop.f32.mrf.mxu1 }
 0x1c9   : > { %v2572_v37 = vadd.f32 %v6563_v61, %v8938_v6  ;;  %v6606_v10 = vpop.f32.mrf.mxu0  ;;  %v9217_v49 = vadd.f32 %v3168_v35, %v2567_v24 }
 0x1ca   : > { %v2455_v16 = vpop.f32.mrf.mxu1 }
 0x1cb   : > { %v2570_v50 = vadd.f32 %v2455_v16, %v9891_v12  ;;  %v3216_v23 = vpop.f32.mrf.mxu0  ;;  %v9220_v25 = vadd.f32 %v6597_v45, %v2572_v37 }
 0x1cc   : > { %v6564_v8 = vpop.f32.mrf.mxu1 }
 0x1cd   : > { %v2573_v30 = vadd.f32 %v6564_v8, %v9892_v17  ;;  %v6609_v13 = vpop.f32.mrf.mxu0  ;;  %v9223_v60 = vadd.f32 %v3181_v41, %v2570_v50 }
 0x1ce   : > { %v2458_v1 = vpop.f32.mrf.mxu1 }
 0x1cf   : > { %v2571_v57 = vadd.f32 %v2458_v1, %v9893_v9  ;;  %v3229_v63 = vpop.f32.mrf.mxu0  ;;  %v9226_v6 = vadd.f32 %v6598_v26, %v2573_v30 }
 0x1d0   : > { %v6567_v35 = vpop.f32.mrf.mxu1 }
 0x1d1   : > { %v2576_v48 = vadd.f32 %v6567_v35, %v9894_v55  ;;  %v6610_v56 = vpop.f32.mrf.mxu0  ;;  %v9229_v46 = vadd.f32 %v3184_v32, %v2571_v57 }
 0x1d2   : > { %v2471_v45 = vpop.f32.mrf.mxu1 }
 0x1d3   : > { %v2574_v42 = vadd.f32 %v2471_v45, %v9025_v14  ;;  %v3232_v18 = vpop.f32.mrf.mxu0  ;;  %v9232_v62 = vadd.f32 %v6601_v28, %v2576_v48 }
 0x1d4   : > { %v6568_v41 = vpop.f32.mrf.mxu1 }
 0x1d5   : > { %v2577_v24 = vadd.f32 %v6568_v41, %v9895_v5  ;;  %v6613_v61 = vpop.f32.mrf.mxu0  ;;  %v9235_v37 = vadd.f32 %v3197_v38, %v2574_v42 }
 0x1d6   : > { %v2474_v26 = vpop.f32.mrf.mxu1 }
 0x1d7   : > { %v2575_v16 = vadd.f32 %v2474_v26, %v9055_v21  ;;  %v3245_v12 = vpop.f32.mrf.mxu0  ;;  %v9238_v50 = vadd.f32 %v6602_v51, %v2577_v24 }
 0x1d8   : > { %v6571_v32 = vpop.f32.mrf.mxu1 }
 0x1d9   : > { %v2580_v8 = vadd.f32 %v6571_v32, %v9062_v52  ;;  %v6614_v17 = vpop.f32.mrf.mxu0  ;;  %v9241_v14 = vadd.f32 %v3200_v59, %v2575_v16 }
 0x1da   : > { %v2487_v28 = vpop.f32.mrf.mxu1 }
 0x1db   : > { %v2578_v30 = vadd.f32 %v2487_v28, %v9084_v20  ;;  %v3248_v1 = vpop.f32.mrf.mxu0  ;;  %v9244_v9 = vadd.f32 %v6605_v3, %v2580_v8 }
 0x1dc   : > { %v6572_v38 = vpop.f32.mrf.mxu1 }
 0x1dd   : > { %v2581_v57 = vadd.f32 %v6572_v38, %v9098_v33  ;;  %v6617_v35 = vpop.f32.mrf.mxu0  ;;  %v9247_v21 = vadd.f32 %v3213_v44, %v2578_v30 }
 0x1de   : > { %v2490_v51 = vpop.f32.mrf.mxu1 }
 0x1df   : > { %v2579_v55 = vadd.f32 %v2490_v51, %v9111_v27  ;;  %v3261_v48 = vpop.f32.mrf.mxu0  ;;  %v9250_v52 = vadd.f32 %v6606_v10, %v2581_v57 }
 0x1e0   : > { %v6575_v59 = vpop.f32.mrf.mxu1 }
 0x1e1   : > { %v2584_v45 = vadd.f32 %v6575_v59, %v9122_v2  ;;  %v6618_v42 = vpop.f32.mrf.mxu0  ;;  %v9253_v20 = vadd.f32 %v3216_v23, %v2579_v55 }
 0x1e2   : > { %v2503_v3 = vpop.f32.mrf.mxu1 }
 0x1e3   : > { %v2582_v41 = vadd.f32 %v2503_v3, %v9129_v40  ;;  %v3264_v5 = vpop.f32.mrf.mxu0  ;;  %v9256_v33 = vadd.f32 %v6609_v13, %v2584_v45 }
 0x1e4   : > { %v6576_v44 = vpop.f32.mrf.mxu1 }
 0x1e5   : > { %9896 = vst [vmem:[#allocation11_spill] sm:$0xff] %v9256_v33  ;;  %v2585_v24 = vadd.f32 %v6576_v44, %v9138_v43  ;;  %v6621_v26 = vpop.f32.mrf.mxu0  ;;  %v9259_v27 = vadd.f32 %v3229_v63, %v2582_v41 }
 0x1e6   : > { %v2506_v10 = vpop.f32.mrf.mxu1 }
 0x1e7   : > { %9897 = vst [vmem:[#allocation13_spill] sm:$0xff] %v9259_v27  ;;  %v2583_v16 = vadd.f32 %v2506_v10, %v9152_v58  ;;  %v3277_v32 = vpop.f32.mrf.mxu0  ;;  %v9262_v2 = vadd.f32 %v6610_v56, %v2585_v24 }
 0x1e8   : > { %v6579_v23 = vpop.f32.mrf.mxu1 }
 0x1e9   : > { %9898 = vst [vmem:[#allocation15_spill] sm:$0xff] %v9262_v2  ;;  %v2588_v8 = vadd.f32 %v6579_v23, %v9156_v15  ;;  %v6622_v28 = vpop.f32.mrf.mxu0  ;;  %v9265_v40 = vadd.f32 %v3232_v18, %v2583_v16 }
 0x1ea   : > { %v2519_v13 = vpop.f32.mrf.mxu1 }
 0x1eb   : > { %9899 = vst [vmem:[#allocation17_spill] sm:$0xff] %v9265_v40  ;;  %v2586_v30 = vadd.f32 %v2519_v13, %v9160_v39  ;;  %v3280_v38 = vpop.f32.mrf.mxu0  ;;  %v9268_v43 = vadd.f32 %v6613_v61, %v2588_v8 }
 0x1ec   : > { %v6580_v63 = vpop.f32.mrf.mxu1 }
 0x1ed   : > { %9900 = vst [vmem:[#allocation19_spill] sm:$0xff] %v9268_v43  ;;  %v2589_v57 = vadd.f32 %v6580_v63, %v9164_v4  ;;  %v9271_v51 = vpop.f32.mrf.mxu0  ;;  %v9273_v58 = vadd.f32 %v3245_v12, %v2586_v30 }
 0x1ee   : > { %v2522_v56 = vpop.f32.mrf.mxu1 }
 0x1ef   : > { %9901 = vst [vmem:[#allocation21_spill] sm:$0xff] %v9273_v58  ;;  %v2587_v55 = vadd.f32 %v2522_v56, %v9174_v54  ;;  %v9276_v15 = vpop.f32.mrf.mxu0  ;;  %v9278_v18 = vadd.f32 %v6614_v17, %v2589_v57 }
 0x1f0   : > { %v6583_v59 = vpop.f32.mrf.mxu1 }
 0x1f1   : > { %9902 = vst [vmem:[#allocation23_spill] sm:$0xff] %v9278_v18  ;;  %v2592_v39 = vadd.f32 %v6583_v59, %v9178_v0  ;;  %v9281_v45 = vpop.f32.mrf.mxu0  ;;  %v9283_v61 = vadd.f32 %v3248_v1, %v2587_v55 }
 0x1f2   : > { %v2535_v3 = vpop.f32.mrf.mxu1 }
 0x1f3   : > { %9903 = vst [vmem:[#allocation27_spill] sm:$0xff] %v9283_v61  ;;  %v2590_v4 = vadd.f32 %v2535_v3, %v9182_v47  ;;  %v9286_v41 = vpop.f32.mrf.mxu0  ;;  %v9288_v12 = vadd.f32 %v6617_v35, %v2592_v39 }
 0x1f4   : > { %v6584_v44 = vpop.f32.mrf.mxu1 }
 0x1f5   : > { %9904 = vst [vmem:[#allocation28_spill] sm:$0xff] %v9288_v12  ;;  %v2593_v54 = vadd.f32 %v6584_v44, %v9186_v31  ;;  %v9291_v24 = vpop.f32.mrf.mxu0  ;;  %v9293_v17 = vadd.f32 %v3261_v48, %v2590_v4 }
 0x1f6   : > { %v2538_v10 = vpop.f32.mrf.mxu1 }
 0x1f7   : > { %9905 = vst [vmem:[#allocation12_spill] sm:$0xff] %v9293_v17  ;;  %v2591_v0 = vadd.f32 %v2538_v10, %v9191_v36  ;;  %v9296_v16 = vpop.f32.mrf.mxu0  ;;  %v9298_v1 = vadd.f32 %v6618_v42, %v2593_v54 }
 0x1f8   : > { %v6587_v23 = vpop.f32.mrf.mxu1 }
 0x1f9   : > { %9906 = vst [vmem:[#allocation14_spill] sm:$0xff] %v9298_v1  ;;  %v2596_v47 = vadd.f32 %v6587_v23, %v9195_v7  ;;  %v9301_v8 = vpop.f32.mrf.mxu0  ;;  %v9303_v35 = vadd.f32 %v3264_v5, %v2591_v0 }
 0x1fa   : > { %v2551_v13 = vpop.f32.mrf.mxu1 }
 0x1fb   : > { %9907 = vst [vmem:[#allocation16_spill] sm:$0xff] %v9303_v35  ;;  %v2594_v31 = vadd.f32 %v2551_v13, %v9199_v22  ;;  %v9306_v30 = vpop.f32.mrf.mxu0  ;;  %v9308_v48 = vadd.f32 %v6621_v26, %v2596_v47 }
 0x1fc   : > { %v6588_v63 = vpop.f32.mrf.mxu1 }
 0x1fd   : > { %9908 = vst [vmem:[#allocation18_spill] sm:$0xff] %v9308_v48  ;;  %v2597_v36 = vadd.f32 %v6588_v63, %v9202_v53  ;;  %v9311_v57 = vpop.f32.mrf.mxu0  ;;  %v9313_v42 = vadd.f32 %v3277_v32, %v2594_v31 }
 0x1fe   : > { %v2554_v56 = vpop.f32.mrf.mxu1 }
 0x1ff   : > { %9909 = vst [vmem:[#allocation20_spill] sm:$0xff] %v9313_v42  ;;  %v2595_v7 = vadd.f32 %v2554_v56, %v9205_v34  ;;  %v9316_v55 = vpop.f32.mrf.mxu0  ;;  %v9318_v5 = vadd.f32 %v6622_v28, %v2597_v36 }
 0x200   : > { %v6627_v59 = vpop.f32.mrf.mxu1 }
 0x201   : > { %9910 = vst [vmem:[#allocation22_spill] sm:$0xff] %v9318_v5  ;;  %v9320_v22 = vpop.f32.mrf.mxu0  ;;  %v9322_v39 = vadd.f32 %v3280_v38, %v2595_v7 }
 0x202   : > { %v3635_v26 = vpop.f32.mrf.mxu1 }
 0x203   : > { %9911 = vst [vmem:[#allocation24_spill] sm:$0xff] %v9322_v39  ;;  %v9324_v3 = vpop.f32.mrf.mxu0 }
 0x204   : > { %v6628_v53 = vpop.f32.mrf.mxu1 }
 0x205   : > { %v9326_v4 = vpop.f32.mrf.mxu0  ;;  %v3765_v27 = vadd.f32 %v6628_v53, %v9214_v19 }
 0x206   : > { %v9328_v32 = vpop.f32.mrf.mxu1 }
 0x207   : > { %v9330_v44 = vpop.f32.mrf.mxu0 }
 0x208   : > { %v9332_v34 = vpop.f32.mrf.mxu1 }
 0x209   : > { %v9334_v54 = vpop.f32.mrf.mxu0 }
 0x20a   : > { %9912 = vst [vmem:[#allocation25_spill] sm:$0xff] %v9334_v54  ;;  %v9336_v28 = vpop.f32.mrf.mxu1 }
 0x20b   : > { %v9338_v10 = vpop.f32.mrf.mxu0 }
 0x20c   : > { %9913 = vst [vmem:[#allocation26_spill] sm:$0xff] %v9338_v10  ;;  %v9340_v38 = vpop.f32.mrf.mxu1 }
 0x20d   : > { %v9342_v0 = vpop.f32.mrf.mxu0 }
 0x20e   : > { %9914 = vst [vmem:[#allocation29_spill] sm:$0xff] %v9342_v0  ;;  %v9344_v23 = vpop.f32.mrf.mxu1 }
 0x20f   : > { %v9346_v47 = vpop.f32.mrf.mxu0 }
 0x210   : > { %9915 = vst [vmem:[#allocation30_spill] sm:$0xff] %v9346_v47  ;;  %v9348_v13 = vpop.f32.mrf.mxu1 }
 0x211   : > { %v9350_v31 = vpop.f32.mrf.mxu0 }
 0x212   : > { %9916 = vst [vmem:[#allocation31_spill] sm:$0xff] %v9350_v31  ;;  %v9352_v63 = vpop.f32.mrf.mxu1 }
 0x213   : > { %v9354_v36 = vpop.f32.mrf.mxu0 }
 0x214   : > { %9917 = vst [vmem:[#allocation32_spill] sm:$0xff] %v9354_v36  ;;  %v9356_v56 = vpop.f32.mrf.mxu1 }
 0x215   : > { %v9358_v7 = vpop.f32.mrf.mxu0 }
 0x216   : > { %9918 = vst [vmem:[#allocation33_spill] sm:$0xff] %v9358_v7  ;;  %v9360_v39 = vpop.f32.mrf.mxu1 }
 0x217   : > { %v9362_v5 = vpop.f32.mrf.mxu0 }
 0x218   : > { %9919 = vst [vmem:[#allocation34_spill] sm:$0xff] %v9362_v5  ;;  %v9364_v42 = vpop.f32.mrf.mxu1 }
 0x219   : > { %v9366_v48 = vpop.f32.mrf.mxu0 }
 0x21a   : > { %9920 = vst [vmem:[#allocation35_spill] sm:$0xff] %v9366_v48  ;;  %v9368_v35 = vpop.f32.mrf.mxu1 }
 0x21b   : > { %v9370_v1 = vpop.f32.mrf.mxu0 }
 0x21c   : > { %9921 = vst [vmem:[#allocation7_spill] sm:$0xff] %v9370_v1  ;;  %v9372_v17 = vpop.f32.mrf.mxu1 }
 0x21d   : > { %v9374_v12 = vpop.f32.mrf.mxu0 }
 0x21e   : > { %9922 = vst [vmem:[#allocation6_spill] sm:$0xff] %v9374_v12  ;;  %v9376_v61 = vpop.f32.mrf.mxu1 }
 0x21f   : > { %v9378_v36 = vpop.f32.mrf.mxu0 }
 0x220   : > { %9923 = vst [vmem:[#allocation9_spill] sm:$0xff] %v9378_v36  ;;  %v9380_v7 = vpop.f32.mrf.mxu1 }
 0x221   : > { %9924 = vst [vmem:[#allocation8_spill] sm:$0xff] %v9380_v7  ;;  %v9382_v18 = vpop.f32.mrf.mxu0 }
 0x222   : > { %9925 = vst [vmem:[#allocation10_spill] sm:$0xff] %v9382_v18  ;;  %v9384_v5 = vpop.f32.mrf.mxu1 }
 0x223   : > { %9926 = vst [vmem:[#allocation36_spill] sm:$0xff] %v9384_v5  ;;  %v9386_v58 = vpop.f32.mrf.mxu0 }
 0x224   : > { %9927 = vst [vmem:[#allocation37_spill] sm:$0xff] %v9386_v58  ;;  %v9388_v48 = vpop.f32.mrf.mxu1 }
 0x225   : > { %9928 = vst [vmem:[#allocation38_spill] sm:$0xff] %v9388_v48  ;;  %v9390_v31 = vpop.f32.mrf.mxu0 }
 0x226   : > { %9929 = vst [vmem:[#allocation39_spill] sm:$0xff] %v9390_v31  ;;  %v9392_v1 = vpop.f32.mrf.mxu1 }
 0x227   : > { %9930 = vst [vmem:[#allocation40_spill] sm:$0xff] %v9392_v1  ;;  %v9394_v43 = vpop.f32.mrf.mxu0 }
 0x228   : > { %9931 = vst [vmem:[#allocation41_spill] sm:$0xff] %v9394_v43  ;;  %v9396_v12 = vpop.f32.mrf.mxu1 }
 0x229   : > { %9932 = vst [vmem:[#allocation42_spill] sm:$0xff] %v9396_v12  ;;  %v9398_v40 = vpop.f32.mrf.mxu0 }
 0x22a   : > { %9933 = vst [vmem:[#allocation43_spill] sm:$0xff] %v9398_v40  ;;  %v9400_v36 = vpop.f32.mrf.mxu1 }
 0x22b   : > { %9934 = vst [vmem:[#allocation44_spill] sm:$0xff] %v9400_v36  ;;  %v9402_v47 = vpop.f32.mrf.mxu0 }
 0x22c   : > { %9935 = vst [vmem:[#allocation45_spill] sm:$0xff] %v9402_v47  ;;  %v9404_v18 = vpop.f32.mrf.mxu1 }
 0x22d   : > { %9936 = vst [vmem:[#allocation46_spill] sm:$0xff] %v9404_v18  ;;  %v6729_v0 = vpop.f32.mrf.mxu0 }
 0x22e   : > { %v9406_v58 = vpop.f32.mrf.mxu1 }
 0x22f   : > { %9937 = vst [vmem:[#allocation47_spill] sm:$0xff] %v9406_v58  ;;  %v5193_v48 = vpop.f32.mrf.mxu0 }
 0x230   : > { %v9408_v2 = vpop.f32.mrf.mxu1 }
 0x231   : > { %9938 = vst [vmem:[#allocation48_spill] sm:$0xff] %v9408_v2  ;;  %v6730_v31 = vpop.f32.mrf.mxu0  ;;  %v3764_v2 = vadd.f32 %v6627_v59, %v9208_v11  ;;  %v3763_v11 = vadd.f32 %v9328_v32, %v9217_v49  ;;  %v3768_v49 = vadd.f32 %v9332_v34, %v9220_v25 }
 0x232   : > { %v9410_v1 = vpop.f32.mrf.mxu1 }
 0x233   : > { %9939 = vst [vmem:[#allocation49_spill] sm:$0xff] %v9410_v1  ;;  %v5196_v43 = vpop.f32.mrf.mxu0 }
 0x234   : > { %v9412_v10 = vpop.f32.mrf.mxu1 }
 0x235   : > { %9940 = vst [vmem:[#allocation50_spill] sm:$0xff] %v9412_v10  ;;  %v9414_v12 = vpop.f32.mrf.mxu0  ;;  %v3762_v10 = vadd.f32 %v3635_v26, %v9211_v29  ;;  %v9449_v29 = vld [vmem:[%s9744_s2] ss:$0 sm:$0xff]  ;;  %v4127_v26 = vadd.f32 %v9281_v45, %v3765_v27  ;;  %v3769_v27 = vadd.f32 %v9340_v38, %v9226_v6 }
 0x236   : > { %v9416_v40 = vpop.f32.mrf.mxu1 }
 0x237   : > { %9941 = vst [vmem:[#allocation51_spill] sm:$0xff] %v9416_v40  ;;  %v9418_v36 = vpop.f32.mrf.mxu0 }
 0x238   : > { %v9420_v47 = vpop.f32.mrf.mxu1 }
 0x239   : > { %9942 = vst [vmem:[#allocation52_spill] sm:$0xff] %v9420_v47  ;;  %v9422_v18 = vpop.f32.mrf.mxu0  ;;  %v4126_v47 = vadd.f32 %v9271_v51, %v3764_v2 }
 0x23a   : > { %v9424_v58 = vpop.f32.mrf.mxu1 }
 0x23b   : > { %9943 = vst [vmem:[#allocation53_spill] sm:$0xff] %v9424_v58  ;;  %v9427_v54 = vpop.f32.mrf.mxu0 }
 0x23c   : > { %v9429_v1 = vpop.f32.mrf.mxu1 }
 0x23d   : > { %9944 = vst [vmem:[#allocation54_spill] sm:$0xff] %v9429_v1  ;;  %v9432_v5 = vpop.f32.mrf.mxu0  ;;  %v4124_v1 = vadd.f32 %v9276_v15, %v3762_v10 }
 0x23e   : > { %v9434_v40 = vpop.f32.mrf.mxu1 }
 0x23f   : > { %v9438_v7 = vpop.f32.mrf.mxu0 }
 0x240   : > { %v6695_v58 = vpop.f32.mrf.mxu1 }
 0x241   : > { %v4852_v59 = vadd.f32 %v6695_v58, %v4126_v47  ;;  %v9443_v33 = vpop.f32.mrf.mxu0  ;;  %v3766_v58 = vadd.f32 %v9336_v28, %v9223_v60 }
 0x242   : > { %v4723_v19 = vpop.f32.mrf.mxu1 }
 0x243   : > { %v5322_v2 = vadd.f32 %v6729_v0, %v4852_v59  ;;  %v4850_v51 = vadd.f32 %v4723_v19, %v4124_v1  ;;  %v9452_v53 = vpop.f32.mrf.mxu0  ;;  %v4125_v0 = vadd.f32 %v9286_v41, %v3763_v11  ;;  %v3767_v19 = vadd.f32 %v9344_v23, %v9229_v46 }
 0x244   : > { %v6696_v15 = vpop.f32.mrf.mxu1  ;;  %v4128_v11 = vadd.f32 %v9296_v16, %v3766_v58  ;;  %v4131_v46 = vadd.f32 %v9301_v8, %v3769_v27 }
 0x245   : > { %v5361_v32 = vadd.f32 %v9449_v29, %v5322_v2  ;;  %v5320_v10 = vadd.f32 %v5193_v48, %v4850_v51  ;;  %v4853_v47 = vadd.f32 %v6696_v15, %v4127_v26  ;;  %v9462_v1 = vpop.f32.mrf.mxu0  ;;  %v4130_v48 = vadd.f32 %v9291_v24, %v3768_v49 }
 0x246   : > { %v4726_v45 = vpop.f32.mrf.mxu1  ;;  %v4129_v58 = vadd.f32 %v9306_v30, %v3767_v19 }
 0x247   : > { %v5393_v59 = vmax.f32 %v5361_v32, 0.0  ;;  %v5359_v25 = vadd.f32 %v9449_v29, %v5320_v10  ;;  %v5323_v34 = vadd.f32 %v6730_v31, %v4853_v47  ;;  %v4851_v60 = vadd.f32 %v4726_v45, %v4125_v0  ;;  %v9467_v28 = vpop.f32.mrf.mxu0 }
 0x248   : > { %v6699_v41 = vpop.f32.mrf.mxu1  ;;  %v3772_v31 = vadd.f32 %v9348_v13, %v9232_v62  ;;  %v3770_v45 = vadd.f32 %v9352_v63, %v9235_v37  ;;  %v3771_v37 = vadd.f32 %v9360_v39, %v9241_v14 }
 0x249   : > { %v6269_v2 = vpack.c.bf16 %v5393_v59, %v5393_v59  ;;  %v5391_v51 = vmax.f32 %v5359_v25, 0.0  ;;  %v5362_v6 = vadd.f32 %v9449_v29, %v5323_v34  ;;  %v5321_v38 = vadd.f32 %v5196_v43, %v4851_v60  ;;  %v9474_v26 = vpop.f32.mrf.mxu0 }
 0x24a   : > { %v4856_v15 = vadd.f32 %v6699_v41, %v4130_v48  ;;  %v4739_v32 = vpop.f32.mrf.mxu1  ;;  %v3773_v59 = vadd.f32 %v9356_v56, %v9238_v50  ;;  %v4134_v30 = vadd.f32 %v9311_v57, %v3772_v31  ;;  %v4132_v14 = vadd.f32 %v9316_v55, %v3770_v45 }
 0x24b   : > { %5554 = vst.msk [vmem:[%s9479_s9 + $0x8] sm:$0xf] %vm5551_vm2, %v6269_v2  ;;  %v6267_v24 = vpack.c.bf16 %v5391_v51, %v5391_v51  ;;  %v5394_v16 = vmax.f32 %v5362_v6, 0.0  ;;  %v5360_v23 = vadd.f32 %v9449_v29, %v5321_v38  ;;  %v4854_v43 = vadd.f32 %v4739_v32, %v4128_v11  ;;  %v9484_v49 = vpop.f32.mrf.mxu0 }
 0x24c   : > { %v5326_v62 = vadd.f32 %v9414_v12, %v4856_v15  ;;  %v6700_v13 = vpop.f32.mrf.mxu1  ;;  %v4135_v6 = vadd.f32 %v9320_v22, %v3773_v59  ;;  %v4133_v55 = vadd.f32 %v9324_v3, %v3771_v37 }
 0x24d   : > { %5552 = vst.msk [vmem:[%s9479_s9] sm:$0xf] %vm5551_vm2, %v6267_v24  ;;  %v6270_v8 = vpack.c.bf16 %v5394_v16, %v5394_v16  ;;  %v5392_v10 = vmax.f32 %v5360_v23, 0.0  ;;  %v5324_v47 = vadd.f32 %v9418_v36, %v4854_v43  ;;  %v4857_v0 = vadd.f32 %v6700_v13, %v4131_v46  ;;  %v9491_v27 = vpop.f32.mrf.mxu0 }
 0x24e   : > { %v5365_v12 = vadd.f32 %v9449_v29, %v5326_v62  ;;  %v4742_v25 = vpop.f32.mrf.mxu1  ;;  %v3774_v46 = vadd.f32 %v9368_v35, %v9247_v21 }
 0x24f   : > { %5555 = vst.msk [vmem:[%s9479_s9 + $0xc] sm:$0xf] %vm5551_vm2, %v6270_v8  ;;  %v6268_v34 = vpack.c.bf16 %v5392_v10, %v5392_v10  ;;  %v5363_v36 = vadd.f32 %v9449_v29, %v5324_v47  ;;  %v5327_v60 = vadd.f32 %v9422_v18, %v4857_v0  ;;  %v4855_v19 = vadd.f32 %v4742_v25, %v4129_v58  ;;  %v9503_v48 = vpop.f32.mrf.mxu0  ;;  %v9945_v25 = vld [vmem:[#allocation11_spill] sm:$0xff] }
 0x250   : > { %v5397_v63 = vmax.f32 %v5365_v12, 0.0  ;;  %v6703_v50 = vpop.f32.mrf.mxu1  ;;  %v3776_v18 = vadd.f32 %v9364_v42, %v9244_v9  ;;  %v3777_v8 = vadd.f32 %v9372_v17, %v9250_v52  ;;  %v3775_v10 = vadd.f32 %v9376_v61, %v9253_v20  ;;  %v9946_v52 = vld [vmem:[#allocation8_spill] sm:$0xff] }
 0x251   : > { %5553 = vst.msk [vmem:[%s9479_s9 + $0x4] sm:$0xf] %vm5551_vm2, %v6268_v34  ;;  %v5395_v56 = vmax.f32 %v5363_v36, 0.0  ;;  %v5366_v57 = vadd.f32 %v9449_v29, %v5327_v60  ;;  %v5325_v41 = vadd.f32 %v9427_v54, %v4855_v19  ;;  %v4860_v11 = vadd.f32 %v6703_v50, %v4134_v30  ;;  %v9511_v2 = vpop.f32.mrf.mxu0  ;;  %v9947_v60 = vld [vmem:[#allocation13_spill] sm:$0xff]  ;;  %v9948_v19 = vld [vmem:[#allocation36_spill] sm:$0xff] }
 0x252   : > { %v6273_v51 = vpack.c.bf16 %v5397_v63, %v5397_v63  ;;  %v4755_v39 = vpop.f32.mrf.mxu1  ;;  %v4138_v21 = vadd.f32 %v9326_v4, %v3776_v18  ;;  %v4136_v0 = vadd.f32 %v9330_v44, %v3774_v46  ;;  %v3780_v17 = vadd.f32 %v9946_v52, %v9945_v25  ;;  %v9949_v63 = vld [vmem:[#allocation25_spill] sm:$0xff] }
 0x253   : > { %v6271_v38 = vpack.c.bf16 %v5395_v56, %v5395_v56  ;;  %v5398_v31 = vmax.f32 %v5366_v57, 0.0  ;;  %v5364_v15 = vadd.f32 %v9449_v29, %v5325_v41  ;;  %v5330_v32 = vadd.f32 %v9432_v5, %v4860_v11  ;;  %v9519_v54 = vpop.f32.mrf.mxu0  ;;  %v9950_v57 = vld [vmem:[#allocation26_spill] sm:$0xff]  ;;  %v9960_v52 = vld [vmem:[#allocation21_spill] sm:$0xff] }
 0x254   : > { %5558 = vst.msk [vmem:[%s9479_s9 + $0x18] sm:$0xf] %vm5551_vm2, %v6273_v51  ;;  %v4858_v9 = vadd.f32 %v4755_v39, %v4132_v14  ;;  %v6704_v42 = vpop.f32.mrf.mxu1  ;;  %v3778_v37 = vadd.f32 %v9948_v19, %v9947_v60  ;;  %v4139_v50 = vadd.f32 %v9949_v63, %v3777_v8  ;;  %v4137_v41 = vadd.f32 %v9950_v57, %v3775_v10  ;;  %v9951_v39 = vld [vmem:[#allocation15_spill] sm:$0xff] }
 0x255   : > { %5556 = vst.msk [vmem:[%s9479_s9 + $0x10] sm:$0xf] %vm5551_vm2, %v6271_v38  ;;  %v6274_v22 = vpack.c.bf16 %v5398_v31, %v5398_v31  ;;  %v5396_v24 = vmax.f32 %v5364_v15, 0.0  ;;  %v5369_v16 = vadd.f32 %v9449_v29, %v5330_v32  ;;  %v4861_v23 = vadd.f32 %v6704_v42, %v4135_v6  ;;  %v9529_v5 = vpop.f32.mrf.mxu0  ;;  %v9952_v6 = vld [vmem:[#allocation38_spill] sm:$0xff]  ;;  %v9953_v32 = vld [vmem:[#allocation29_spill] sm:$0xff]  ;;  %v9957_v10 = vld [vmem:[#allocation19_spill] sm:$0xff] }
 0x256   : > { %v5328_v43 = vadd.f32 %v9438_v7, %v4858_v9  ;;  %v4758_v62 = vpop.f32.mrf.mxu1  ;;  %v3781_v38 = vadd.f32 %v9952_v6, %v9951_v39  ;;  %v4142_v46 = vadd.f32 %v9953_v32, %v3780_v17  ;;  %v9961_v17 = vld [vmem:[#allocation44_spill] sm:$0xff]  ;;  %v9966_v6 = vld [vmem:[#allocation27_spill] sm:$0xff]  ;;  %v9968_v32 = vld [vmem:[#allocation34_spill] sm:$0xff] }
 0x257   : > { %5559 = vst.msk [vmem:[%s9479_s9 + $0x1c] sm:$0xf] %vm5551_vm2, %v6274_v22  ;;  %v6272_v35 = vpack.c.bf16 %v5396_v24, %v5396_v24  ;;  %v5401_v13 = vmax.f32 %v5369_v16, 0.0  ;;  %v5331_v3 = vadd.f32 %v9443_v33, %v4861_v23  ;;  %v4859_v58 = vadd.f32 %v4758_v62, %v4133_v55  ;;  %v9542_v4 = vpop.f32.mrf.mxu0  ;;  %v9954_v16 = vld [vmem:[#allocation30_spill] sm:$0xff] }
 0x258   : > { %v5367_v47 = vadd.f32 %v9449_v29, %v5328_v43  ;;  %v6707_v7 = vpop.f32.mrf.mxu1  ;;  %v4140_v23 = vadd.f32 %v9954_v16, %v3778_v37  ;;  %v9962_v37 = vld [vmem:[#allocation23_spill] sm:$0xff] }
 0x259   : > { %5557 = vst.msk [vmem:[%s9479_s9 + $0x14] sm:$0xf] %vm5551_vm2, %v6272_v35  ;;  %v6277_v45 = vpack.c.bf16 %v5401_v13, %v5401_v13  ;;  %v5370_v33 = vadd.f32 %v9449_v29, %v5331_v3  ;;  %v5329_v59 = vadd.f32 %v9452_v53, %v4859_v58  ;;  %v4864_v12 = vadd.f32 %v6707_v7, %v4138_v21  ;;  %v9558_v11 = vpop.f32.mrf.mxu0  ;;  %v9955_v3 = vld [vmem:[#allocation17_spill] sm:$0xff]  ;;  %v9956_v58 = vld [vmem:[#allocation40_spill] sm:$0xff]  ;;  %v9969_v16 = vld [vmem:[#allocation35_spill] sm:$0xff] }
 0x25a   : > { %v5399_v30 = vmax.f32 %v5367_v47, 0.0  ;;  %v4771_v20 = vpop.f32.mrf.mxu1  ;;  %v3779_v8 = vadd.f32 %v9956_v58, %v9955_v3  ;;  %v9958_v47 = vld [vmem:[#allocation42_spill] sm:$0xff]  ;;  %v9970_v3 = vld [vmem:[#allocation28_spill] sm:$0xff] }
 0x25b   : > { %5562 = vst.msk [vmem:[%s9479_s9 + $0x28] sm:$0xf] %vm5551_vm2, %v6277_v45  ;;  %v5402_v61 = vmax.f32 %v5370_v33, 0.0  ;;  %v5368_v44 = vadd.f32 %v9449_v29, %v5329_v59  ;;  %v5334_v34 = vadd.f32 %v9462_v1, %v4864_v12  ;;  %v4862_v36 = vadd.f32 %v4771_v20, %v4136_v0  ;;  %v9572_v43 = vpop.f32.mrf.mxu0  ;;  %v9959_v45 = vld [vmem:[#allocation31_spill] sm:$0xff]  ;;  %v9971_v58 = vld [vmem:[#allocation48_spill] sm:$0xff] }
 0x25c   : > { %v6275_v53 = vpack.c.bf16 %v5399_v30, %v5399_v30  ;;  %v6708_v56 = vpop.f32.mrf.mxu1  ;;  %v3784_v7 = vadd.f32 %v9958_v47, %v9957_v10  ;;  %v4143_v33 = vadd.f32 %v9959_v45, %v3781_v38  ;;  %v3782_v30 = vadd.f32 %v9961_v17, %v9960_v52  ;;  %v9972_v10 = vld [vmem:[#allocation12_spill] sm:$0xff]  ;;  %v9973_v47 = vld [vmem:[#allocation49_spill] sm:$0xff]  ;;  %v9976_v52 = vld [vmem:[#allocation50_spill] sm:$0xff] }
 0x25d   : > { %v6278_v18 = vpack.c.bf16 %v5402_v61, %v5402_v61  ;;  %v5400_v51 = vmax.f32 %v5368_v44, 0.0  ;;  %v5373_v14 = vadd.f32 %v9449_v29, %v5334_v34  ;;  %v5332_v1 = vadd.f32 %v9467_v28, %v4862_v36  ;;  %v9589_v44 = vpop.f32.mrf.mxu0 }
 0x25e   : > { %5560 = vst.msk [vmem:[%s9479_s9 + $0x20] sm:$0xf] %vm5551_vm2, %v6275_v53  ;;  %v4865_v31 = vadd.f32 %v6708_v56, %v4139_v50  ;;  %v4774_v15 = vpop.f32.mrf.mxu1  ;;  %v9963_v53 = vld [vmem:[#allocation46_spill] sm:$0xff]  ;;  %v9964_v50 = vld [vmem:[#allocation32_spill] sm:$0xff] }
 0x25f   : > { %5563 = vst.msk [vmem:[%s9479_s9 + $0x2c] sm:$0xf] %vm5551_vm2, %v6278_v18  ;;  %v6276_v9 = vpack.c.bf16 %v5400_v51, %v5400_v51  ;;  %v5405_v42 = vmax.f32 %v5373_v14, 0.0  ;;  %v5371_v55 = vadd.f32 %v9449_v29, %v5332_v1  ;;  %v4863_v22 = vadd.f32 %v4774_v15, %v4137_v41  ;;  %v9965_v41 = vld [vmem:[#allocation33_spill] sm:$0xff] }
 0x260   : > { %v5335_v24 = vadd.f32 %v9474_v26, %v4865_v31  ;;  %v6711_v28 = vpop.f32.mrf.mxu1  ;;  %v4141_v56 = vadd.f32 %v9964_v50, %v3779_v8  ;;  %v4146_v18 = vadd.f32 %v9965_v41, %v3784_v7  ;;  %v3788_v8 = vadd.f32 %v9971_v58, %v9970_v3  ;;  %v9987_v58 = vld [vmem:[#allocation22_spill] sm:$0xff] }
 0x261   : > { %5561 = vst.msk [vmem:[%s9479_s9 + $0x24] sm:$0xf] %vm5551_vm2, %v6276_v9  ;;  %v6281_v62 = vpack.c.bf16 %v5405_v42, %v5405_v42  ;;  %v5403_v21 = vmax.f32 %v5371_v55, 0.0  ;;  %v5333_v35 = vadd.f32 %v9484_v49, %v4863_v22  ;;  %v4868_v13 = vadd.f32 %v6711_v28, %v4142_v46  ;;  %v5289_v9 = vpop.f32.mrf.mxu0 }
 0x262   : > { %v5374_v26 = vadd.f32 %v9449_v29, %v5335_v24  ;;  %v4787_v0 = vpop.f32.mrf.mxu1  ;;  %v4144_v46 = vadd.f32 %v9968_v32, %v3782_v30  ;;  %v3786_v7 = vadd.f32 %v9973_v47, %v9972_v10 }
 0x263   : > { %5566 = vst.msk [vmem:[%s9479_s9 + $0x38] sm:$0xf] %vm5551_vm2, %v6281_v62  ;;  %v6279_v59 = vpack.c.bf16 %v5403_v21, %v5403_v21  ;;  %v5372_v12 = vadd.f32 %v9449_v29, %v5333_v35  ;;  %v5338_v49 = vadd.f32 %v9491_v27, %v4868_v13  ;;  %v4866_v25 = vadd.f32 %v4787_v0, %v4140_v23  ;;  %v9974_v0 = vld [vmem:[#allocation7_spill] sm:$0xff] }
 0x264   : > { %v5406_v20 = vmax.f32 %v5374_v26, 0.0  ;;  %v6712_v61 = vpop.f32.mrf.mxu1  ;;  %v3785_v27 = vadd.f32 %v9963_v53, %v9962_v37  ;;  %v9978_v37 = vld [vmem:[#allocation51_spill] sm:$0xff] }
 0x265   : > { %5564 = vst.msk [vmem:[%s9479_s9 + $0x30] sm:$0xf] %vm5551_vm2, %v6279_v59  ;;  %v5404_v34 = vmax.f32 %v5372_v12, 0.0  ;;  %v5377_v36 = vadd.f32 %v9449_v29, %v5338_v49  ;;  %v5336_v60 = vadd.f32 %v9503_v48, %v4866_v25  ;;  %v4869_v19 = vadd.f32 %v6712_v61, %v4143_v33  ;;  %v9967_v48 = vld [vmem:[#allocation47_spill] sm:$0xff]  ;;  %v6754_v33 = vpop.f32.mrf.mxu0  ;;  %v9975_v25 = vld [vmem:[#allocation14_spill] sm:$0xff] }
 0x266   : > { %v6282_v63 = vpack.c.bf16 %v5406_v20, %v5406_v20  ;;  %v4790_v57 = vpop.f32.mrf.mxu1  ;;  %v3783_v38 = vadd.f32 %v9967_v48, %v9966_v6  ;;  %v4147_v23 = vadd.f32 %v9969_v16, %v3785_v27  ;;  %v3789_v17 = vadd.f32 %v9976_v52, %v9975_v25  ;;  %v9979_v27 = vld [vmem:[#allocation6_spill] sm:$0xff] }
 0x267   : > { %v6280_v51 = vpack.c.bf16 %v5404_v34, %v5404_v34  ;;  %v5409_v14 = vmax.f32 %v5377_v36, 0.0  ;;  %v5375_v1 = vadd.f32 %v9449_v29, %v5336_v60  ;;  %v5339_v39 = vadd.f32 %v9511_v2, %v4869_v19  ;;  %v9977_v19 = vld [vmem:[#allocation16_spill] sm:$0xff]  ;;  %v5292_v41 = vpop.f32.mrf.mxu0 }
 0x268   : > { %5567 = vst.msk [vmem:[%s9479_s9 + $0x3c] sm:$0xf] %vm5551_vm2, %v6282_v63  ;;  %v4867_v31 = vadd.f32 %v4790_v57, %v4141_v56  ;;  %v6715_v15 = vpop.f32.mrf.mxu1  ;;  %v4145_v45 = vadd.f32 %v9974_v0, %v3783_v38  ;;  %v3787_v53 = vadd.f32 %v9978_v37, %v9977_v19  ;;  %v4150_v63 = vadd.f32 %v9979_v27, %v3788_v8  ;;  %v9980_v56 = vld [vmem:[#allocation9_spill] sm:$0xff]  ;;  %v9988_v8 = vld [vmem:[#allocation54_spill] sm:$0xff] }
 0x269   : > { %5565 = vst.msk [vmem:[%s9479_s9 + $0x34] sm:$0xf] %vm5551_vm2, %v6280_v51  ;;  %v6285_v42 = vpack.c.bf16 %v5409_v14, %v5409_v14  ;;  %v5407_v55 = vmax.f32 %v5375_v1, 0.0  ;;  %v5378_v22 = vadd.f32 %v9449_v29, %v5339_v39  ;;  %v4872_v24 = vadd.f32 %v6715_v15, %v4146_v18  ;;  %v9982_v39 = vld [vmem:[#allocation52_spill] sm:$0xff] }
 0x26a   : > { %v5337_v2 = vadd.f32 %v9519_v54, %v4867_v31  ;;  %v4803_v28 = vpop.f32.mrf.mxu1  ;;  %v4148_v57 = vadd.f32 %v9980_v56, %v3786_v7  ;;  %v9983_v31 = vld [vmem:[#allocation10_spill] sm:$0xff]  ;;  %v3793_v10 = vadd.f32 %v9988_v8, %v9987_v58  ;;  %v9989_v7 = vld [vmem:[#allocation39_spill] sm:$0xff]  ;;  %v9993_v56 = vld [vmem:[#allocation45_spill] sm:$0xff] }
 0x26b   : > { %5570 = vst.msk [vmem:[%s9479_s9 + $0x48] sm:$0xf] %vm5551_vm2, %v6285_v42  ;;  %v6283_v62 = vpack.c.bf16 %v5407_v55, %v5407_v55  ;;  %v5410_v21 = vmax.f32 %v5378_v22, 0.0  ;;  %v5342_v35 = vadd.f32 %v9529_v5, %v4872_v24  ;;  %v4870_v13 = vadd.f32 %v4803_v28, %v4144_v46  ;;  %v9984_v24 = vld [vmem:[#allocation37_spill] sm:$0xff]  ;;  %v6757_v28 = vpop.f32.mrf.mxu0 }
 0x26c   : > { %v5376_v26 = vadd.f32 %v9449_v29, %v5337_v2  ;;  %v6716_v54 = vpop.f32.mrf.mxu1  ;;  %v4151_v15 = vadd.f32 %v9983_v31, %v3789_v17  ;;  %v4149_v2 = vadd.f32 %v9984_v24, %v3787_v53 }
 0x26d   : > { %5568 = vst.msk [vmem:[%s9479_s9 + $0x40] sm:$0xf] %vm5551_vm2, %v6283_v62  ;;  %v6286_v59 = vpack.c.bf16 %v5410_v21, %v5410_v21  ;;  %v5381_v12 = vadd.f32 %v9449_v29, %v5342_v35  ;;  %v5340_v5 = vadd.f32 %v9542_v4, %v4870_v13  ;;  %v4873_v49 = vadd.f32 %v6716_v54, %v4147_v23  ;;  %v9985_v35 = vld [vmem:[#allocation20_spill] sm:$0xff]  ;;  %v9986_v13 = vld [vmem:[#allocation53_spill] sm:$0xff]  ;;  %v5305_v25 = vpop.f32.mrf.mxu0 }
 0x26e   : > { %v5408_v30 = vmax.f32 %v5376_v26, 0.0  ;;  %v4806_v20 = vpop.f32.mrf.mxu1  ;;  %v3790_v3 = vadd.f32 %v9986_v13, %v9985_v35 }
 0x26f   : > { %5571 = vst.msk [vmem:[%s9479_s9 + $0x4c] sm:$0xf] %vm5551_vm2, %v6286_v59  ;;  %v5413_v61 = vmax.f32 %v5381_v12, 0.0  ;;  %v5379_v34 = vadd.f32 %v9449_v29, %v5340_v5  ;;  %v5343_v36 = vadd.f32 %v9558_v11, %v4873_v49  ;;  %v4871_v60 = vadd.f32 %v4806_v20, %v4145_v45  ;;  %v9981_v11 = vld [vmem:[#allocation18_spill] sm:$0xff]  ;;  %v9990_v59 = vld [vmem:[#allocation24_spill] sm:$0xff] }
 0x270   : > { %v6284_v4 = vpack.c.bf16 %v5408_v30, %v5408_v30  ;;  %v6719_v50 = vpop.f32.mrf.mxu1  ;;  %v3792_v6 = vadd.f32 %v9982_v39, %v9981_v11  ;;  %v3791_v12 = vadd.f32 %v9434_v40, %v9990_v59 }
 0x271   : > { %v6289_v18 = vpack.c.bf16 %v5413_v61, %v5413_v61  ;;  %v5411_v51 = vmax.f32 %v5379_v34, 0.0  ;;  %v5382_v14 = vadd.f32 %v9449_v29, %v5343_v36  ;;  %v5341_v1 = vadd.f32 %v9572_v43, %v4871_v60  ;;  %v9991_v34 = vld [vmem:[#allocation41_spill] sm:$0xff]  ;;  %v9992_v60 = vld [vmem:[#allocation43_spill] sm:$0xff] }
 0x272   : > { %5569 = vst.msk [vmem:[%s9479_s9 + $0x44] sm:$0xf] %vm5551_vm2, %v6284_v4  ;;  %v4876_v48 = vadd.f32 %v6719_v50, %v4150_v63  ;;  %v4819_v38 = vpop.f32.mrf.mxu1  ;;  %v4154_v26 = vadd.f32 %v9989_v7, %v3792_v6  ;;  %v4152_v36 = vadd.f32 %v9991_v34, %v3790_v3  ;;  %v4155_v19 = vadd.f32 %v9992_v60, %v3793_v10  ;;  %v6758_v63 = vpop.f32.mrf.mxu0 }
 0x273   : > { %5574 = vst.msk [vmem:[%s9479_s9 + $0x58] sm:$0xf] %vm5551_vm2, %v6289_v18  ;;  %v6287_v32 = vpack.c.bf16 %v5411_v51, %v5411_v51  ;;  %v5414_v46 = vmax.f32 %v5382_v14, 0.0  ;;  %v5380_v42 = vadd.f32 %v9449_v29, %v5341_v1  ;;  %v4874_v55 = vadd.f32 %v4819_v38, %v4148_v57 }
 0x274   : > { %v5346_v22 = vadd.f32 %v9589_v44, %v4876_v48  ;;  %v6720_v43 = vpop.f32.mrf.mxu1  ;;  %v4153_v57 = vadd.f32 %v9993_v56, %v3791_v12 }
 0x275   : > { %5572 = vst.msk [vmem:[%s9479_s9 + $0x50] sm:$0xf] %vm5551_vm2, %v6287_v32  ;;  %v6290_v16 = vpack.c.bf16 %v5414_v46, %v5414_v46  ;;  %v5412_v23 = vmax.f32 %v5380_v42, 0.0  ;;  %v5344_v62 = vadd.f32 %v5289_v9, %v4874_v55  ;;  %v4877_v21 = vadd.f32 %v6720_v43, %v4151_v15  ;;  %v5308_v15 = vpop.f32.mrf.mxu0 }
 0x276   : > { %v5385_v47 = vadd.f32 %v9449_v29, %v5346_v22  ;;  %v4822_v44 = vpop.f32.mrf.mxu1 }
 0x277   : > { %5575 = vst.msk [vmem:[%s9479_s9 + $0x5c] sm:$0xf] %vm5551_vm2, %v6290_v16  ;;  %v6288_v54 = vpack.c.bf16 %v5412_v23, %v5412_v23  ;;  %v5383_v0 = vadd.f32 %v9449_v29, %v5344_v62  ;;  %v5347_v45 = vadd.f32 %v6754_v33, %v4877_v21  ;;  %v4875_v9 = vadd.f32 %v4822_v44, %v4149_v2 }
 0x278   : > { %v5417_v5 = vmax.f32 %v5385_v47, 0.0  ;;  %v6723_v49 = vpop.f32.mrf.mxu1 }
 0x279   : > { %5573 = vst.msk [vmem:[%s9479_s9 + $0x54] sm:$0xf] %vm5551_vm2, %v6288_v54  ;;  %v5415_v52 = vmax.f32 %v5383_v0, 0.0  ;;  %v5386_v17 = vadd.f32 %v9449_v29, %v5347_v45  ;;  %v5345_v30 = vadd.f32 %v5292_v41, %v4875_v9  ;;  %v4880_v20 = vadd.f32 %v6723_v49, %v4154_v26 }
 0x27a   : > { %v6293_v61 = vpack.c.bf16 %v5417_v5, %v5417_v5  ;;  %v4835_v33 = vpop.f32.mrf.mxu1 }
 0x27b   : > { %v6291_v37 = vpack.c.bf16 %v5415_v52, %v5415_v52  ;;  %v5418_v40 = vmax.f32 %v5386_v17, 0.0  ;;  %v5384_v53 = vadd.f32 %v9449_v29, %v5345_v30  ;;  %v5350_v4 = vadd.f32 %v6757_v28, %v4880_v20 }
 0x27c   : > { %5578 = vst.msk [vmem:[%s9479_s9 + $0x68] sm:$0xf] %vm5551_vm2, %v6293_v61  ;;  %v4878_v27 = vadd.f32 %v4835_v33, %v4152_v36  ;;  %v6724_v50 = vpop.f32.mrf.mxu1 }
 0x27d   : > { %5576 = vst.msk [vmem:[%s9479_s9 + $0x60] sm:$0xf] %vm5551_vm2, %v6291_v37  ;;  %v6294_v41 = vpack.c.bf16 %v5418_v40, %v5418_v40  ;;  %v5416_v18 = vmax.f32 %v5384_v53, 0.0  ;;  %v5389_v51 = vadd.f32 %v9449_v29, %v5350_v4  ;;  %v4881_v14 = vadd.f32 %v6724_v50, %v4155_v19 }
 0x27e   : > { %v5348_v1 = vadd.f32 %v5305_v25, %v4878_v27  ;;  %v4838_v11 = vpop.f32.mrf.mxu1 }
 0x27f   : > { %5579 = vst.msk [vmem:[%s9479_s9 + $0x6c] sm:$0xf] %vm5551_vm2, %v6294_v41  ;;  %v6292_v39 = vpack.c.bf16 %v5416_v18, %v5416_v18  ;;  %v5421_v6 = vmax.f32 %v5389_v51, 0.0  ;;  %v5351_v48 = vadd.f32 %v6758_v63, %v4881_v14  ;;  %v4879_v38 = vadd.f32 %v4838_v11, %v4153_v57 }
 0x280   : > { %v5387_v31 = vadd.f32 %v9449_v29, %v5348_v1 }
 0x281   : > { %5577 = vst.msk [vmem:[%s9479_s9 + $0x64] sm:$0xf] %vm5551_vm2, %v6292_v39  ;;  %v6297_v32 = vpack.c.bf16 %v5421_v6, %v5421_v6  ;;  %v5390_v46 = vadd.f32 %v9449_v29, %v5351_v48  ;;  %v5349_v42 = vadd.f32 %v5308_v15, %v4879_v38 }
 0x282   : > { %v5419_v55 = vmax.f32 %v5387_v31, 0.0 }
 0x283   : > { %5582 = vst.msk [vmem:[%s9479_s9 + $0x78] sm:$0xf] %vm5551_vm2, %v6297_v32  ;;  %v5422_v22 = vmax.f32 %v5390_v46, 0.0  ;;  %v5388_v43 = vadd.f32 %v9449_v29, %v5349_v42 }
 0x284   : > { %v6295_v24 = vpack.c.bf16 %v5419_v55, %v5419_v55 }
 0x285   : > { %v6298_v2 = vpack.c.bf16 %v5422_v22, %v5422_v22  ;;  %v5420_v28 = vmax.f32 %v5388_v43, 0.0 }
 0x286   : > { %5580 = vst.msk [vmem:[%s9479_s9 + $0x70] sm:$0xf] %vm5551_vm2, %v6295_v24 }
 0x287   : > { %5583 = vst.msk [vmem:[%s9479_s9 + $0x7c] sm:$0xf] %vm5551_vm2, %v6298_v2  ;;  %v6296_v29 = vpack.c.bf16 %v5420_v28, %v5420_v28 }
 0x289   : > { %5581 = vst.msk [vmem:[%s9479_s9 + $0x74] sm:$0xf] %vm5551_vm2, %v6296_v29 }
 0x28a   : > { %6886 = shalt.err (!%p6883_p5)
}
 0x28b   : > { %s6887_s29 = scalar_lea.hbm %s9687_s21, 2048  ;;  %s6891_s5 = scalar_lea.hbm %s9745_s3, 4096 }
 0x28c   : > { %p6888_p6 = scmp.ne.s32.totalorder %s9687_s21, %s6887_s29  ;;  %p6892_p10 = scmp.lt.s32.totalorder %s9687_s21, %s9745_s3 }
 0x28d   : > { %p6893_p11 = scmp.lt.s32.totalorder %s6891_s5, %s6887_s29 }
 0x28e   : > { %p6889_p7 = pnand %p6888_p6, %p7016_p4 }
 0x28f   : > { %p6894_p12 = por %p6893_p11, %p6892_p10 }
 0x290   : > { %p6890_p9 = pneg %p6889_p7 }
 0x292   : > { %p6895_p13 = pnand %p6894_p12, %p6890_p9 }
 0x294   : > { %6898 = shalt.err (!%p6895_p13)
}
 0x295   : > { %s6954_s8 = smov 64   ;;  %s6955_s9 = smov 4  }
 0x296   : > { %6761 = dma.vmem_to_hbm [thread:$0]  (%p7016_p4), %s9689_s11, 2048, %s9687_s21, %s9697_s15, %s6954_s8, %s6954_s8, %s6955_s9  }
 0x297 PF: > { %p6767_p0 = scmp.ge.s32.totalorder %s6949_s17, 2  ;;  %s5616_s10 = sand.u32 1, %s6929_s12  }
 0x298   : > { %s5617_s18 = scalar_lea.sflag [#allocation4], %s5616_s10 }
 0x299   : > { %p6764_p1 = pnand %p6767_p0, %p7023_p8 }
 0x29b   : > { %p6765_p2 = pneg %p6764_p1 }
 0x29d   : > { %6924 = dma.done.wait (%p6765_p2), %s5617_s18, 2048  }
 0x29e   : > { %6926 = vsyncadd (%p6765_p2), %s5617_s18, 4294965248  ;;  %s16_s17 = sadd.s32 1, %s6949_s17   ;;  %s9994_s12 = smov %s6933_s13 }
 0x29f   : > { %p13_p3 = scmp.ge.s32.totalorder %s16_s17, 4   ;;  %s9995_s13 = smov %s6937_s14 }
 0x2a0   : > { %s9996_s14 = smov %s7029_s25  ;;  %s9997_s15 = smov %s6945_s16 }
 0x2a1   : > { %s9998_s16 = smov %s10000_s20  ;;  %15 = sbr.rel (!%p13_p3) target bundleno = 4 (0x4), region = 84 }
 0x2a6   :  { %5622 = vsyncpa [#allocation4], 1 }
 0x2a7   :  { %5624 = vsyncpa [#allocation4 + $0x1], 1 }

</bundles_post_ra>
